<compile_context>
chip_gen: v5e
topology: v5e:2x2
jax: 0.10.0
libtpu: 0.0.40
codegen_flags: <defaults>
</compile_context>

<pallas_src>
import functools

import jax
import jax.numpy as jnp
from jax.experimental import pallas as pl
from jax.experimental.pallas import tpu as pltpu


D_IN, D_H1, D_LAT, D_H2 = 1024, 512, 256, 512   # fc1:1024->512, fc21/22:512->256, fc3:256->512, fc4:512->1024


# ------------------------------ Pallas kernel ------------------------------ #

def _vae_fused_kernel(x_ref, eps_ref,
                      w1_ref, b1_ref, w2_ref, b2_ref,
                      w3_ref, b3_ref, w4_ref, b4_ref,
                      dec_ref, z_ref, mu_ref, logvar_ref):
    """Whole VAE forward for one batch tile, entirely in VMEM."""
    x = x_ref[...]

    # fc1 + ReLU
    h1 = jnp.dot(x, w1_ref[...], preferred_element_type=jnp.float32) + b1_ref[...]
    h1 = jnp.maximum(h1, 0.0)

    # fc21 / fc22 packed into a single GEMM: w2 = [w21 | w22] along outputs
    h2 = jnp.dot(h1, w2_ref[...], preferred_element_type=jnp.float32) + b2_ref[...]
    mu = h2[:, :D_LAT]
    logvar = h2[:, D_LAT:]

    # reparametrize: z = eps * exp(0.5*logvar) + mu
    std = jnp.exp(0.5 * logvar)
    z = eps_ref[...] * std + mu

    # fc3 + ReLU
    h3 = jnp.dot(z, w3_ref[...], preferred_element_type=jnp.float32) + b3_ref[...]
    h3 = jnp.maximum(h3, 0.0)

    # fc4 + sigmoid
    logits = jnp.dot(h3, w4_ref[...], preferred_element_type=jnp.float32) + b4_ref[...]
    dec_ref[...] = 1.0 / (1.0 + jnp.exp(-logits))

    z_ref[...] = z
    mu_ref[...] = mu
    logvar_ref[...] = logvar


# ------------------------------ host wrapper ------------------------------- #

def cifar_single_vae_forward(x, eps, params, *, batch_tile=128):
    """x: [B, 1024], eps: [B, 256]. Returns (decoded, z, mu, logvar)."""
    B, D = x.shape
    assert D == D_IN and eps.shape == (B, D_LAT)

    # Batch tiling: single full-array tile for small B (exempt from the
    # (8,128) rule), otherwise 8/128-aligned tiles sharded across cores.
    TB = B if B <= batch_tile else batch_tile
    Bp = ((B + TB - 1) // TB) * TB
    if Bp != B:
        x = jnp.pad(x, ((0, Bp - B), (0, 0)))
        eps = jnp.pad(eps, ((0, Bp - B), (0, 0)))

    w1, b1 = params["w1"], params["b1"]
    w2 = jnp.concatenate([params["w21"], params["w22"]], axis=1)   # [512, 512]
    b2 = jnp.concatenate([params["b21"], params["b22"]], axis=1)   # [1, 512]
    w3, b3 = params["w3"], params["b3"]
    w4, b4 = params["w4"], params["b4"]

    def full(a):   # weight/bias: whole array resident, constant block index
        return pl.BlockSpec(a.shape, lambda i: (0, 0))

    def row(cols):  # batch-tiled activations
        return pl.BlockSpec((TB, cols), lambda i: (i, 0))

    dec, z, mu, logvar = pl.pallas_call(
        _vae_fused_kernel,
        grid=(Bp // TB,),
        in_specs=[
            row(D_IN), row(D_LAT),
            full(w1), full(b1),
            full(w2), full(b2),
            full(w3), full(b3),
            full(w4), full(b4),
        ],
        out_specs=(row(D_IN), row(D_LAT), row(D_LAT), row(D_LAT)),
        out_shape=(
            jax.ShapeDtypeStruct((Bp, D_IN), jnp.float32),
            jax.ShapeDtypeStruct((Bp, D_LAT), jnp.float32),
            jax.ShapeDtypeStruct((Bp, D_LAT), jnp.float32),
            jax.ShapeDtypeStruct((Bp, D_LAT), jnp.float32),
        ),
        compiler_params=pltpu.CompilerParams(
            dimension_semantics=("parallel",),
            vmem_limit_bytes=32 * 1024 * 1024,
        ),
    )(x, eps, w1, b1, w2, b2, w3, b3, w4, b4)

    if Bp != B:
        dec, z, mu, logvar = dec[:B], z[:B], mu[:B], logvar[:B]
    return dec, z, mu, logvar


# ----------------------------- parameter init ------------------------------ #

def _init_linear(key, fan_in, fan_out):
    """PyTorch nn.Linear default init; weight stored pre-transposed [in, out]."""
    bound = 1.0 / (fan_in ** 0.5)
    kw, kb = jax.random.split(key)
    w = jax.random.uniform(kw, (fan_in, fan_out), jnp.float32, -bound, bound)
    b = jax.random.uniform(kb, (1, fan_out), jnp.float32, -bound, bound)
    return w, b


def init_params(key):
    k1, k21, k22, k3, k4 = jax.random.split(key, 5)
    p = {}
    p["w1"], p["b1"] = _init_linear(k1, D_IN, D_H1)
    p["w21"], p["b21"] = _init_linear(k21, D_H1, D_LAT)
    p["w22"], p["b22"] = _init_linear(k22, D_H1, D_LAT)
    p["w3"], p["b3"] = _init_linear(k3, D_LAT, D_H2)
    p["w4"], p["b4"] = _init_linear(k4, D_H2, D_IN)
    return p


# ------------------------- pure-JAX reference check ------------------------ #

def reference_forward(x, eps, params):
    h1 = jnp.maximum(x @ params["w1"] + params["b1"], 0.0)
    mu = h1 @ params["w21"] + params["b21"]
    logvar = h1 @ params["w22"] + params["b22"]
    std = jnp.exp(0.5 * logvar)
    z = eps * std + mu
    h3 = jnp.maximum(z @ params["w3"] + params["b3"], 0.0)
    dec = 1.0 / (1.0 + jnp.exp(-(h3 @ params["w4"] + params["b4"])))
    return dec, z, mu, logvar


# ---------------------------------- main ----------------------------------- #

if __name__ == "__main__":
    key = jax.random.PRNGKey(0)
    k_x, k_eps, k_p = jax.random.split(key, 3)

    B = 2
    x = jax.random.uniform(k_x, (B, D_IN), jnp.float32)      # flattened 32x32 image, [0,1]
    eps = jax.random.normal(k_eps, (B, D_LAT), jnp.float32)  # reparametrization noise
    params = init_params(k_p)

    fwd = jax.jit(functools.partial(cifar_single_vae_forward))
    dec, z, mu, logvar = jax.block_until_ready(fwd(x, eps, params))

    assert dec.shape == (B, D_IN), dec.shape
    assert z.shape == (B, D_LAT) and mu.shape == (B, D_LAT) and logvar.shape == (B, D_LAT)

    ref = reference_forward(x, eps, params)
    for name, got, want in zip(("decoded", "z", "mu", "logvar"),
                               (dec, z, mu, logvar), ref):
        err = float(jnp.max(jnp.abs(got - want)))
        assert err < 1e-3, f"{name} mismatch vs reference: {err}"

    print("KERNEL_OK")
</pallas_src>

<mosaic_0001>
module attributes {stable_mosaic.version = 11 : i64} {
  func.func @_vae_fused_kernel(%arg0: i32, %arg1: memref<2x1024xf32, #tpu.memory_space<vmem>>, %arg2: memref<2x256xf32, #tpu.memory_space<vmem>>, %arg3: memref<1024x512xf32, #tpu.memory_space<vmem>>, %arg4: memref<1x512xf32, #tpu.memory_space<vmem>>, %arg5: memref<512x512xf32, #tpu.memory_space<vmem>>, %arg6: memref<1x512xf32, #tpu.memory_space<vmem>>, %arg7: memref<256x512xf32, #tpu.memory_space<vmem>>, %arg8: memref<1x512xf32, #tpu.memory_space<vmem>>, %arg9: memref<512x1024xf32, #tpu.memory_space<vmem>>, %arg10: memref<1x1024xf32, #tpu.memory_space<vmem>>, %arg11: memref<2x1024xf32, #tpu.memory_space<vmem>>, %arg12: memref<2x256xf32, #tpu.memory_space<vmem>>, %arg13: memref<2x256xf32, #tpu.memory_space<vmem>>, %arg14: memref<2x256xf32, #tpu.memory_space<vmem>>) attributes {dimension_semantics = [#tpu.dimension_semantics<parallel>], iteration_bounds = array<i64: 1>, scalar_prefetch = 0 : i64, scratch_operands = 0 : i64, tpu.core_type = #tpu.core_type<tc>, window_params = [{transform_indices = @transform_0, window_bounds = array<i64: 2, 1024>}, {transform_indices = @transform_1, window_bounds = array<i64: 2, 256>}, {pipeline_mode = #tpu.pipeline_mode<synchronous>, transform_indices = @transform_2, window_bounds = array<i64: 1024, 512>}, {pipeline_mode = #tpu.pipeline_mode<synchronous>, transform_indices = @transform_3, window_bounds = array<i64: 1, 512>}, {pipeline_mode = #tpu.pipeline_mode<synchronous>, transform_indices = @transform_4, window_bounds = array<i64: 512, 512>}, {pipeline_mode = #tpu.pipeline_mode<synchronous>, transform_indices = @transform_5, window_bounds = array<i64: 1, 512>}, {pipeline_mode = #tpu.pipeline_mode<synchronous>, transform_indices = @transform_6, window_bounds = array<i64: 256, 512>}, {pipeline_mode = #tpu.pipeline_mode<synchronous>, transform_indices = @transform_7, window_bounds = array<i64: 1, 512>}, {pipeline_mode = #tpu.pipeline_mode<synchronous>, transform_indices = @transform_8, window_bounds = array<i64: 512, 1024>}, {pipeline_mode = #tpu.pipeline_mode<synchronous>, transform_indices = @transform_9, window_bounds = array<i64: 1, 1024>}, {transform_indices = @transform_10, window_bounds = array<i64: 2, 1024>}, {transform_indices = @transform_11, window_bounds = array<i64: 2, 256>}, {transform_indices = @transform_12, window_bounds = array<i64: 2, 256>}, {transform_indices = @transform_13, window_bounds = array<i64: 2, 256>}]} {
    %c0 = arith.constant 0 : index
    %c0_0 = arith.constant 0 : index
    %0 = vector.load %arg1[%c0, %c0_0] : memref<2x1024xf32, #tpu.memory_space<vmem>>, vector<2x1024xf32>
    %c0_1 = arith.constant 0 : index
    %c0_2 = arith.constant 0 : index
    %1 = vector.load %arg3[%c0_1, %c0_2] : memref<1024x512xf32, #tpu.memory_space<vmem>>, vector<1024x512xf32>
    %cst = arith.constant dense<0.000000e+00> : vector<2x512xf32>
    %2 = tpu.matmul %0, %1, %cst {dimension_numbers = #tpu.dot_dimension_numbers<[1], [0], [0], [1], [0, 0, 1, 1], [], []>} : vector<2x1024xf32>, vector<1024x512xf32>, vector<2x512xf32> -> vector<2x512xf32>
    %c0_3 = arith.constant 0 : index
    %c0_4 = arith.constant 0 : index
    %3 = vector.load %arg4[%c0_3, %c0_4] : memref<1x512xf32, #tpu.memory_space<vmem>>, vector<1x512xf32>
    %4 = vector.broadcast %3 : vector<1x512xf32> to vector<2x512xf32>
    %5 = arith.addf %2, %4 : vector<2x512xf32>
    %cst_5 = arith.constant 0.000000e+00 : f32
    %6 = vector.broadcast %cst_5 : f32 to vector<2x512xf32>
    %7 = arith.maximumf %5, %6 : vector<2x512xf32>
    %c0_6 = arith.constant 0 : index
    %c0_7 = arith.constant 0 : index
    %8 = vector.load %arg5[%c0_6, %c0_7] : memref<512x512xf32, #tpu.memory_space<vmem>>, vector<512x512xf32>
    %cst_8 = arith.constant dense<0.000000e+00> : vector<2x512xf32>
    %9 = tpu.matmul %7, %8, %cst_8 {dimension_numbers = #tpu.dot_dimension_numbers<[1], [0], [0], [1], [0, 0, 1, 1], [], []>} : vector<2x512xf32>, vector<512x512xf32>, vector<2x512xf32> -> vector<2x512xf32>
    %c0_9 = arith.constant 0 : index
    %c0_10 = arith.constant 0 : index
    %10 = vector.load %arg6[%c0_9, %c0_10] : memref<1x512xf32, #tpu.memory_space<vmem>>, vector<1x512xf32>
    %11 = vector.broadcast %10 : vector<1x512xf32> to vector<2x512xf32>
    %12 = arith.addf %9, %11 : vector<2x512xf32>
    %13 = vector.extract_strided_slice %12 {offsets = [0, 0], sizes = [2, 256], strides = [1, 1]} : vector<2x512xf32> to vector<2x256xf32>
    %14 = vector.extract_strided_slice %12 {offsets = [0, 256], sizes = [2, 256], strides = [1, 1]} : vector<2x512xf32> to vector<2x256xf32>
    %cst_11 = arith.constant 5.000000e-01 : f32
    %15 = vector.broadcast %cst_11 : f32 to vector<2x256xf32>
    %16 = arith.mulf %15, %14 : vector<2x256xf32>
    %17 = math.exp %16 : vector<2x256xf32>
    %c0_12 = arith.constant 0 : index
    %c0_13 = arith.constant 0 : index
    %18 = vector.load %arg2[%c0_12, %c0_13] : memref<2x256xf32, #tpu.memory_space<vmem>>, vector<2x256xf32>
    %19 = arith.mulf %18, %17 : vector<2x256xf32>
    %20 = arith.addf %19, %13 : vector<2x256xf32>
    %c0_14 = arith.constant 0 : index
    %c0_15 = arith.constant 0 : index
    %21 = vector.load %arg7[%c0_14, %c0_15] : memref<256x512xf32, #tpu.memory_space<vmem>>, vector<256x512xf32>
    %cst_16 = arith.constant dense<0.000000e+00> : vector<2x512xf32>
    %22 = tpu.matmul %20, %21, %cst_16 {dimension_numbers = #tpu.dot_dimension_numbers<[1], [0], [0], [1], [0, 0, 1, 1], [], []>} : vector<2x256xf32>, vector<256x512xf32>, vector<2x512xf32> -> vector<2x512xf32>
    %c0_17 = arith.constant 0 : index
    %c0_18 = arith.constant 0 : index
    %23 = vector.load %arg8[%c0_17, %c0_18] : memref<1x512xf32, #tpu.memory_space<vmem>>, vector<1x512xf32>
    %24 = vector.broadcast %23 : vector<1x512xf32> to vector<2x512xf32>
    %25 = arith.addf %22, %24 : vector<2x512xf32>
    %cst_19 = arith.constant 0.000000e+00 : f32
    %26 = vector.broadcast %cst_19 : f32 to vector<2x512xf32>
    %27 = arith.maximumf %25, %26 : vector<2x512xf32>
    %c0_20 = arith.constant 0 : index
    %c0_21 = arith.constant 0 : index
    %28 = vector.load %arg9[%c0_20, %c0_21] : memref<512x1024xf32, #tpu.memory_space<vmem>>, vector<512x1024xf32>
    %cst_22 = arith.constant dense<0.000000e+00> : vector<2x1024xf32>
    %29 = tpu.matmul %27, %28, %cst_22 {dimension_numbers = #tpu.dot_dimension_numbers<[1], [0], [0], [1], [0, 0, 1, 1], [], []>} : vector<2x512xf32>, vector<512x1024xf32>, vector<2x1024xf32> -> vector<2x1024xf32>
    %c0_23 = arith.constant 0 : index
    %c0_24 = arith.constant 0 : index
    %30 = vector.load %arg10[%c0_23, %c0_24] : memref<1x1024xf32, #tpu.memory_space<vmem>>, vector<1x1024xf32>
    %31 = vector.broadcast %30 : vector<1x1024xf32> to vector<2x1024xf32>
    %32 = arith.addf %29, %31 : vector<2x1024xf32>
    %cst_25 = arith.constant 0.000000e+00 : f32
    %33 = vector.broadcast %cst_25 : f32 to vector<2x1024xf32>
    %34 = arith.subf %33, %32 : vector<2x1024xf32>
    %35 = math.exp %34 : vector<2x1024xf32>
    %cst_26 = arith.constant 1.000000e+00 : f32
    %36 = vector.broadcast %cst_26 : f32 to vector<2x1024xf32>
    %37 = arith.addf %36, %35 : vector<2x1024xf32>
    %cst_27 = arith.constant 1.000000e+00 : f32
    %38 = vector.broadcast %cst_27 : f32 to vector<2x1024xf32>
    %39 = arith.divf %38, %37 : vector<2x1024xf32>
    %c0_28 = arith.constant 0 : index
    %c0_29 = arith.constant 0 : index
    %40 = vector.load %arg11[%c0_28, %c0_29] : memref<2x1024xf32, #tpu.memory_space<vmem>>, vector<2x1024xf32>
    tpu.vector_store %arg11[%c0_28, %c0_29], %39 {strides = array<i32>} : memref<2x1024xf32, #tpu.memory_space<vmem>>, vector<2x1024xf32>,
    %c0_30 = arith.constant 0 : index
    %c0_31 = arith.constant 0 : index
    %41 = vector.load %arg12[%c0_30, %c0_31] : memref<2x256xf32, #tpu.memory_space<vmem>>, vector<2x256xf32>
    tpu.vector_store %arg12[%c0_30, %c0_31], %20 {strides = array<i32>} : memref<2x256xf32, #tpu.memory_space<vmem>>, vector<2x256xf32>,
    %c0_32 = arith.constant 0 : index
    %c0_33 = arith.constant 0 : index
    %42 = vector.load %arg13[%c0_32, %c0_33] : memref<2x256xf32, #tpu.memory_space<vmem>>, vector<2x256xf32>
    tpu.vector_store %arg13[%c0_32, %c0_33], %13 {strides = array<i32>} : memref<2x256xf32, #tpu.memory_space<vmem>>, vector<2x256xf32>,
    %c0_34 = arith.constant 0 : index
    %c0_35 = arith.constant 0 : index
    %43 = vector.load %arg14[%c0_34, %c0_35] : memref<2x256xf32, #tpu.memory_space<vmem>>, vector<2x256xf32>
    tpu.vector_store %arg14[%c0_34, %c0_35], %14 {strides = array<i32>} : memref<2x256xf32, #tpu.memory_space<vmem>>, vector<2x256xf32>,
    return
  }
  func.func @transform_0(%arg0: i32) -> (i32, i32) {
    %c0_i32 = arith.constant 0 : i32
    %c0_i32_0 = arith.constant 0 : i32
    return %arg0, %c0_i32 : i32, i32
  }
  func.func @transform_1(%arg0: i32) -> (i32, i32) {
    %c0_i32 = arith.constant 0 : i32
    %c0_i32_0 = arith.constant 0 : i32
    return %arg0, %c0_i32 : i32, i32
  }
  func.func @transform_2(%arg0: i32) -> (i32, i32) {
    %c0_i32 = arith.constant 0 : i32
    %c0_i32_0 = arith.constant 0 : i32
    %c0_i32_1 = arith.constant 0 : i32
    return %c0_i32, %c0_i32_0 : i32, i32
  }
  func.func @transform_3(%arg0: i32) -> (i32, i32) {
    %c0_i32 = arith.constant 0 : i32
    %c0_i32_0 = arith.constant 0 : i32
    %c0_i32_1 = arith.constant 0 : i32
    return %c0_i32, %c0_i32_0 : i32, i32
  }
  func.func @transform_4(%arg0: i32) -> (i32, i32) {
    %c0_i32 = arith.constant 0 : i32
    %c0_i32_0 = arith.constant 0 : i32
    %c0_i32_1 = arith.constant 0 : i32
    return %c0_i32, %c0_i32_0 : i32, i32
  }
  func.func @transform_5(%arg0: i32) -> (i32, i32) {
    %c0_i32 = arith.constant 0 : i32
    %c0_i32_0 = arith.constant 0 : i32
    %c0_i32_1 = arith.constant 0 : i32
    return %c0_i32, %c0_i32_0 : i32, i32
  }
  func.func @transform_6(%arg0: i32) -> (i32, i32) {
    %c0_i32 = arith.constant 0 : i32
    %c0_i32_0 = arith.constant 0 : i32
    %c0_i32_1 = arith.constant 0 : i32
    return %c0_i32, %c0_i32_0 : i32, i32
  }
  func.func @transform_7(%arg0: i32) -> (i32, i32) {
    %c0_i32 = arith.constant 0 : i32
    %c0_i32_0 = arith.constant 0 : i32
    %c0_i32_1 = arith.constant 0 : i32
    return %c0_i32, %c0_i32_0 : i32, i32
  }
  func.func @transform_8(%arg0: i32) -> (i32, i32) {
    %c0_i32 = arith.constant 0 : i32
    %c0_i32_0 = arith.constant 0 : i32
    %c0_i32_1 = arith.constant 0 : i32
    return %c0_i32, %c0_i32_0 : i32, i32
  }
  func.func @transform_9(%arg0: i32) -> (i32, i32) {
    %c0_i32 = arith.constant 0 : i32
    %c0_i32_0 = arith.constant 0 : i32
    %c0_i32_1 = arith.constant 0 : i32
    return %c0_i32, %c0_i32_0 : i32, i32
  }
  func.func @transform_10(%arg0: i32) -> (i32, i32) {
    %c0_i32 = arith.constant 0 : i32
    %c0_i32_0 = arith.constant 0 : i32
    return %arg0, %c0_i32 : i32, i32
  }
  func.func @transform_11(%arg0: i32) -> (i32, i32) {
    %c0_i32 = arith.constant 0 : i32
    %c0_i32_0 = arith.constant 0 : i32
    return %arg0, %c0_i32 : i32, i32
  }
  func.func @transform_12(%arg0: i32) -> (i32, i32) {
    %c0_i32 = arith.constant 0 : i32
    %c0_i32_0 = arith.constant 0 : i32
    return %arg0, %c0_i32 : i32, i32
  }
  func.func @transform_13(%arg0: i32) -> (i32, i32) {
    %c0_i32 = arith.constant 0 : i32
    %c0_i32_0 = arith.constant 0 : i32
    return %arg0, %c0_i32 : i32, i32
  }
}

</mosaic_0001>

<bundles_post_ra>
// kernel: cifar_single_vae_forward.1
= control target key start
LH: loop header
LB: loop body
LE: loop exit
PB: predicated region body
PF: predicated region fallthrough
CT: control target
= control target key end

     0   :  { %19 = vsyncpa [#allocation3], 0  ;;  %s6603_s0 = inlined_call_operand.hbm [shape: f32[2,1024], index: 0, kind: input, shape index: {}]   ;;  %s6604_s1 = inlined_call_operand.vmem [shape: f32[2,256], index: 1, kind: input, shape index: {}]   ;;  %s6605_s2 = inlined_call_operand.vmem [shape: f32[1024,512], index: 2, kind: input, shape index: {}]   ;;  %s6606_s3 = inlined_call_operand.hbm [shape: f32[1,512], index: 3, kind: input, shape index: {}]   ;;  %s6607_s4 = inlined_call_operand.vmem [shape: f32[512,512], index: 4, kind: input, shape index: {}]   ;;  %s6608_s5 = inlined_call_operand.vmem [shape: f32[1,512], index: 5, kind: input, shape index: {}]   ;;  %s6609_s6 = inlined_call_operand.hbm [shape: f32[256,512], index: 6, kind: input, shape index: {}]   ;;  %s6610_s7 = inlined_call_operand.hbm [shape: f32[1,512], index: 7, kind: input, shape index: {}]   ;;  %s6611_s8 = inlined_call_operand.hbm [shape: f32[512,1024], index: 8, kind: input, shape index: {}]   ;;  %s6612_s9 = inlined_call_operand.vmem [shape: f32[1,1024], index: 9, kind: input, shape index: {}]   ;;  %s6613_s10 = inlined_call_operand.hbm [shape: f32[2,1024], index: 10, kind: output, shape index: {0}]   ;;  %s6614_s11 = inlined_call_operand.hbm [shape: f32[2,256], index: 11, kind: output, shape index: {1}]   ;;  %s6615_s12 = inlined_call_operand.hbm [shape: f32[2,256], index: 12, kind: output, shape index: {2}]   ;;  %s6616_s13 = inlined_call_operand.hbm [shape: f32[2,256], index: 13, kind: output, shape index: {3}]  }
   0x1   :  { %20 = vsyncpa [#allocation6], 0 }
   0x2   :  { %21 = vsyncpa [#allocation9], 0 }
   0x3   :  { %22 = vsyncpa [#allocation4], 0 }
   0x4   :  { %23 = vsyncpa [#allocation13], 0  ;;  %s45_s27 = sshll.u32 %s6606_s3, 4  ;;  %s46_s27 = int_to_ptr.hbm [resolvable:$true] %s45_s27 }
   0x5   :  { %24 = vsyncpa [#allocation16], 0  ;;  %s3924_s28 = smov [#allocation5]   ;;  %s73_s15 = sshll.u32 %s6610_s7, 4  ;;  %s74_s15 = int_to_ptr.hbm [resolvable:$true] %s73_s15 }
   0x6   :  { %s47_s29 = sshll.u32 %s3924_s28, 4  ;;  %s3925_s16 = smov [#allocation8]   ;;  %s48_s29 = int_to_ptr.vmem [resolvable:$true] %s47_s29 }
   0x7   :  { %50 = dma.hbm_to_vmem [thread:$0]  %s46_s27, 64, %s48_s29, [#allocation6]  }
   0x8   :  { %s75_s17 = sshll.u32 %s3925_s16, 4  ;;  %s30_s20 = sshll.u32 %s6603_s0, 4  ;;  %s76_s17 = int_to_ptr.vmem [resolvable:$true] %s75_s17  ;;  %s31_s20 = int_to_ptr.hbm [resolvable:$true] %s30_s20 }
   0x9   :  { %78 = dma.hbm_to_vmem [thread:$0]  %s74_s15, 64, %s76_s17, [#allocation9]  }
   0xa   :  { %s59_s22 = sshll.u32 %s6609_s6, 4  ;;  %s3926_s23 = smov [#allocation2]   ;;  %s60_s22 = int_to_ptr.hbm [resolvable:$true] %s59_s22 }
   0xb   :  { %s32_s24 = sshll.u32 %s3926_s23, 4  ;;  %s3927_s7 = smov [#allocation7]   ;;  %s33_s24 = int_to_ptr.vmem [resolvable:$true] %s32_s24 }
   0xc   :  { %35 = dma.hbm_to_vmem [thread:$0]  %s31_s20, 256, %s33_s24, [#allocation3]  }
   0xd   :  { %s61_s25 = sshll.u32 %s3927_s7, 4  ;;  %s3928_s26 = smov 512   ;;  %s62_s25 = int_to_ptr.vmem [resolvable:$true] %s61_s25 }
   0xe   :  { %s3929_s27 = smov 32   ;;  %s83_s29 = sshll.u32 %s6611_s8, 4  ;;  %s84_s29 = int_to_ptr.hbm [resolvable:$true] %s83_s29 }
   0xf   :  { %67 = dma.hbm_to_vmem [thread:$0]  %s60_s22, 16384, %s62_s25, [#allocation6], %s3928_s26, %s3928_s26, %s3929_s27  }
  0x10   :  { %s3930_s30 = smov [#allocation10]   ;;  %s3931_s6 = smov 1024  }
  0x11   :  { %s85_s14 = sshll.u32 %s3930_s30, 4  ;;  %s3932_s15 = smov 64   ;;  %s86_s14 = int_to_ptr.vmem [resolvable:$true] %s85_s14 }
  0x12   :  { %91 = dma.hbm_to_vmem [thread:$0]  %s84_s29, 65536, %s86_s14, [#allocation9], %s3931_s6, %s3931_s6, %s3932_s15  }
  0x13   :  { %3912 = dma.done.wait [#allocation3], 256  }
  0x14   :  { %3913 = vsyncadd [#allocation3], 4294967040 }
  0x15   :  { %3914 = dma.done.wait [#allocation6], 16448  }
  0x16   :  { %3915 = vsyncadd [#allocation6], 4294950848 }
  0x17   :  { %3916 = dma.done.wait [#allocation9], 65600  }
  0x18   :  { %3917 = vsyncadd [#allocation9], 4294901696  ;;  %v176_v0 = vld [vmem:[%s6605_s2 + $0x1e0] sm:$0xff]  ;;  %vm1899_vm0 = vcmask 1041408   ;;  %s3591_s15 = sshll.u32 %s6614_s11, 4  ;;  %s3933_s16 = smov [#allocation12]   ;;  %s3592_s15 = int_to_ptr.hbm [resolvable:$true] %s3591_s15 }
  0x19   :  { %v240_v1 = vld [vmem:[%s6605_s2 + $0x3e0] sm:$0xff]  ;;  %659 = vmatpush.msra.mxu0 %v176_v0  ;;  %s3589_s17 = sshll.u32 %s3933_s16, 4  ;;  %s3934_s18 = smov [#allocation14]   ;;  %s3590_s17 = int_to_ptr.vmem [resolvable:$true] %s3589_s17 }
  0x1a   :  { %v304_v2 = vld [vmem:[%s6605_s2 + $0x5e0] sm:$0xff]  ;;  %679 = vmatpush.msra.mxu1 %v240_v1  ;;  %s3600_s19 = sshll.u32 %s3934_s18, 4  ;;  %s3602_s20 = sshll.u32 %s6615_s12, 4  ;;  %s3601_s19 = int_to_ptr.vmem [resolvable:$true] %s3600_s19  ;;  %s3603_s20 = int_to_ptr.hbm [resolvable:$true] %s3602_s20 }
  0x1b   :  { %v172_v3 = vld [vmem:[%s6605_s2 + $0x1c0] sm:$0xff]  ;;  %699 = vmatpush.msra.mxu2 %v304_v2  ;;  %s3613_s22 = sshll.u32 %s6616_s13, 4  ;;  %s3935_s23 = smov [#allocation15]   ;;  %s3614_s22 = int_to_ptr.hbm [resolvable:$true] %s3613_s22 }
  0x1c   :  { %v236_v4 = vld [vmem:[%s6605_s2 + $0x3c0] sm:$0xff]  ;;  %660 = vmatpush.msra.mxu0 %v172_v3  ;;  %s3611_s24 = sshll.u32 %s3935_s23, 4  ;;  %s3936_s12 = smov [#allocation11]   ;;  %s3612_s24 = int_to_ptr.vmem [resolvable:$true] %s3611_s24 }
  0x1d   :  { %v300_v5 = vld [vmem:[%s6605_s2 + $0x5c0] sm:$0xff]  ;;  %680 = vmatpush.msra.mxu1 %v236_v4  ;;  %s3578_s13 = sshll.u32 %s3936_s12, 4  ;;  %s3580_s26 = sshll.u32 %s6613_s10, 4  ;;  %s3579_s13 = int_to_ptr.vmem [resolvable:$true] %s3578_s13  ;;  %s3581_s26 = int_to_ptr.hbm [resolvable:$true] %s3580_s26 }
  0x1e   :  { %v368_v6 = vld [vmem:[%s6605_s2 + $0x7e0] sm:$0xff]  ;;  %700 = vmatpush.msra.mxu2 %v300_v5 }
  0x1f   :  { %v168_v7 = vld [vmem:[%s6605_s2 + $0x1a0] sm:$0xff]  ;;  %719 = vmatpush.msra.mxu3 %v368_v6 }
  0x20   :  { %v232_v8 = vld [vmem:[%s6605_s2 + $0x3a0] sm:$0xff]  ;;  %661 = vmatpush.msra.mxu0 %v168_v7 }
  0x21   :  { %v296_v9 = vld [vmem:[%s6605_s2 + $0x5a0] sm:$0xff]  ;;  %681 = vmatpush.msra.mxu1 %v232_v8 }
  0x22   :  { %v364_v10 = vld [vmem:[%s6605_s2 + $0x7c0] sm:$0xff]  ;;  %701 = vmatpush.msra.mxu2 %v296_v9 }
  0x23   :  { %v164_v11 = vld [vmem:[%s6605_s2 + $0x180] sm:$0xff]  ;;  %720 = vmatpush.msra.mxu3 %v364_v10 }
  0x24   :  { %v228_v12 = vld [vmem:[%s6605_s2 + $0x380] sm:$0xff]  ;;  %662 = vmatpush.msra.mxu0 %v164_v11 }
  0x25   :  { %v292_v13 = vld [vmem:[%s6605_s2 + $0x580] sm:$0xff]  ;;  %682 = vmatpush.msra.mxu1 %v228_v12 }
  0x26   :  { %v360_v14 = vld [vmem:[%s6605_s2 + $0x7a0] sm:$0xff]  ;;  %702 = vmatpush.msra.mxu2 %v292_v13 }
  0x27   :  { %v160_v15 = vld [vmem:[%s6605_s2 + $0x160] sm:$0xff]  ;;  %721 = vmatpush.msra.mxu3 %v360_v14 }
  0x28   :  { %v224_v16 = vld [vmem:[%s6605_s2 + $0x360] sm:$0xff]  ;;  %663 = vmatpush.msra.mxu0 %v160_v15 }
  0x29   :  { %v288_v17 = vld [vmem:[%s6605_s2 + $0x560] sm:$0xff]  ;;  %683 = vmatpush.msra.mxu1 %v224_v16 }
  0x2a   :  { %v356_v18 = vld [vmem:[%s6605_s2 + $0x780] sm:$0xff]  ;;  %703 = vmatpush.msra.mxu2 %v288_v17 }
  0x2b   :  { %v156_v19 = vld [vmem:[%s6605_s2 + $0x140] sm:$0xff]  ;;  %722 = vmatpush.msra.mxu3 %v356_v18 }
  0x2c   :  { %v220_v20 = vld [vmem:[%s6605_s2 + $0x340] sm:$0xff]  ;;  %664 = vmatpush.msra.mxu0 %v156_v19 }
  0x2d   :  { %v284_v21 = vld [vmem:[%s6605_s2 + $0x540] sm:$0xff]  ;;  %684 = vmatpush.msra.mxu1 %v220_v20 }
  0x2e   :  { %v352_v22 = vld [vmem:[%s6605_s2 + $0x760] sm:$0xff]  ;;  %704 = vmatpush.msra.mxu2 %v284_v21 }
  0x2f   :  { %v152_v23 = vld [vmem:[%s6605_s2 + $0x120] sm:$0xff]  ;;  %723 = vmatpush.msra.mxu3 %v352_v22 }
  0x30   :  { %v216_v24 = vld [vmem:[%s6605_s2 + $0x320] sm:$0xff]  ;;  %665 = vmatpush.msra.mxu0 %v152_v23 }
  0x31   :  { %v280_v25 = vld [vmem:[%s6605_s2 + $0x520] sm:$0xff]  ;;  %685 = vmatpush.msra.mxu1 %v216_v24 }
  0x32   :  { %v348_v26 = vld [vmem:[%s6605_s2 + $0x740] sm:$0xff]  ;;  %705 = vmatpush.msra.mxu2 %v280_v25  ;;  %v114_v25 = vld [vmem:[#allocation2] sm:$0xff] }
  0x33   :  { %v148_v27 = vld [vmem:[%s6605_s2 + $0x100] sm:$0xff]  ;;  %724 = vmatpush.msra.mxu3 %v348_v26  ;;  %640 = vst [vmem:[#allocation1] ss:$4 sm:$0xff] %v114_v25  ;;  %v357_v25 = vld [vmem:[%s6605_s2 + $0x788] sm:$0xff] }
  0x34   :  { %v212_v28 = vld [vmem:[%s6605_s2 + $0x300] sm:$0xff]  ;;  %666 = vmatpush.msra.mxu0 %v148_v27 }
  0x35   :  { %v276_v29 = vld [vmem:[%s6605_s2 + $0x500] sm:$0xff]  ;;  %686 = vmatpush.msra.mxu1 %v212_v28 }
  0x36   :  { %v344_v30 = vld [vmem:[%s6605_s2 + $0x720] sm:$0xff]  ;;  %706 = vmatpush.msra.mxu2 %v276_v29 }
  0x37   :  { %v144_v31 = vld [vmem:[%s6605_s2 + $0xe0] sm:$0xff]  ;;  %725 = vmatpush.msra.mxu3 %v344_v30 }
  0x38   :  { %v208_v32 = vld [vmem:[%s6605_s2 + $0x2e0] sm:$0xff]  ;;  %667 = vmatpush.msra.mxu0 %v144_v31 }
  0x39   :  { %v272_v33 = vld [vmem:[%s6605_s2 + $0x4e0] sm:$0xff]  ;;  %687 = vmatpush.msra.mxu1 %v208_v32 }
  0x3a   :  { %v340_v34 = vld [vmem:[%s6605_s2 + $0x700] sm:$0xff]  ;;  %707 = vmatpush.msra.mxu2 %v272_v33 }
  0x3b   :  { %v140_v35 = vld [vmem:[%s6605_s2 + $0xc0] sm:$0xff]  ;;  %726 = vmatpush.msra.mxu3 %v340_v34 }
  0x3c   :  { %v204_v36 = vld [vmem:[%s6605_s2 + $0x2c0] sm:$0xff]  ;;  %668 = vmatpush.msra.mxu0 %v140_v35 }
  0x3d   :  { %v268_v37 = vld [vmem:[%s6605_s2 + $0x4c0] sm:$0xff]  ;;  %688 = vmatpush.msra.mxu1 %v204_v36 }
  0x3e   :  { %v336_v38 = vld [vmem:[%s6605_s2 + $0x6e0] sm:$0xff]  ;;  %708 = vmatpush.msra.mxu2 %v268_v37 }
  0x3f   :  { %v136_v39 = vld [vmem:[%s6605_s2 + $0xa0] sm:$0xff]  ;;  %727 = vmatpush.msra.mxu3 %v336_v38  ;;  %v115_v38 = vld [vmem:[#allocation2 + $0x8] sm:$0xff] }
  0x40   :  { %v200_v40 = vld [vmem:[%s6605_s2 + $0x2a0] sm:$0xff]  ;;  %669 = vmatpush.msra.mxu0 %v136_v39  ;;  %642 = vst [vmem:[#allocation1 + $0x20] ss:$4 sm:$0xff] %v115_v38  ;;  %v213_v38 = vld [vmem:[%s6605_s2 + $0x308] sm:$0xff] }
  0x41   :  { %v264_v41 = vld [vmem:[%s6605_s2 + $0x4a0] sm:$0xff]  ;;  %689 = vmatpush.msra.mxu1 %v200_v40 }
  0x42   :  { %v332_v42 = vld [vmem:[%s6605_s2 + $0x6c0] sm:$0xff]  ;;  %709 = vmatpush.msra.mxu2 %v264_v41 }
  0x43   :  { %v132_v43 = vld [vmem:[%s6605_s2 + $0x80] sm:$0xff]  ;;  %728 = vmatpush.msra.mxu3 %v332_v42 }
  0x44   :  { %v196_v44 = vld [vmem:[%s6605_s2 + $0x280] sm:$0xff]  ;;  %670 = vmatpush.msra.mxu0 %v132_v43 }
  0x45   :  { %v260_v45 = vld [vmem:[%s6605_s2 + $0x480] sm:$0xff]  ;;  %690 = vmatpush.msra.mxu1 %v196_v44 }
  0x46   :  { %v328_v46 = vld [vmem:[%s6605_s2 + $0x6a0] sm:$0xff]  ;;  %710 = vmatpush.msra.mxu2 %v260_v45 }
  0x47   :  { %v128_v47 = vld [vmem:[%s6605_s2 + $0x60] sm:$0xff]  ;;  %729 = vmatpush.msra.mxu3 %v328_v46 }
  0x48   :  { %v192_v48 = vld [vmem:[%s6605_s2 + $0x260] sm:$0xff]  ;;  %671 = vmatpush.msra.mxu0 %v128_v47 }
  0x49   :  { %v256_v49 = vld [vmem:[%s6605_s2 + $0x460] sm:$0xff]  ;;  %691 = vmatpush.msra.mxu1 %v192_v48 }
  0x4a   :  { %v324_v50 = vld [vmem:[%s6605_s2 + $0x680] sm:$0xff]  ;;  %711 = vmatpush.msra.mxu2 %v256_v49 }
  0x4b   :  { %v124_v51 = vld [vmem:[%s6605_s2 + $0x40] sm:$0xff]  ;;  %730 = vmatpush.msra.mxu3 %v324_v50 }
  0x4c   :  { %v188_v52 = vld [vmem:[%s6605_s2 + $0x240] sm:$0xff]  ;;  %672 = vmatpush.msra.mxu0 %v124_v51 }
  0x4d   :  { %v252_v53 = vld [vmem:[%s6605_s2 + $0x440] sm:$0xff]  ;;  %692 = vmatpush.msra.mxu1 %v188_v52 }
  0x4e   :  { %v320_v54 = vld [vmem:[%s6605_s2 + $0x660] sm:$0xff]  ;;  %712 = vmatpush.msra.mxu2 %v252_v53 }
  0x4f   :  { %v120_v55 = vld [vmem:[%s6605_s2 + $0x20] sm:$0xff]  ;;  %731 = vmatpush.msra.mxu3 %v320_v54 }
  0x50   :  { %v184_v56 = vld [vmem:[%s6605_s2 + $0x220] sm:$0xff]  ;;  %673 = vmatpush.msra.mxu0 %v120_v55 }
  0x51   :  { %v248_v57 = vld [vmem:[%s6605_s2 + $0x420] sm:$0xff]  ;;  %693 = vmatpush.msra.mxu1 %v184_v56 }
  0x52   :  { %v316_v58 = vld [vmem:[%s6605_s2 + $0x640] sm:$0xff]  ;;  %713 = vmatpush.msra.mxu2 %v248_v57 }
  0x53   :  { %v116_v59 = vld [vmem:[%s6605_s2] sm:$0xff]  ;;  %732 = vmatpush.msra.mxu3 %v316_v58 }
  0x54   :  { %v180_v60 = vld [vmem:[%s6605_s2 + $0x200] sm:$0xff]  ;;  %674 = vmatpush.msra.mxu0 %v116_v59 }
  0x55   :  { %v244_v61 = vld [vmem:[%s6605_s2 + $0x400] sm:$0xff]  ;;  %694 = vmatpush.msra.mxu1 %v180_v60 }
  0x56   :  { %v312_v62 = vld [vmem:[%s6605_s2 + $0x620] sm:$0xff]  ;;  %714 = vmatpush.msra.mxu2 %v244_v61 }
  0x57   :  { %v432_v63 = vld [vmem:[%s6605_s2 + $0x9e0] sm:$0xff]  ;;  %733 = vmatpush.msra.mxu3 %v312_v62 }
  0x58   :  { %v496_v0 = vld [vmem:[%s6605_s2 + $0xbe0] sm:$0xff]  ;;  %739 = vmatpush.msrb.mxu0 %v432_v63 }
  0x59   :  { %v560_v1 = vld [vmem:[%s6605_s2 + $0xde0] sm:$0xff]  ;;  %759 = vmatpush.msrb.mxu1 %v496_v0 }
  0x5a   :  { %v308_v2 = vld [vmem:[%s6605_s2 + $0x600] sm:$0xff]  ;;  %779 = vmatpush.msrb.mxu2 %v560_v1 }
  0x5b   :  { %v428_v3 = vld [vmem:[%s6605_s2 + $0x9c0] sm:$0xff]  ;;  %734 = vmatpush.msra.mxu3 %v308_v2  ;;  %v4405_v2 = vld.sshfl [vmem:[#allocation1 + $0x8] sm:$0xff pattern:$0x73625140] }
  0x5c   :  { %v492_v4 = vld [vmem:[%s6605_s2 + $0xbc0] sm:$0xff]  ;;  %740 = vmatpush.msrb.mxu0 %v428_v3  ;;  %v4407_v3 = vld.sshfl [vmem:[#allocation1 + $0x10] sm:$0xff pattern:$0x73625140]  ;;  %695 = vmatmul.f32.vlgmr.msra.gmra.mxu1 %v4405_v2 }
  0x5d   :  { %v556_v5 = vld [vmem:[%s6605_s2 + $0xdc0] sm:$0xff]  ;;  %760 = vmatpush.msrb.mxu1 %v492_v4  ;;  %v177_v4 = vld [vmem:[%s6605_s2 + $0x1e8] sm:$0xff]  ;;  %715 = vmatmul.f32.vlgmr.msra.gmra.mxu2 %v4407_v3 }
  0x5e   :  { %v624_v6 = vld [vmem:[%s6605_s2 + $0xfe0] sm:$0xff]  ;;  %780 = vmatpush.msrb.mxu2 %v556_v5  ;;  %v241_v5 = vld [vmem:[%s6605_s2 + $0x3e8] sm:$0xff] }
  0x5f   :  { %v424_v7 = vld [vmem:[%s6605_s2 + $0x9a0] sm:$0xff]  ;;  %799 = vmatpush.msrb.mxu3 %v624_v6  ;;  %v305_v6 = vld [vmem:[%s6605_s2 + $0x5e8] sm:$0xff] }
  0x60   :  { %v488_v8 = vld [vmem:[%s6605_s2 + $0xba0] sm:$0xff]  ;;  %741 = vmatpush.msrb.mxu0 %v424_v7 }
  0x61   :  { %v552_v9 = vld [vmem:[%s6605_s2 + $0xda0] sm:$0xff]  ;;  %761 = vmatpush.msrb.mxu1 %v488_v8  ;;  %v173_v8 = vld [vmem:[%s6605_s2 + $0x1c8] sm:$0xff] }
  0x62   :  { %v620_v10 = vld [vmem:[%s6605_s2 + $0xfc0] sm:$0xff]  ;;  %781 = vmatpush.msrb.mxu2 %v552_v9  ;;  %v4427_v9 = vld.sshfl [vmem:[#allocation1 + $0x18] sm:$0xff pattern:$0x73625140] }
  0x63   :  { %v420_v11 = vld [vmem:[%s6605_s2 + $0x980] sm:$0xff]  ;;  %800 = vmatpush.msrb.mxu3 %v620_v10  ;;  %v237_v10 = vld [vmem:[%s6605_s2 + $0x3c8] sm:$0xff] }
  0x64   :  { %v484_v12 = vld [vmem:[%s6605_s2 + $0xb80] sm:$0xff]  ;;  %742 = vmatpush.msrb.mxu0 %v420_v11  ;;  %v301_v11 = vld [vmem:[%s6605_s2 + $0x5c8] sm:$0xff]  ;;  %735 = vmatmul.f32.vlgmr.msra.gmra.mxu3 %v4427_v9 }
  0x65   :  { %v548_v13 = vld [vmem:[%s6605_s2 + $0xd80] sm:$0xff]  ;;  %762 = vmatpush.msrb.mxu1 %v484_v12  ;;  %v369_v12 = vld [vmem:[%s6605_s2 + $0x7e8] sm:$0xff] }
  0x66   :  { %v616_v14 = vld [vmem:[%s6605_s2 + $0xfa0] sm:$0xff]  ;;  %782 = vmatpush.msrb.mxu2 %v548_v13  ;;  %v169_v13 = vld [vmem:[%s6605_s2 + $0x1a8] sm:$0xff] }
  0x67   :  { %v416_v15 = vld [vmem:[%s6605_s2 + $0x960] sm:$0xff]  ;;  %801 = vmatpush.msrb.mxu3 %v616_v14  ;;  %v233_v14 = vld [vmem:[%s6605_s2 + $0x3a8] sm:$0xff] }
  0x68   :  { %v480_v16 = vld [vmem:[%s6605_s2 + $0xb60] sm:$0xff]  ;;  %743 = vmatpush.msrb.mxu0 %v416_v15  ;;  %v297_v15 = vld [vmem:[%s6605_s2 + $0x5a8] sm:$0xff] }
  0x69   :  { %v544_v17 = vld [vmem:[%s6605_s2 + $0xd60] sm:$0xff]  ;;  %763 = vmatpush.msrb.mxu1 %v480_v16  ;;  %v365_v16 = vld [vmem:[%s6605_s2 + $0x7c8] sm:$0xff] }
  0x6a   :  { %v612_v18 = vld [vmem:[%s6605_s2 + $0xf80] sm:$0xff]  ;;  %783 = vmatpush.msrb.mxu2 %v544_v17  ;;  %v165_v17 = vld [vmem:[%s6605_s2 + $0x188] sm:$0xff] }
  0x6b   :  { %v412_v19 = vld [vmem:[%s6605_s2 + $0x940] sm:$0xff]  ;;  %802 = vmatpush.msrb.mxu3 %v612_v18  ;;  %v229_v18 = vld [vmem:[%s6605_s2 + $0x388] sm:$0xff] }
  0x6c   :  { %v476_v20 = vld [vmem:[%s6605_s2 + $0xb40] sm:$0xff]  ;;  %744 = vmatpush.msrb.mxu0 %v412_v19  ;;  %v293_v19 = vld [vmem:[%s6605_s2 + $0x588] sm:$0xff] }
  0x6d   :  { %v540_v21 = vld [vmem:[%s6605_s2 + $0xd40] sm:$0xff]  ;;  %764 = vmatpush.msrb.mxu1 %v476_v20  ;;  %v361_v20 = vld [vmem:[%s6605_s2 + $0x7a8] sm:$0xff] }
  0x6e   :  { %v608_v22 = vld [vmem:[%s6605_s2 + $0xf60] sm:$0xff]  ;;  %784 = vmatpush.msrb.mxu2 %v540_v21  ;;  %v4463_v21 = vld.sshfl [vmem:[#allocation1 + $0x30] sm:$0xff pattern:$0x73625140] }
  0x6f   :  { %v408_v23 = vld [vmem:[%s6605_s2 + $0x920] sm:$0xff]  ;;  %803 = vmatpush.msrb.mxu3 %v608_v22  ;;  %v161_v22 = vld [vmem:[%s6605_s2 + $0x168] sm:$0xff] }
  0x70   :  { %v472_v24 = vld [vmem:[%s6605_s2 + $0xb20] sm:$0xff]  ;;  %745 = vmatpush.msrb.mxu0 %v408_v23  ;;  %v225_v23 = vld [vmem:[%s6605_s2 + $0x368] sm:$0xff] }
  0x71   :  { %v536_v26 = vld [vmem:[%s6605_s2 + $0xd20] sm:$0xff]  ;;  %765 = vmatpush.msrb.mxu1 %v472_v24  ;;  %v289_v24 = vld [vmem:[%s6605_s2 + $0x568] sm:$0xff] }
  0x72   :  { %v604_v27 = vld [vmem:[%s6605_s2 + $0xf40] sm:$0xff]  ;;  %785 = vmatpush.msrb.mxu2 %v536_v26 }
  0x73   :  { %v404_v28 = vld [vmem:[%s6605_s2 + $0x900] sm:$0xff]  ;;  %804 = vmatpush.msrb.mxu3 %v604_v27  ;;  %v4480_v27 = vld.sshfl [vmem:[#allocation1 + $0x38] sm:$0xff pattern:$0x73625140] }
  0x74   :  { %v468_v29 = vld [vmem:[%s6605_s2 + $0xb00] sm:$0xff]  ;;  %746 = vmatpush.msrb.mxu0 %v404_v28  ;;  %v157_v28 = vld [vmem:[%s6605_s2 + $0x148] sm:$0xff] }
  0x75   :  { %v532_v30 = vld [vmem:[%s6605_s2 + $0xd00] sm:$0xff]  ;;  %766 = vmatpush.msrb.mxu1 %v468_v29  ;;  %v221_v29 = vld [vmem:[%s6605_s2 + $0x348] sm:$0xff] }
  0x76   :  { %v600_v31 = vld [vmem:[%s6605_s2 + $0xf20] sm:$0xff]  ;;  %786 = vmatpush.msrb.mxu2 %v532_v30  ;;  %v285_v30 = vld [vmem:[%s6605_s2 + $0x548] sm:$0xff] }
  0x77   :  { %v400_v32 = vld [vmem:[%s6605_s2 + $0x8e0] sm:$0xff]  ;;  %805 = vmatpush.msrb.mxu3 %v600_v31  ;;  %v353_v31 = vld [vmem:[%s6605_s2 + $0x768] sm:$0xff] }
  0x78   :  { %v464_v33 = vld [vmem:[%s6605_s2 + $0xae0] sm:$0xff]  ;;  %747 = vmatpush.msrb.mxu0 %v400_v32  ;;  %v4495_v32 = vld.sshfl [vmem:[#allocation1 + $0x28] sm:$0xff pattern:$0x73625140] }
  0x79   :  { %v528_v34 = vld [vmem:[%s6605_s2 + $0xce0] sm:$0xff]  ;;  %767 = vmatpush.msrb.mxu1 %v464_v33  ;;  %v153_v33 = vld [vmem:[%s6605_s2 + $0x128] sm:$0xff] }
  0x7a   :  { %v596_v35 = vld [vmem:[%s6605_s2 + $0xf00] sm:$0xff]  ;;  %787 = vmatpush.msrb.mxu2 %v528_v34  ;;  %v217_v34 = vld [vmem:[%s6605_s2 + $0x328] sm:$0xff] }
  0x7b   :  { %v396_v36 = vld [vmem:[%s6605_s2 + $0x8c0] sm:$0xff]  ;;  %806 = vmatpush.msrb.mxu3 %v596_v35  ;;  %v281_v35 = vld [vmem:[%s6605_s2 + $0x528] sm:$0xff] }
  0x7c   :  { %v460_v37 = vld [vmem:[%s6605_s2 + $0xac0] sm:$0xff]  ;;  %748 = vmatpush.msrb.mxu0 %v396_v36  ;;  %v349_v36 = vld [vmem:[%s6605_s2 + $0x748] sm:$0xff] }
  0x7d   :  { %v524_v39 = vld [vmem:[%s6605_s2 + $0xcc0] sm:$0xff]  ;;  %768 = vmatpush.msrb.mxu1 %v460_v37  ;;  %v149_v37 = vld [vmem:[%s6605_s2 + $0x108] sm:$0xff] }
  0x7e   :  { %v592_v40 = vld [vmem:[%s6605_s2 + $0xee0] sm:$0xff]  ;;  %788 = vmatpush.msrb.mxu2 %v524_v39  ;;  %v277_v39 = vld [vmem:[%s6605_s2 + $0x508] sm:$0xff] }
  0x7f   :  { %v392_v41 = vld [vmem:[%s6605_s2 + $0x8a0] sm:$0xff]  ;;  %807 = vmatpush.msrb.mxu3 %v592_v40  ;;  %v345_v40 = vld [vmem:[%s6605_s2 + $0x728] sm:$0xff] }
  0x80   :  { %v456_v42 = vld [vmem:[%s6605_s2 + $0xaa0] sm:$0xff]  ;;  %749 = vmatpush.msrb.mxu0 %v392_v41  ;;  %v145_v41 = vld [vmem:[%s6605_s2 + $0xe8] sm:$0xff] }
  0x81   :  { %v520_v43 = vld [vmem:[%s6605_s2 + $0xca0] sm:$0xff]  ;;  %769 = vmatpush.msrb.mxu1 %v456_v42  ;;  %v209_v42 = vld [vmem:[%s6605_s2 + $0x2e8] sm:$0xff] }
  0x82   :  { %v588_v44 = vld [vmem:[%s6605_s2 + $0xec0] sm:$0xff]  ;;  %789 = vmatpush.msrb.mxu2 %v520_v43  ;;  %v273_v43 = vld [vmem:[%s6605_s2 + $0x4e8] sm:$0xff] }
  0x83   :  { %v388_v45 = vld [vmem:[%s6605_s2 + $0x880] sm:$0xff]  ;;  %808 = vmatpush.msrb.mxu3 %v588_v44  ;;  %v341_v44 = vld [vmem:[%s6605_s2 + $0x708] sm:$0xff] }
  0x84   :  { %v452_v46 = vld [vmem:[%s6605_s2 + $0xa80] sm:$0xff]  ;;  %750 = vmatpush.msrb.mxu0 %v388_v45  ;;  %v141_v45 = vld [vmem:[%s6605_s2 + $0xc8] sm:$0xff] }
  0x85   :  { %v516_v47 = vld [vmem:[%s6605_s2 + $0xc80] sm:$0xff]  ;;  %770 = vmatpush.msrb.mxu1 %v452_v46  ;;  %v205_v46 = vld [vmem:[%s6605_s2 + $0x2c8] sm:$0xff] }
  0x86   :  { %v584_v48 = vld [vmem:[%s6605_s2 + $0xea0] sm:$0xff]  ;;  %790 = vmatpush.msrb.mxu2 %v516_v47  ;;  %v269_v47 = vld [vmem:[%s6605_s2 + $0x4c8] sm:$0xff] }
  0x87   :  { %v384_v49 = vld [vmem:[%s6605_s2 + $0x860] sm:$0xff]  ;;  %809 = vmatpush.msrb.mxu3 %v584_v48  ;;  %v337_v48 = vld [vmem:[%s6605_s2 + $0x6e8] sm:$0xff] }
  0x88   :  { %v448_v50 = vld [vmem:[%s6605_s2 + $0xa60] sm:$0xff]  ;;  %751 = vmatpush.msrb.mxu0 %v384_v49  ;;  %v137_v49 = vld [vmem:[%s6605_s2 + $0xa8] sm:$0xff] }
  0x89   :  { %v512_v51 = vld [vmem:[%s6605_s2 + $0xc60] sm:$0xff]  ;;  %771 = vmatpush.msrb.mxu1 %v448_v50  ;;  %v201_v50 = vld [vmem:[%s6605_s2 + $0x2a8] sm:$0xff] }
  0x8a   :  { %v580_v52 = vld [vmem:[%s6605_s2 + $0xe80] sm:$0xff]  ;;  %791 = vmatpush.msrb.mxu2 %v512_v51  ;;  %v265_v51 = vld [vmem:[%s6605_s2 + $0x4a8] sm:$0xff] }
  0x8b   :  { %v380_v53 = vld [vmem:[%s6605_s2 + $0x840] sm:$0xff]  ;;  %810 = vmatpush.msrb.mxu3 %v580_v52  ;;  %v333_v52 = vld [vmem:[%s6605_s2 + $0x6c8] sm:$0xff] }
  0x8c   :  { %v444_v54 = vld [vmem:[%s6605_s2 + $0xa40] sm:$0xff]  ;;  %752 = vmatpush.msrb.mxu0 %v380_v53  ;;  %v133_v53 = vld [vmem:[%s6605_s2 + $0x88] sm:$0xff] }
  0x8d   :  { %v508_v55 = vld [vmem:[%s6605_s2 + $0xc40] sm:$0xff]  ;;  %772 = vmatpush.msrb.mxu1 %v444_v54  ;;  %v197_v54 = vld [vmem:[%s6605_s2 + $0x288] sm:$0xff] }
  0x8e   :  { %v576_v56 = vld [vmem:[%s6605_s2 + $0xe60] sm:$0xff]  ;;  %792 = vmatpush.msrb.mxu2 %v508_v55  ;;  %v261_v55 = vld [vmem:[%s6605_s2 + $0x488] sm:$0xff] }
  0x8f   :  { %v376_v57 = vld [vmem:[%s6605_s2 + $0x820] sm:$0xff]  ;;  %811 = vmatpush.msrb.mxu3 %v576_v56  ;;  %v329_v56 = vld [vmem:[%s6605_s2 + $0x6a8] sm:$0xff] }
  0x90   :  { %v440_v58 = vld [vmem:[%s6605_s2 + $0xa20] sm:$0xff]  ;;  %753 = vmatpush.msrb.mxu0 %v376_v57  ;;  %v129_v57 = vld [vmem:[%s6605_s2 + $0x68] sm:$0xff] }
  0x91   :  { %v504_v59 = vld [vmem:[%s6605_s2 + $0xc20] sm:$0xff]  ;;  %773 = vmatpush.msrb.mxu1 %v440_v58  ;;  %v193_v58 = vld [vmem:[%s6605_s2 + $0x268] sm:$0xff] }
  0x92   :  { %v572_v60 = vld [vmem:[%s6605_s2 + $0xe40] sm:$0xff]  ;;  %793 = vmatpush.msrb.mxu2 %v504_v59  ;;  %v257_v59 = vld [vmem:[%s6605_s2 + $0x468] sm:$0xff] }
  0x93   :  { %v372_v61 = vld [vmem:[%s6605_s2 + $0x800] sm:$0xff]  ;;  %812 = vmatpush.msrb.mxu3 %v572_v60  ;;  %v325_v60 = vld [vmem:[%s6605_s2 + $0x688] sm:$0xff] }
  0x94   :  { %v436_v62 = vld [vmem:[%s6605_s2 + $0xa00] sm:$0xff]  ;;  %754 = vmatpush.msrb.mxu0 %v372_v61  ;;  %v125_v61 = vld [vmem:[%s6605_s2 + $0x48] sm:$0xff] }
  0x95   :  { %v500_v63 = vld [vmem:[%s6605_s2 + $0xc00] sm:$0xff]  ;;  %774 = vmatpush.msrb.mxu1 %v436_v62  ;;  %v189_v62 = vld [vmem:[%s6605_s2 + $0x248] sm:$0xff] }
  0x96   :  { %v568_v0 = vld [vmem:[%s6605_s2 + $0xe20] sm:$0xff]  ;;  %794 = vmatpush.msrb.mxu2 %v500_v63  ;;  %775 = vmatmul.f32.vlgmr.msrb.gmra.mxu1 %v4495_v32  ;;  %v253_v63 = vld [vmem:[%s6605_s2 + $0x448] sm:$0xff] }
  0x97   :  { %v4403_v1 = vld.sshfl [vmem:[#allocation1] sm:$0xff pattern:$0x73625140]  ;;  %813 = vmatpush.msrb.mxu3 %v568_v0  ;;  %839 = vmatpush.msra.mxu1 %v241_v5  ;;  %v321_v0 = vld [vmem:[%s6605_s2 + $0x668] sm:$0xff] }
  0x98   :  { %675 = vmatmul.f32.vlgmr.msra.gmra.mxu0 %v4403_v1  ;;  %v564_v7 = vld [vmem:[%s6605_s2 + $0xe00] sm:$0xff]  ;;  %859 = vmatpush.msra.mxu2 %v305_v6  ;;  %v185_v5 = vld [vmem:[%s6605_s2 + $0x228] sm:$0xff] }
  0x99   :  { %819 = vmatpush.msra.mxu0 %v177_v4  ;;  %814 = vmatpush.msrb.mxu3 %v564_v7  ;;  %v4477_v26 = vld.sshfl [vmem:[#allocation1 + $0x20] sm:$0xff pattern:$0x73625140]  ;;  %v121_v4 = vld [vmem:[%s6605_s2 + $0x28] sm:$0xff] }
  0x9a   :  { %840 = vmatpush.msra.mxu1 %v237_v10  ;;  %860 = vmatpush.msra.mxu2 %v301_v11  ;;  %v249_v6 = vld [vmem:[%s6605_s2 + $0x428] sm:$0xff] }
  0x9b   :  { %820 = vmatpush.msra.mxu0 %v173_v8  ;;  %879 = vmatpush.msra.mxu3 %v369_v12  ;;  %v317_v7 = vld [vmem:[%s6605_s2 + $0x648] sm:$0xff] }
  0x9c   :  { %841 = vmatpush.msra.mxu1 %v233_v14  ;;  %861 = vmatpush.msra.mxu2 %v297_v15  ;;  %v117_v8 = vld [vmem:[%s6605_s2 + $0x8] sm:$0xff] }
  0x9d   :  { %821 = vmatpush.msra.mxu0 %v169_v13  ;;  %880 = vmatpush.msra.mxu3 %v365_v16  ;;  %v181_v10 = vld [vmem:[%s6605_s2 + $0x208] sm:$0xff] }
  0x9e   :  { %842 = vmatpush.msra.mxu1 %v229_v18  ;;  %862 = vmatpush.msra.mxu2 %v293_v19  ;;  %v245_v11 = vld [vmem:[%s6605_s2 + $0x408] sm:$0xff] }
  0x9f   :  { %822 = vmatpush.msra.mxu0 %v165_v17  ;;  %881 = vmatpush.msra.mxu3 %v361_v20  ;;  %v313_v12 = vld [vmem:[%s6605_s2 + $0x628] sm:$0xff] }
  0xa0   :  { %795 = vmatmul.f32.vlgmr.msrb.gmra.mxu2 %v4463_v21  ;;  %843 = vmatpush.msra.mxu1 %v225_v23  ;;  %v433_v13 = vld [vmem:[%s6605_s2 + $0x9e8] sm:$0xff] }
  0xa1   :  { %823 = vmatpush.msra.mxu0 %v161_v22  ;;  %863 = vmatpush.msra.mxu2 %v289_v24  ;;  %v497_v14 = vld [vmem:[%s6605_s2 + $0xbe8] sm:$0xff] }
  0xa2   :  { %882 = vmatpush.msra.mxu3 %v357_v25  ;;  %755 = vmatmul.f32.vlgmr.msrb.gmra.mxu0 %v4477_v26  ;;  %v561_v15 = vld [vmem:[%s6605_s2 + $0xde8] sm:$0xff] }
  0xa3   :  { %815 = vmatmul.f32.vlgmr.msrb.gmra.mxu3 %v4480_v27  ;;  %824 = vmatpush.msra.mxu0 %v157_v28  ;;  %v309_v16 = vld [vmem:[%s6605_s2 + $0x608] sm:$0xff] }
  0xa4   :  { %844 = vmatpush.msra.mxu1 %v221_v29  ;;  %864 = vmatpush.msra.mxu2 %v285_v30  ;;  %v429_v17 = vld [vmem:[%s6605_s2 + $0x9c8] sm:$0xff] }
  0xa5   :  { %883 = vmatpush.msra.mxu3 %v353_v31  ;;  %825 = vmatpush.msra.mxu0 %v153_v33  ;;  %v493_v18 = vld [vmem:[%s6605_s2 + $0xbc8] sm:$0xff] }
  0xa6   :  { %845 = vmatpush.msra.mxu1 %v217_v34  ;;  %865 = vmatpush.msra.mxu2 %v281_v35  ;;  %v557_v19 = vld [vmem:[%s6605_s2 + $0xdc8] sm:$0xff] }
  0xa7   :  { %884 = vmatpush.msra.mxu3 %v349_v36  ;;  %826 = vmatpush.msra.mxu0 %v149_v37  ;;  %v625_v20 = vld [vmem:[%s6605_s2 + $0xfe8] sm:$0xff] }
  0xa8   :  { %846 = vmatpush.msra.mxu1 %v213_v38  ;;  %866 = vmatpush.msra.mxu2 %v277_v39  ;;  %v425_v22 = vld [vmem:[%s6605_s2 + $0x9a8] sm:$0xff] }
  0xa9   :  { %885 = vmatpush.msra.mxu3 %v345_v40  ;;  %827 = vmatpush.msra.mxu0 %v145_v41  ;;  %v489_v23 = vld [vmem:[%s6605_s2 + $0xba8] sm:$0xff] }
  0xaa   :  { %847 = vmatpush.msra.mxu1 %v209_v42  ;;  %867 = vmatpush.msra.mxu2 %v273_v43  ;;  %v553_v24 = vld [vmem:[%s6605_s2 + $0xda8] sm:$0xff] }
  0xab   :  { %886 = vmatpush.msra.mxu3 %v341_v44  ;;  %828 = vmatpush.msra.mxu0 %v141_v45  ;;  %v621_v25 = vld [vmem:[%s6605_s2 + $0xfc8] sm:$0xff] }
  0xac   :  { %848 = vmatpush.msra.mxu1 %v205_v46  ;;  %868 = vmatpush.msra.mxu2 %v269_v47  ;;  %v421_v28 = vld [vmem:[%s6605_s2 + $0x988] sm:$0xff] }
  0xad   :  { %887 = vmatpush.msra.mxu3 %v337_v48  ;;  %829 = vmatpush.msra.mxu0 %v137_v49  ;;  %v485_v29 = vld [vmem:[%s6605_s2 + $0xb88] sm:$0xff] }
  0xae   :  { %849 = vmatpush.msra.mxu1 %v201_v50  ;;  %869 = vmatpush.msra.mxu2 %v265_v51  ;;  %v549_v30 = vld [vmem:[%s6605_s2 + $0xd88] sm:$0xff] }
  0xaf   :  { %888 = vmatpush.msra.mxu3 %v333_v52  ;;  %830 = vmatpush.msra.mxu0 %v133_v53  ;;  %v617_v31 = vld [vmem:[%s6605_s2 + $0xfa8] sm:$0xff] }
  0xb0   :  { %850 = vmatpush.msra.mxu1 %v197_v54  ;;  %870 = vmatpush.msra.mxu2 %v261_v55  ;;  %v417_v33 = vld [vmem:[%s6605_s2 + $0x968] sm:$0xff] }
  0xb1   :  { %889 = vmatpush.msra.mxu3 %v329_v56  ;;  %831 = vmatpush.msra.mxu0 %v129_v57  ;;  %v481_v34 = vld [vmem:[%s6605_s2 + $0xb68] sm:$0xff] }
  0xb2   :  { %851 = vmatpush.msra.mxu1 %v193_v58  ;;  %871 = vmatpush.msra.mxu2 %v257_v59  ;;  %v545_v35 = vld [vmem:[%s6605_s2 + $0xd68] sm:$0xff] }
  0xb3   :  { %890 = vmatpush.msra.mxu3 %v325_v60  ;;  %832 = vmatpush.msra.mxu0 %v125_v61  ;;  %v613_v36 = vld [vmem:[%s6605_s2 + $0xf88] sm:$0xff] }
  0xb4   :  { %852 = vmatpush.msra.mxu1 %v189_v62  ;;  %872 = vmatpush.msra.mxu2 %v253_v63  ;;  %v413_v37 = vld [vmem:[%s6605_s2 + $0x948] sm:$0xff] }
  0xb5   :  { %891 = vmatpush.msra.mxu3 %v321_v0  ;;  %833 = vmatpush.msra.mxu0 %v121_v4  ;;  %v477_v38 = vld [vmem:[%s6605_s2 + $0xb48] sm:$0xff] }
  0xb6   :  { %853 = vmatpush.msra.mxu1 %v185_v5  ;;  %873 = vmatpush.msra.mxu2 %v249_v6  ;;  %v541_v39 = vld [vmem:[%s6605_s2 + $0xd48] sm:$0xff] }
  0xb7   :  { %892 = vmatpush.msra.mxu3 %v317_v7  ;;  %834 = vmatpush.msra.mxu0 %v117_v8  ;;  %v609_v40 = vld [vmem:[%s6605_s2 + $0xf68] sm:$0xff] }
  0xb8   :  { %854 = vmatpush.msra.mxu1 %v181_v10  ;;  %874 = vmatpush.msra.mxu2 %v245_v11  ;;  %v409_v41 = vld [vmem:[%s6605_s2 + $0x928] sm:$0xff] }
  0xb9   :  { %893 = vmatpush.msra.mxu3 %v313_v12  ;;  %899 = vmatpush.msrb.mxu0 %v433_v13  ;;  %v473_v42 = vld [vmem:[%s6605_s2 + $0xb28] sm:$0xff] }
  0xba   :  { %919 = vmatpush.msrb.mxu1 %v497_v14  ;;  %939 = vmatpush.msrb.mxu2 %v561_v15  ;;  %v537_v43 = vld [vmem:[%s6605_s2 + $0xd28] sm:$0xff] }
  0xbb   :  { %894 = vmatpush.msra.mxu3 %v309_v16  ;;  %900 = vmatpush.msrb.mxu0 %v429_v17  ;;  %v605_v44 = vld [vmem:[%s6605_s2 + $0xf48] sm:$0xff] }
  0xbc   :  { %920 = vmatpush.msrb.mxu1 %v493_v18  ;;  %940 = vmatpush.msrb.mxu2 %v557_v19  ;;  %v405_v45 = vld [vmem:[%s6605_s2 + $0x908] sm:$0xff] }
  0xbd   :  { %959 = vmatpush.msrb.mxu3 %v625_v20  ;;  %901 = vmatpush.msrb.mxu0 %v425_v22  ;;  %v469_v46 = vld [vmem:[%s6605_s2 + $0xb08] sm:$0xff]  ;;  %v178_v22 = vld [vmem:[%s6605_s2 + $0x1f0] sm:$0xff] }
  0xbe   :  { %921 = vmatpush.msrb.mxu1 %v489_v23  ;;  %941 = vmatpush.msrb.mxu2 %v553_v24  ;;  %v533_v47 = vld [vmem:[%s6605_s2 + $0xd08] sm:$0xff]  ;;  %v242_v23 = vld [vmem:[%s6605_s2 + $0x3f0] sm:$0xff] }
  0xbf   :  { %960 = vmatpush.msrb.mxu3 %v621_v25  ;;  %902 = vmatpush.msrb.mxu0 %v421_v28  ;;  %v601_v48 = vld [vmem:[%s6605_s2 + $0xf28] sm:$0xff]  ;;  %v306_v24 = vld [vmem:[%s6605_s2 + $0x5f0] sm:$0xff] }
  0xc0   :  { %922 = vmatpush.msrb.mxu1 %v485_v29  ;;  %942 = vmatpush.msrb.mxu2 %v549_v30  ;;  %v401_v49 = vld [vmem:[%s6605_s2 + $0x8e8] sm:$0xff]  ;;  %v174_v28 = vld [vmem:[%s6605_s2 + $0x1d0] sm:$0xff] }
  0xc1   :  { %961 = vmatpush.msrb.mxu3 %v617_v31  ;;  %903 = vmatpush.msrb.mxu0 %v417_v33  ;;  %v465_v50 = vld [vmem:[%s6605_s2 + $0xae8] sm:$0xff]  ;;  %v238_v29 = vld [vmem:[%s6605_s2 + $0x3d0] sm:$0xff] }
  0xc2   :  { %923 = vmatpush.msrb.mxu1 %v481_v34  ;;  %943 = vmatpush.msrb.mxu2 %v545_v35  ;;  %v529_v51 = vld [vmem:[%s6605_s2 + $0xce8] sm:$0xff]  ;;  %v170_v30 = vld [vmem:[%s6605_s2 + $0x1b0] sm:$0xff] }
  0xc3   :  { %962 = vmatpush.msrb.mxu3 %v613_v36  ;;  %904 = vmatpush.msrb.mxu0 %v413_v37  ;;  %v597_v52 = vld [vmem:[%s6605_s2 + $0xf08] sm:$0xff]  ;;  %v234_v31 = vld [vmem:[%s6605_s2 + $0x3b0] sm:$0xff] }
  0xc4   :  { %924 = vmatpush.msrb.mxu1 %v477_v38  ;;  %944 = vmatpush.msrb.mxu2 %v541_v39  ;;  %v397_v53 = vld [vmem:[%s6605_s2 + $0x8c8] sm:$0xff]  ;;  %v298_v33 = vld [vmem:[%s6605_s2 + $0x5b0] sm:$0xff] }
  0xc5   :  { %963 = vmatpush.msrb.mxu3 %v609_v40  ;;  %905 = vmatpush.msrb.mxu0 %v409_v41  ;;  %v461_v54 = vld [vmem:[%s6605_s2 + $0xac8] sm:$0xff]  ;;  %v366_v34 = vld [vmem:[%s6605_s2 + $0x7d0] sm:$0xff] }
  0xc6   :  { %925 = vmatpush.msrb.mxu1 %v473_v42  ;;  %945 = vmatpush.msrb.mxu2 %v537_v43  ;;  %v525_v55 = vld [vmem:[%s6605_s2 + $0xcc8] sm:$0xff]  ;;  %v166_v35 = vld [vmem:[%s6605_s2 + $0x190] sm:$0xff] }
  0xc7   :  { %964 = vmatpush.msrb.mxu3 %v605_v44  ;;  %906 = vmatpush.msrb.mxu0 %v405_v45  ;;  %v593_v56 = vld [vmem:[%s6605_s2 + $0xee8] sm:$0xff]  ;;  %v230_v36 = vld [vmem:[%s6605_s2 + $0x390] sm:$0xff] }
  0xc8   :  { %926 = vmatpush.msrb.mxu1 %v469_v46  ;;  %946 = vmatpush.msrb.mxu2 %v533_v47  ;;  %v393_v57 = vld [vmem:[%s6605_s2 + $0x8a8] sm:$0xff]  ;;  %v294_v37 = vld [vmem:[%s6605_s2 + $0x590] sm:$0xff] }
  0xc9   :  { %965 = vmatpush.msrb.mxu3 %v601_v48  ;;  %907 = vmatpush.msrb.mxu0 %v401_v49  ;;  %v457_v58 = vld [vmem:[%s6605_s2 + $0xaa8] sm:$0xff]  ;;  %v362_v38 = vld [vmem:[%s6605_s2 + $0x7b0] sm:$0xff] }
  0xca   :  { %927 = vmatpush.msrb.mxu1 %v465_v50  ;;  %947 = vmatpush.msrb.mxu2 %v529_v51  ;;  %v521_v59 = vld [vmem:[%s6605_s2 + $0xca8] sm:$0xff]  ;;  %v162_v39 = vld [vmem:[%s6605_s2 + $0x170] sm:$0xff] }
  0xcb   :  { %966 = vmatpush.msrb.mxu3 %v597_v52  ;;  %908 = vmatpush.msrb.mxu0 %v397_v53  ;;  %v589_v60 = vld [vmem:[%s6605_s2 + $0xec8] sm:$0xff]  ;;  %v226_v40 = vld [vmem:[%s6605_s2 + $0x370] sm:$0xff] }
  0xcc   :  { %928 = vmatpush.msrb.mxu1 %v461_v54  ;;  %948 = vmatpush.msrb.mxu2 %v525_v55  ;;  %v389_v61 = vld [vmem:[%s6605_s2 + $0x888] sm:$0xff]  ;;  %v290_v41 = vld [vmem:[%s6605_s2 + $0x570] sm:$0xff] }
  0xcd   :  { %967 = vmatpush.msrb.mxu3 %v593_v56  ;;  %v453_v62 = vld [vmem:[%s6605_s2 + $0xa88] sm:$0xff]  ;;  %909 = vmatpush.msrb.mxu0 %v393_v57  ;;  %v358_v42 = vld [vmem:[%s6605_s2 + $0x790] sm:$0xff] }
  0xce   :  { %929 = vmatpush.msrb.mxu1 %v457_v58  ;;  %v517_v63 = vld [vmem:[%s6605_s2 + $0xc88] sm:$0xff]  ;;  %949 = vmatpush.msrb.mxu2 %v521_v59  ;;  %v158_v43 = vld [vmem:[%s6605_s2 + $0x150] sm:$0xff] }
  0xcf   :  { %v585_v0 = vld [vmem:[%s6605_s2 + $0xea8] sm:$0xff]  ;;  %968 = vmatpush.msrb.mxu3 %v589_v60  ;;  %910 = vmatpush.msrb.mxu0 %v389_v61  ;;  %v222_v44 = vld [vmem:[%s6605_s2 + $0x350] sm:$0xff] }
  0xd0   :  { %v385_v4 = vld [vmem:[%s6605_s2 + $0x868] sm:$0xff]  ;;  %930 = vmatpush.msrb.mxu1 %v453_v62  ;;  %950 = vmatpush.msrb.mxu2 %v517_v63  ;;  %v286_v45 = vld [vmem:[%s6605_s2 + $0x550] sm:$0xff] }
  0xd1   :  { %v449_v5 = vld [vmem:[%s6605_s2 + $0xa68] sm:$0xff]  ;;  %969 = vmatpush.msrb.mxu3 %v585_v0  ;;  %911 = vmatpush.msrb.mxu0 %v385_v4  ;;  %v354_v46 = vld [vmem:[%s6605_s2 + $0x770] sm:$0xff] }
  0xd2   :  { %v513_v6 = vld [vmem:[%s6605_s2 + $0xc68] sm:$0xff]  ;;  %931 = vmatpush.msrb.mxu1 %v449_v5  ;;  %835 = vmatmul.f32.vlgmr.msra.gmra.mxu0 %v4403_v1  ;;  %v302_v1 = vld [vmem:[%s6605_s2 + $0x5d0] sm:$0xff] }
  0xd3   :  { %v581_v7 = vld [vmem:[%s6605_s2 + $0xe88] sm:$0xff]  ;;  %951 = vmatpush.msrb.mxu2 %v513_v6  ;;  %855 = vmatmul.f32.vlgmr.msra.gmra.mxu1 %v4405_v2  ;;  %v370_v2 = vld [vmem:[%s6605_s2 + $0x7f0] sm:$0xff] }
  0xd4   :  { %v381_v8 = vld [vmem:[%s6605_s2 + $0x848] sm:$0xff]  ;;  %970 = vmatpush.msrb.mxu3 %v581_v7  ;;  %875 = vmatmul.f32.vlgmr.msra.gmra.mxu2 %v4407_v3  ;;  %v154_v47 = vld [vmem:[%s6605_s2 + $0x130] sm:$0xff] }
  0xd5   :  { %v445_v10 = vld [vmem:[%s6605_s2 + $0xa48] sm:$0xff]  ;;  %912 = vmatpush.msrb.mxu0 %v381_v8  ;;  %895 = vmatmul.f32.vlgmr.msra.gmra.mxu3 %v4427_v9  ;;  %v218_v48 = vld [vmem:[%s6605_s2 + $0x330] sm:$0xff] }
  0xd6   :  { %v509_v11 = vld [vmem:[%s6605_s2 + $0xc48] sm:$0xff]  ;;  %932 = vmatpush.msrb.mxu1 %v445_v10  ;;  %v282_v49 = vld [vmem:[%s6605_s2 + $0x530] sm:$0xff] }
  0xd7   :  { %v577_v12 = vld [vmem:[%s6605_s2 + $0xe68] sm:$0xff]  ;;  %952 = vmatpush.msrb.mxu2 %v509_v11  ;;  %v350_v50 = vld [vmem:[%s6605_s2 + $0x750] sm:$0xff] }
  0xd8   :  { %v377_v13 = vld [vmem:[%s6605_s2 + $0x828] sm:$0xff]  ;;  %971 = vmatpush.msrb.mxu3 %v577_v12  ;;  %v150_v51 = vld [vmem:[%s6605_s2 + $0x110] sm:$0xff] }
  0xd9   :  { %v441_v14 = vld [vmem:[%s6605_s2 + $0xa28] sm:$0xff]  ;;  %913 = vmatpush.msrb.mxu0 %v377_v13  ;;  %v214_v52 = vld [vmem:[%s6605_s2 + $0x310] sm:$0xff] }
  0xda   :  { %v505_v15 = vld [vmem:[%s6605_s2 + $0xc28] sm:$0xff]  ;;  %933 = vmatpush.msrb.mxu1 %v441_v14  ;;  %v278_v53 = vld [vmem:[%s6605_s2 + $0x510] sm:$0xff] }
  0xdb   :  { %v573_v16 = vld [vmem:[%s6605_s2 + $0xe48] sm:$0xff]  ;;  %953 = vmatpush.msrb.mxu2 %v505_v15  ;;  %v346_v54 = vld [vmem:[%s6605_s2 + $0x730] sm:$0xff] }
  0xdc   :  { %v373_v17 = vld [vmem:[%s6605_s2 + $0x808] sm:$0xff]  ;;  %972 = vmatpush.msrb.mxu3 %v573_v16  ;;  %v146_v55 = vld [vmem:[%s6605_s2 + $0xf0] sm:$0xff] }
  0xdd   :  { %v437_v18 = vld [vmem:[%s6605_s2 + $0xa08] sm:$0xff]  ;;  %914 = vmatpush.msrb.mxu0 %v373_v17  ;;  %v210_v56 = vld [vmem:[%s6605_s2 + $0x2f0] sm:$0xff] }
  0xde   :  { %v501_v19 = vld [vmem:[%s6605_s2 + $0xc08] sm:$0xff]  ;;  %934 = vmatpush.msrb.mxu1 %v437_v18  ;;  %915 = vmatmul.f32.vlgmr.msrb.gmra.mxu0 %v4477_v26  ;;  %v274_v57 = vld [vmem:[%s6605_s2 + $0x4f0] sm:$0xff] }
  0xdf   :  { %v569_v20 = vld [vmem:[%s6605_s2 + $0xe28] sm:$0xff]  ;;  %954 = vmatpush.msrb.mxu2 %v501_v19  ;;  %979 = vmatpush.msra.mxu0 %v178_v22  ;;  %v342_v58 = vld [vmem:[%s6605_s2 + $0x710] sm:$0xff] }
  0xe0   :  { %973 = vmatpush.msrb.mxu3 %v569_v20  ;;  %v565_v25 = vld [vmem:[%s6605_s2 + $0xe08] sm:$0xff]  ;;  %999 = vmatpush.msra.mxu1 %v242_v23  ;;  %v142_v59 = vld [vmem:[%s6605_s2 + $0xd0] sm:$0xff] }
  0xe1   :  { %1019 = vmatpush.msra.mxu2 %v306_v24  ;;  %980 = vmatpush.msra.mxu0 %v174_v28  ;;  %v206_v60 = vld [vmem:[%s6605_s2 + $0x2d0] sm:$0xff] }
  0xe2   :  { %974 = vmatpush.msrb.mxu3 %v565_v25  ;;  %1000 = vmatpush.msra.mxu1 %v238_v29  ;;  %v270_v61 = vld [vmem:[%s6605_s2 + $0x4d0] sm:$0xff] }
  0xe3   :  { %1020 = vmatpush.msra.mxu2 %v302_v1  ;;  %981 = vmatpush.msra.mxu0 %v170_v30  ;;  %v338_v62 = vld [vmem:[%s6605_s2 + $0x6f0] sm:$0xff] }
  0xe4   :  { %1039 = vmatpush.msra.mxu3 %v370_v2  ;;  %1001 = vmatpush.msra.mxu1 %v234_v31  ;;  %v138_v63 = vld [vmem:[%s6605_s2 + $0xb0] sm:$0xff] }
  0xe5   :  { %1021 = vmatpush.msra.mxu2 %v298_v33  ;;  %982 = vmatpush.msra.mxu0 %v166_v35  ;;  %v202_v0 = vld [vmem:[%s6605_s2 + $0x2b0] sm:$0xff] }
  0xe6   :  { %1040 = vmatpush.msra.mxu3 %v366_v34  ;;  %1002 = vmatpush.msra.mxu1 %v230_v36  ;;  %v266_v4 = vld [vmem:[%s6605_s2 + $0x4b0] sm:$0xff] }
  0xe7   :  { %1022 = vmatpush.msra.mxu2 %v294_v37  ;;  %983 = vmatpush.msra.mxu0 %v162_v39  ;;  %v334_v5 = vld [vmem:[%s6605_s2 + $0x6d0] sm:$0xff] }
  0xe8   :  { %1041 = vmatpush.msra.mxu3 %v362_v38  ;;  %955 = vmatmul.f32.vlgmr.msrb.gmra.mxu2 %v4463_v21  ;;  %v134_v6 = vld [vmem:[%s6605_s2 + $0x90] sm:$0xff] }
  0xe9   :  { %1003 = vmatpush.msra.mxu1 %v226_v40  ;;  %1023 = vmatpush.msra.mxu2 %v290_v41  ;;  %v198_v7 = vld [vmem:[%s6605_s2 + $0x290] sm:$0xff] }
  0xea   :  { %1042 = vmatpush.msra.mxu3 %v358_v42  ;;  %984 = vmatpush.msra.mxu0 %v158_v43  ;;  %v262_v8 = vld [vmem:[%s6605_s2 + $0x490] sm:$0xff] }
  0xeb   :  { %975 = vmatmul.f32.vlgmr.msrb.gmra.mxu3 %v4480_v27  ;;  %1004 = vmatpush.msra.mxu1 %v222_v44  ;;  %v330_v10 = vld [vmem:[%s6605_s2 + $0x6b0] sm:$0xff] }
  0xec   :  { %1024 = vmatpush.msra.mxu2 %v286_v45  ;;  %1043 = vmatpush.msra.mxu3 %v354_v46  ;;  %v130_v11 = vld [vmem:[%s6605_s2 + $0x70] sm:$0xff] }
  0xed   :  { %935 = vmatmul.f32.vlgmr.msrb.gmra.mxu1 %v4495_v32  ;;  %985 = vmatpush.msra.mxu0 %v154_v47  ;;  %v194_v12 = vld [vmem:[%s6605_s2 + $0x270] sm:$0xff] }
  0xee   :  { %1005 = vmatpush.msra.mxu1 %v218_v48  ;;  %1025 = vmatpush.msra.mxu2 %v282_v49  ;;  %v258_v13 = vld [vmem:[%s6605_s2 + $0x470] sm:$0xff] }
  0xef   :  { %1044 = vmatpush.msra.mxu3 %v350_v50  ;;  %986 = vmatpush.msra.mxu0 %v150_v51  ;;  %v326_v14 = vld [vmem:[%s6605_s2 + $0x690] sm:$0xff] }
  0xf0   :  { %1006 = vmatpush.msra.mxu1 %v214_v52  ;;  %1026 = vmatpush.msra.mxu2 %v278_v53  ;;  %v126_v15 = vld [vmem:[%s6605_s2 + $0x50] sm:$0xff] }
  0xf1   :  { %1045 = vmatpush.msra.mxu3 %v346_v54  ;;  %987 = vmatpush.msra.mxu0 %v146_v55  ;;  %v190_v16 = vld [vmem:[%s6605_s2 + $0x250] sm:$0xff] }
  0xf2   :  { %1007 = vmatpush.msra.mxu1 %v210_v56  ;;  %1027 = vmatpush.msra.mxu2 %v274_v57  ;;  %v254_v17 = vld [vmem:[%s6605_s2 + $0x450] sm:$0xff] }
  0xf3   :  { %1046 = vmatpush.msra.mxu3 %v342_v58  ;;  %988 = vmatpush.msra.mxu0 %v142_v59  ;;  %v322_v18 = vld [vmem:[%s6605_s2 + $0x670] sm:$0xff] }
  0xf4   :  { %1008 = vmatpush.msra.mxu1 %v206_v60  ;;  %1028 = vmatpush.msra.mxu2 %v270_v61  ;;  %v122_v19 = vld [vmem:[%s6605_s2 + $0x30] sm:$0xff] }
  0xf5   :  { %1047 = vmatpush.msra.mxu3 %v338_v62  ;;  %989 = vmatpush.msra.mxu0 %v138_v63  ;;  %v186_v20 = vld [vmem:[%s6605_s2 + $0x230] sm:$0xff] }
  0xf6   :  { %1009 = vmatpush.msra.mxu1 %v202_v0  ;;  %1029 = vmatpush.msra.mxu2 %v266_v4  ;;  %v250_v22 = vld [vmem:[%s6605_s2 + $0x430] sm:$0xff] }
  0xf7   :  { %1048 = vmatpush.msra.mxu3 %v334_v5  ;;  %990 = vmatpush.msra.mxu0 %v134_v6  ;;  %v318_v23 = vld [vmem:[%s6605_s2 + $0x650] sm:$0xff] }
  0xf8   :  { %1010 = vmatpush.msra.mxu1 %v198_v7  ;;  %1030 = vmatpush.msra.mxu2 %v262_v8  ;;  %v118_v24 = vld [vmem:[%s6605_s2 + $0x10] sm:$0xff] }
  0xf9   :  { %1049 = vmatpush.msra.mxu3 %v330_v10  ;;  %991 = vmatpush.msra.mxu0 %v130_v11  ;;  %v182_v25 = vld [vmem:[%s6605_s2 + $0x210] sm:$0xff] }
  0xfa   :  { %1011 = vmatpush.msra.mxu1 %v194_v12  ;;  %1031 = vmatpush.msra.mxu2 %v258_v13  ;;  %v246_v28 = vld [vmem:[%s6605_s2 + $0x410] sm:$0xff] }
  0xfb   :  { %1050 = vmatpush.msra.mxu3 %v326_v14  ;;  %992 = vmatpush.msra.mxu0 %v126_v15  ;;  %v314_v29 = vld [vmem:[%s6605_s2 + $0x630] sm:$0xff] }
  0xfc   :  { %1012 = vmatpush.msra.mxu1 %v190_v16  ;;  %1032 = vmatpush.msra.mxu2 %v254_v17  ;;  %v434_v1 = vld [vmem:[%s6605_s2 + $0x9f0] sm:$0xff] }
  0xfd   :  { %1051 = vmatpush.msra.mxu3 %v322_v18  ;;  %993 = vmatpush.msra.mxu0 %v122_v19  ;;  %v498_v2 = vld [vmem:[%s6605_s2 + $0xbf0] sm:$0xff] }
  0xfe   :  { %1013 = vmatpush.msra.mxu1 %v186_v20  ;;  %1033 = vmatpush.msra.mxu2 %v250_v22  ;;  %v562_v30 = vld [vmem:[%s6605_s2 + $0xdf0] sm:$0xff] }
  0xff   :  { %1052 = vmatpush.msra.mxu3 %v318_v23  ;;  %994 = vmatpush.msra.mxu0 %v118_v24  ;;  %v310_v31 = vld [vmem:[%s6605_s2 + $0x610] sm:$0xff] }
 0x100   :  { %1014 = vmatpush.msra.mxu1 %v182_v25  ;;  %1034 = vmatpush.msra.mxu2 %v246_v28  ;;  %v430_v33 = vld [vmem:[%s6605_s2 + $0x9d0] sm:$0xff]  ;;  %v5177_v25 = vld.sshfl [vmem:[#allocation1] sm:$0xff pattern:$0x73625140] }
 0x101   :  { %1053 = vmatpush.msra.mxu3 %v314_v29  ;;  %v494_v34 = vld [vmem:[%s6605_s2 + $0xbd0] sm:$0xff]  ;;  %1059 = vmatpush.msrb.mxu0 %v434_v1 }
 0x102   :  { %1079 = vmatpush.msrb.mxu1 %v498_v2  ;;  %v558_v35 = vld [vmem:[%s6605_s2 + $0xdd0] sm:$0xff]  ;;  %1099 = vmatpush.msrb.mxu2 %v562_v30 }
 0x103   :  { %v626_v36 = vld [vmem:[%s6605_s2 + $0xff0] sm:$0xff]  ;;  %1054 = vmatpush.msra.mxu3 %v310_v31  ;;  %1060 = vmatpush.msrb.mxu0 %v430_v33 }
 0x104   :  { %v426_v37 = vld [vmem:[%s6605_s2 + $0x9b0] sm:$0xff]  ;;  %1080 = vmatpush.msrb.mxu1 %v494_v34  ;;  %1100 = vmatpush.msrb.mxu2 %v558_v35  ;;  %v179_v35 = vld [vmem:[%s6605_s2 + $0x1f8] sm:$0xff] }
 0x105   :  { %v490_v38 = vld [vmem:[%s6605_s2 + $0xbb0] sm:$0xff]  ;;  %1119 = vmatpush.msrb.mxu3 %v626_v36  ;;  %1061 = vmatpush.msrb.mxu0 %v426_v37  ;;  %v243_v36 = vld [vmem:[%s6605_s2 + $0x3f8] sm:$0xff] }
 0x106   :  { %v554_v39 = vld [vmem:[%s6605_s2 + $0xdb0] sm:$0xff]  ;;  %1081 = vmatpush.msrb.mxu1 %v490_v38  ;;  %1035 = vmatmul.f32.vlgmr.msra.gmra.mxu2 %v4407_v3  ;;  %v307_v37 = vld [vmem:[%s6605_s2 + $0x5f8] sm:$0xff] }
 0x107   :  { %v622_v40 = vld [vmem:[%s6605_s2 + $0xfd0] sm:$0xff]  ;;  %1101 = vmatpush.msrb.mxu2 %v554_v39  ;;  %995 = vmatmul.f32.vlgmr.msra.gmra.mxu0 %v5177_v25  ;;  %v175_v39 = vld [vmem:[%s6605_s2 + $0x1d8] sm:$0xff] }
 0x108   :  { %v422_v41 = vld [vmem:[%s6605_s2 + $0x990] sm:$0xff]  ;;  %1120 = vmatpush.msrb.mxu3 %v622_v40  ;;  %v239_v40 = vld [vmem:[%s6605_s2 + $0x3d8] sm:$0xff] }
 0x109   :  { %v486_v42 = vld [vmem:[%s6605_s2 + $0xb90] sm:$0xff]  ;;  %1062 = vmatpush.msrb.mxu0 %v422_v41  ;;  %1055 = vmatmul.f32.vlgmr.msra.gmra.mxu3 %v4427_v9  ;;  %v5196_v9 = vld.sshfl [vmem:[#allocation1 + $0x8] sm:$0xff pattern:$0x73625140]  ;;  %v303_v41 = vld [vmem:[%s6605_s2 + $0x5d8] sm:$0xff] }
 0x10a   :  { %v550_v43 = vld [vmem:[%s6605_s2 + $0xd90] sm:$0xff]  ;;  %1082 = vmatpush.msrb.mxu1 %v486_v42  ;;  %v171_v42 = vld [vmem:[%s6605_s2 + $0x1b8] sm:$0xff] }
 0x10b   :  { %v618_v44 = vld [vmem:[%s6605_s2 + $0xfb0] sm:$0xff]  ;;  %1102 = vmatpush.msrb.mxu2 %v550_v43  ;;  %1015 = vmatmul.f32.vlgmr.msra.gmra.mxu1 %v5196_v9  ;;  %v235_v43 = vld [vmem:[%s6605_s2 + $0x3b8] sm:$0xff] }
 0x10c   :  { %v418_v45 = vld [vmem:[%s6605_s2 + $0x970] sm:$0xff]  ;;  %1121 = vmatpush.msrb.mxu3 %v618_v44  ;;  %v367_v44 = vld [vmem:[%s6605_s2 + $0x7d8] sm:$0xff] }
 0x10d   :  { %v482_v46 = vld [vmem:[%s6605_s2 + $0xb70] sm:$0xff]  ;;  %1063 = vmatpush.msrb.mxu0 %v418_v45  ;;  %v231_v45 = vld [vmem:[%s6605_s2 + $0x398] sm:$0xff] }
 0x10e   :  { %v546_v47 = vld [vmem:[%s6605_s2 + $0xd70] sm:$0xff]  ;;  %1083 = vmatpush.msrb.mxu1 %v482_v46  ;;  %v295_v46 = vld [vmem:[%s6605_s2 + $0x598] sm:$0xff] }
 0x10f   :  { %v614_v48 = vld [vmem:[%s6605_s2 + $0xf90] sm:$0xff]  ;;  %1103 = vmatpush.msrb.mxu2 %v546_v47  ;;  %v363_v47 = vld [vmem:[%s6605_s2 + $0x7b8] sm:$0xff] }
 0x110   :  { %v414_v49 = vld [vmem:[%s6605_s2 + $0x950] sm:$0xff]  ;;  %1122 = vmatpush.msrb.mxu3 %v614_v48  ;;  %v227_v48 = vld [vmem:[%s6605_s2 + $0x378] sm:$0xff] }
 0x111   :  { %v478_v50 = vld [vmem:[%s6605_s2 + $0xb50] sm:$0xff]  ;;  %1064 = vmatpush.msrb.mxu0 %v414_v49  ;;  %v291_v49 = vld [vmem:[%s6605_s2 + $0x578] sm:$0xff] }
 0x112   :  { %v542_v51 = vld [vmem:[%s6605_s2 + $0xd50] sm:$0xff]  ;;  %1084 = vmatpush.msrb.mxu1 %v478_v50  ;;  %v359_v50 = vld [vmem:[%s6605_s2 + $0x798] sm:$0xff] }
 0x113   :  { %v610_v52 = vld [vmem:[%s6605_s2 + $0xf70] sm:$0xff]  ;;  %1104 = vmatpush.msrb.mxu2 %v542_v51  ;;  %v159_v51 = vld [vmem:[%s6605_s2 + $0x158] sm:$0xff] }
 0x114   :  { %v410_v53 = vld [vmem:[%s6605_s2 + $0x930] sm:$0xff]  ;;  %1123 = vmatpush.msrb.mxu3 %v610_v52  ;;  %v223_v52 = vld [vmem:[%s6605_s2 + $0x358] sm:$0xff] }
 0x115   :  { %v474_v54 = vld [vmem:[%s6605_s2 + $0xb30] sm:$0xff]  ;;  %1065 = vmatpush.msrb.mxu0 %v410_v53  ;;  %v287_v53 = vld [vmem:[%s6605_s2 + $0x558] sm:$0xff] }
 0x116   :  { %v538_v55 = vld [vmem:[%s6605_s2 + $0xd30] sm:$0xff]  ;;  %1085 = vmatpush.msrb.mxu1 %v474_v54  ;;  %v355_v54 = vld [vmem:[%s6605_s2 + $0x778] sm:$0xff] }
 0x117   :  { %v606_v56 = vld [vmem:[%s6605_s2 + $0xf50] sm:$0xff]  ;;  %1105 = vmatpush.msrb.mxu2 %v538_v55  ;;  %v155_v55 = vld [vmem:[%s6605_s2 + $0x138] sm:$0xff] }
 0x118   :  { %v406_v57 = vld [vmem:[%s6605_s2 + $0x910] sm:$0xff]  ;;  %1124 = vmatpush.msrb.mxu3 %v606_v56  ;;  %v219_v56 = vld [vmem:[%s6605_s2 + $0x338] sm:$0xff] }
 0x119   :  { %v470_v58 = vld [vmem:[%s6605_s2 + $0xb10] sm:$0xff]  ;;  %1066 = vmatpush.msrb.mxu0 %v406_v57  ;;  %v283_v57 = vld [vmem:[%s6605_s2 + $0x538] sm:$0xff] }
 0x11a   :  { %v534_v59 = vld [vmem:[%s6605_s2 + $0xd10] sm:$0xff]  ;;  %1086 = vmatpush.msrb.mxu1 %v470_v58  ;;  %v351_v58 = vld [vmem:[%s6605_s2 + $0x758] sm:$0xff] }
 0x11b   :  { %v602_v60 = vld [vmem:[%s6605_s2 + $0xf30] sm:$0xff]  ;;  %1106 = vmatpush.msrb.mxu2 %v534_v59  ;;  %v151_v59 = vld [vmem:[%s6605_s2 + $0x118] sm:$0xff] }
 0x11c   :  { %v402_v61 = vld [vmem:[%s6605_s2 + $0x8f0] sm:$0xff]  ;;  %1125 = vmatpush.msrb.mxu3 %v602_v60  ;;  %v215_v60 = vld [vmem:[%s6605_s2 + $0x318] sm:$0xff] }
 0x11d   :  { %v466_v62 = vld [vmem:[%s6605_s2 + $0xaf0] sm:$0xff]  ;;  %1067 = vmatpush.msrb.mxu0 %v402_v61  ;;  %v279_v61 = vld [vmem:[%s6605_s2 + $0x518] sm:$0xff] }
 0x11e   :  { %v530_v63 = vld [vmem:[%s6605_s2 + $0xcf0] sm:$0xff]  ;;  %1087 = vmatpush.msrb.mxu1 %v466_v62  ;;  %v347_v62 = vld [vmem:[%s6605_s2 + $0x738] sm:$0xff] }
 0x11f   :  { %v598_v0 = vld [vmem:[%s6605_s2 + $0xf10] sm:$0xff]  ;;  %1107 = vmatpush.msrb.mxu2 %v530_v63  ;;  %v147_v63 = vld [vmem:[%s6605_s2 + $0xf8] sm:$0xff] }
 0x120   :  { %v398_v4 = vld [vmem:[%s6605_s2 + $0x8d0] sm:$0xff]  ;;  %1126 = vmatpush.msrb.mxu3 %v598_v0  ;;  %v211_v0 = vld [vmem:[%s6605_s2 + $0x2f8] sm:$0xff] }
 0x121   :  { %v462_v5 = vld [vmem:[%s6605_s2 + $0xad0] sm:$0xff]  ;;  %1068 = vmatpush.msrb.mxu0 %v398_v4  ;;  %v275_v4 = vld [vmem:[%s6605_s2 + $0x4f8] sm:$0xff] }
 0x122   :  { %v526_v6 = vld [vmem:[%s6605_s2 + $0xcd0] sm:$0xff]  ;;  %1088 = vmatpush.msrb.mxu1 %v462_v5  ;;  %v343_v5 = vld [vmem:[%s6605_s2 + $0x718] sm:$0xff] }
 0x123   :  { %v594_v7 = vld [vmem:[%s6605_s2 + $0xef0] sm:$0xff]  ;;  %1108 = vmatpush.msrb.mxu2 %v526_v6  ;;  %v143_v6 = vld [vmem:[%s6605_s2 + $0xd8] sm:$0xff] }
 0x124   :  { %v394_v8 = vld [vmem:[%s6605_s2 + $0x8b0] sm:$0xff]  ;;  %1127 = vmatpush.msrb.mxu3 %v594_v7  ;;  %v207_v7 = vld [vmem:[%s6605_s2 + $0x2d8] sm:$0xff] }
 0x125   :  { %v458_v10 = vld [vmem:[%s6605_s2 + $0xab0] sm:$0xff]  ;;  %1069 = vmatpush.msrb.mxu0 %v394_v8  ;;  %v271_v8 = vld [vmem:[%s6605_s2 + $0x4d8] sm:$0xff] }
 0x126   :  { %v522_v11 = vld [vmem:[%s6605_s2 + $0xcb0] sm:$0xff]  ;;  %1089 = vmatpush.msrb.mxu1 %v458_v10  ;;  %v339_v10 = vld [vmem:[%s6605_s2 + $0x6f8] sm:$0xff] }
 0x127   :  { %v590_v12 = vld [vmem:[%s6605_s2 + $0xed0] sm:$0xff]  ;;  %1109 = vmatpush.msrb.mxu2 %v522_v11  ;;  %v139_v11 = vld [vmem:[%s6605_s2 + $0xb8] sm:$0xff] }
 0x128   :  { %v390_v13 = vld [vmem:[%s6605_s2 + $0x890] sm:$0xff]  ;;  %1128 = vmatpush.msrb.mxu3 %v590_v12  ;;  %v203_v12 = vld [vmem:[%s6605_s2 + $0x2b8] sm:$0xff] }
 0x129   :  { %v454_v14 = vld [vmem:[%s6605_s2 + $0xa90] sm:$0xff]  ;;  %1070 = vmatpush.msrb.mxu0 %v390_v13  ;;  %v267_v13 = vld [vmem:[%s6605_s2 + $0x4b8] sm:$0xff] }
 0x12a   :  { %v518_v15 = vld [vmem:[%s6605_s2 + $0xc90] sm:$0xff]  ;;  %1090 = vmatpush.msrb.mxu1 %v454_v14  ;;  %v335_v14 = vld [vmem:[%s6605_s2 + $0x6d8] sm:$0xff] }
 0x12b   :  { %v586_v16 = vld [vmem:[%s6605_s2 + $0xeb0] sm:$0xff]  ;;  %1110 = vmatpush.msrb.mxu2 %v518_v15  ;;  %v135_v15 = vld [vmem:[%s6605_s2 + $0x98] sm:$0xff] }
 0x12c   :  { %v386_v17 = vld [vmem:[%s6605_s2 + $0x870] sm:$0xff]  ;;  %1129 = vmatpush.msrb.mxu3 %v586_v16  ;;  %v199_v16 = vld [vmem:[%s6605_s2 + $0x298] sm:$0xff] }
 0x12d   :  { %v450_v18 = vld [vmem:[%s6605_s2 + $0xa70] sm:$0xff]  ;;  %1071 = vmatpush.msrb.mxu0 %v386_v17  ;;  %v263_v17 = vld [vmem:[%s6605_s2 + $0x498] sm:$0xff] }
 0x12e   :  { %v514_v19 = vld [vmem:[%s6605_s2 + $0xc70] sm:$0xff]  ;;  %1091 = vmatpush.msrb.mxu1 %v450_v18  ;;  %v331_v18 = vld [vmem:[%s6605_s2 + $0x6b8] sm:$0xff] }
 0x12f   :  { %v582_v20 = vld [vmem:[%s6605_s2 + $0xe90] sm:$0xff]  ;;  %1111 = vmatpush.msrb.mxu2 %v514_v19  ;;  %v131_v19 = vld [vmem:[%s6605_s2 + $0x78] sm:$0xff] }
 0x130   :  { %v382_v22 = vld [vmem:[%s6605_s2 + $0x850] sm:$0xff]  ;;  %1130 = vmatpush.msrb.mxu3 %v582_v20  ;;  %v195_v20 = vld [vmem:[%s6605_s2 + $0x278] sm:$0xff] }
 0x131   :  { %v446_v23 = vld [vmem:[%s6605_s2 + $0xa50] sm:$0xff]  ;;  %1072 = vmatpush.msrb.mxu0 %v382_v22  ;;  %v259_v22 = vld [vmem:[%s6605_s2 + $0x478] sm:$0xff] }
 0x132   :  { %v510_v24 = vld [vmem:[%s6605_s2 + $0xc50] sm:$0xff]  ;;  %1092 = vmatpush.msrb.mxu1 %v446_v23  ;;  %v327_v23 = vld [vmem:[%s6605_s2 + $0x698] sm:$0xff] }
 0x133   :  { %v578_v3 = vld [vmem:[%s6605_s2 + $0xe70] sm:$0xff]  ;;  %1112 = vmatpush.msrb.mxu2 %v510_v24  ;;  %v127_v24 = vld [vmem:[%s6605_s2 + $0x58] sm:$0xff] }
 0x134   :  { %v378_v28 = vld [vmem:[%s6605_s2 + $0x830] sm:$0xff]  ;;  %1131 = vmatpush.msrb.mxu3 %v578_v3  ;;  %v191_v3 = vld [vmem:[%s6605_s2 + $0x258] sm:$0xff] }
 0x135   :  { %v442_v29 = vld [vmem:[%s6605_s2 + $0xa30] sm:$0xff]  ;;  %1073 = vmatpush.msrb.mxu0 %v378_v28  ;;  %v255_v28 = vld [vmem:[%s6605_s2 + $0x458] sm:$0xff] }
 0x136   :  { %v506_v1 = vld [vmem:[%s6605_s2 + $0xc30] sm:$0xff]  ;;  %1093 = vmatpush.msrb.mxu1 %v442_v29  ;;  %v323_v29 = vld [vmem:[%s6605_s2 + $0x678] sm:$0xff] }
 0x137   :  { %v574_v2 = vld [vmem:[%s6605_s2 + $0xe50] sm:$0xff]  ;;  %1113 = vmatpush.msrb.mxu2 %v506_v1  ;;  %v123_v1 = vld [vmem:[%s6605_s2 + $0x38] sm:$0xff] }
 0x138   :  { %v374_v30 = vld [vmem:[%s6605_s2 + $0x810] sm:$0xff]  ;;  %1132 = vmatpush.msrb.mxu3 %v574_v2  ;;  %v187_v2 = vld [vmem:[%s6605_s2 + $0x238] sm:$0xff] }
 0x139   :  { %v438_v31 = vld [vmem:[%s6605_s2 + $0xa10] sm:$0xff]  ;;  %1074 = vmatpush.msrb.mxu0 %v374_v30  ;;  %v251_v30 = vld [vmem:[%s6605_s2 + $0x438] sm:$0xff] }
 0x13a   :  { %v502_v33 = vld [vmem:[%s6605_s2 + $0xc10] sm:$0xff]  ;;  %1094 = vmatpush.msrb.mxu1 %v438_v31  ;;  %1075 = vmatmul.f32.vlgmr.msrb.gmra.mxu0 %v4477_v26  ;;  %v299_v26 = vld [vmem:[%s6605_s2 + $0x5b8] sm:$0xff] }
 0x13b   :  { %v570_v34 = vld [vmem:[%s6605_s2 + $0xe30] sm:$0xff]  ;;  %1114 = vmatpush.msrb.mxu2 %v502_v33  ;;  %1139 = vmatpush.msra.mxu0 %v179_v35  ;;  %v319_v31 = vld [vmem:[%s6605_s2 + $0x658] sm:$0xff] }
 0x13c   :  { %1133 = vmatpush.msrb.mxu3 %v570_v34  ;;  %v566_v38 = vld [vmem:[%s6605_s2 + $0xe10] sm:$0xff]  ;;  %1115 = vmatmul.f32.vlgmr.msrb.gmra.mxu2 %v4463_v21  ;;  %v371_v21 = vld [vmem:[%s6605_s2 + $0x7f8] sm:$0xff] }
 0x13d   :  { %1159 = vmatpush.msra.mxu1 %v243_v36  ;;  %1179 = vmatpush.msra.mxu2 %v307_v37  ;;  %v119_v33 = vld [vmem:[%s6605_s2 + $0x18] sm:$0xff] }
 0x13e   :  { %1134 = vmatpush.msrb.mxu3 %v566_v38  ;;  %1140 = vmatpush.msra.mxu0 %v175_v39  ;;  %v183_v34 = vld [vmem:[%s6605_s2 + $0x218] sm:$0xff] }
 0x13f   :  { %1135 = vmatmul.f32.vlgmr.msrb.gmra.mxu3 %v4480_v27  ;;  %1160 = vmatpush.msra.mxu1 %v239_v40  ;;  %v167_v27 = vld [vmem:[%s6605_s2 + $0x198] sm:$0xff] }
 0x140   :  { %1180 = vmatpush.msra.mxu2 %v303_v41  ;;  %1199 = vmatpush.msra.mxu3 %v371_v21  ;;  %v247_v35 = vld [vmem:[%s6605_s2 + $0x418] sm:$0xff] }
 0x141   :  { %1095 = vmatmul.f32.vlgmr.msrb.gmra.mxu1 %v4495_v32  ;;  %1141 = vmatpush.msra.mxu0 %v171_v42  ;;  %v163_v32 = vld [vmem:[%s6605_s2 + $0x178] sm:$0xff] }
 0x142   :  { %1161 = vmatpush.msra.mxu1 %v235_v43  ;;  %1181 = vmatpush.msra.mxu2 %v299_v26  ;;  %v315_v36 = vld [vmem:[%s6605_s2 + $0x638] sm:$0xff] }
 0x143   :  { %1200 = vmatpush.msra.mxu3 %v367_v44  ;;  %1142 = vmatpush.msra.mxu0 %v167_v27  ;;  %v435_v37 = vld [vmem:[%s6605_s2 + $0x9f8] sm:$0xff] }
 0x144   :  { %1162 = vmatpush.msra.mxu1 %v231_v45  ;;  %1182 = vmatpush.msra.mxu2 %v295_v46  ;;  %v499_v38 = vld [vmem:[%s6605_s2 + $0xbf8] sm:$0xff] }
 0x145   :  { %1201 = vmatpush.msra.mxu3 %v363_v47  ;;  %1143 = vmatpush.msra.mxu0 %v163_v32  ;;  %v563_v39 = vld [vmem:[%s6605_s2 + $0xdf8] sm:$0xff] }
 0x146   :  { %1163 = vmatpush.msra.mxu1 %v227_v48  ;;  %1183 = vmatpush.msra.mxu2 %v291_v49  ;;  %v311_v40 = vld [vmem:[%s6605_s2 + $0x618] sm:$0xff] }
 0x147   :  { %1202 = vmatpush.msra.mxu3 %v359_v50  ;;  %1144 = vmatpush.msra.mxu0 %v159_v51  ;;  %v431_v41 = vld [vmem:[%s6605_s2 + $0x9d8] sm:$0xff] }
 0x148   :  { %1164 = vmatpush.msra.mxu1 %v223_v52  ;;  %1184 = vmatpush.msra.mxu2 %v287_v53  ;;  %v495_v21 = vld [vmem:[%s6605_s2 + $0xbd8] sm:$0xff] }
 0x149   :  { %1203 = vmatpush.msra.mxu3 %v355_v54  ;;  %1145 = vmatpush.msra.mxu0 %v155_v55  ;;  %v559_v42 = vld [vmem:[%s6605_s2 + $0xdd8] sm:$0xff] }
 0x14a   :  { %1165 = vmatpush.msra.mxu1 %v219_v56  ;;  %1185 = vmatpush.msra.mxu2 %v283_v57  ;;  %v627_v43 = vld [vmem:[%s6605_s2 + $0xff8] sm:$0xff] }
 0x14b   :  { %1204 = vmatpush.msra.mxu3 %v351_v58  ;;  %1146 = vmatpush.msra.mxu0 %v151_v59  ;;  %v427_v26 = vld [vmem:[%s6605_s2 + $0x9b8] sm:$0xff] }
 0x14c   :  { %1166 = vmatpush.msra.mxu1 %v215_v60  ;;  %1186 = vmatpush.msra.mxu2 %v279_v61  ;;  %v491_v44 = vld [vmem:[%s6605_s2 + $0xbb8] sm:$0xff]  ;;  %v5491_v61 = vpop.f32.mrf.mxu0 }
 0x14d   :  { %1205 = vmatpush.msra.mxu3 %v347_v62  ;;  %1147 = vmatpush.msra.mxu0 %v147_v63  ;;  %v555_v27 = vld [vmem:[%s6605_s2 + $0xdb8] sm:$0xff] }
 0x14e   :  { %1167 = vmatpush.msra.mxu1 %v211_v0  ;;  %1187 = vmatpush.msra.mxu2 %v275_v4  ;;  %v623_v45 = vld [vmem:[%s6605_s2 + $0xfd8] sm:$0xff] }
 0x14f   :  { %1206 = vmatpush.msra.mxu3 %v343_v5  ;;  %1148 = vmatpush.msra.mxu0 %v143_v6  ;;  %v423_v46 = vld [vmem:[%s6605_s2 + $0x998] sm:$0xff] }
 0x150   :  { %1168 = vmatpush.msra.mxu1 %v207_v7  ;;  %1188 = vmatpush.msra.mxu2 %v271_v8  ;;  %v487_v47 = vld [vmem:[%s6605_s2 + $0xb98] sm:$0xff] }
 0x151   :  { %1207 = vmatpush.msra.mxu3 %v339_v10  ;;  %1149 = vmatpush.msra.mxu0 %v139_v11  ;;  %v551_v32 = vld [vmem:[%s6605_s2 + $0xd98] sm:$0xff]  ;;  %v5517_v10 = vpop.f32.mrf.mxu1 }
 0x152   :  { %1169 = vmatpush.msra.mxu1 %v203_v12  ;;  %1189 = vmatpush.msra.mxu2 %v267_v13  ;;  %v619_v48 = vld [vmem:[%s6605_s2 + $0xfb8] sm:$0xff] }
 0x153   :  { %1208 = vmatpush.msra.mxu3 %v335_v14  ;;  %1150 = vmatpush.msra.mxu0 %v135_v15  ;;  %v419_v49 = vld [vmem:[%s6605_s2 + $0x978] sm:$0xff] }
 0x154   :  { %1170 = vmatpush.msra.mxu1 %v199_v16  ;;  %1190 = vmatpush.msra.mxu2 %v263_v17  ;;  %v483_v50 = vld [vmem:[%s6605_s2 + $0xb78] sm:$0xff] }
 0x155   :  { %1209 = vmatpush.msra.mxu3 %v331_v18  ;;  %1151 = vmatpush.msra.mxu0 %v131_v19  ;;  %v547_v51 = vld [vmem:[%s6605_s2 + $0xd78] sm:$0xff]  ;;  %v5543_v19 = vpop.f32.mrf.mxu2 }
 0x156   :  { %1171 = vmatpush.msra.mxu1 %v195_v20  ;;  %1191 = vmatpush.msra.mxu2 %v259_v22  ;;  %v615_v52 = vld [vmem:[%s6605_s2 + $0xf98] sm:$0xff] }
 0x157   :  { %1210 = vmatpush.msra.mxu3 %v327_v23  ;;  %1152 = vmatpush.msra.mxu0 %v127_v24  ;;  %v415_v53 = vld [vmem:[%s6605_s2 + $0x958] sm:$0xff] }
 0x158   :  { %1172 = vmatpush.msra.mxu1 %v191_v3  ;;  %1192 = vmatpush.msra.mxu2 %v255_v28  ;;  %v479_v54 = vld [vmem:[%s6605_s2 + $0xb58] sm:$0xff]  ;;  %v5557_v3 = vpop.f32.mrf.mxu0 }
 0x159   :  { %1211 = vmatpush.msra.mxu3 %v323_v29  ;;  %1153 = vmatpush.msra.mxu0 %v123_v1  ;;  %v543_v55 = vld [vmem:[%s6605_s2 + $0xd58] sm:$0xff] }
 0x15a   :  { %1173 = vmatpush.msra.mxu1 %v187_v2  ;;  %1193 = vmatpush.msra.mxu2 %v251_v30  ;;  %v611_v56 = vld [vmem:[%s6605_s2 + $0xf78] sm:$0xff]  ;;  %v5568_v2 = vpop.f32.mrf.mxu3 }
 0x15b   :  { %1212 = vmatpush.msra.mxu3 %v319_v31  ;;  %1154 = vmatpush.msra.mxu0 %v119_v33  ;;  %v411_v57 = vld [vmem:[%s6605_s2 + $0x938] sm:$0xff]  ;;  %v3690_v31 = vld.sshfl [vmem:[#allocation1 + $0x10] sm:$0xff pattern:$0x73625140] }
 0x15c   :  { %1174 = vmatpush.msra.mxu1 %v183_v34  ;;  %1194 = vmatpush.msra.mxu2 %v247_v35  ;;  %v475_v58 = vld [vmem:[%s6605_s2 + $0xb38] sm:$0xff]  ;;  %v5578_v35 = vpop.f32.mrf.mxu1 }
 0x15d   :  { %1213 = vmatpush.msra.mxu3 %v315_v36  ;;  %1219 = vmatpush.msrb.mxu0 %v435_v37  ;;  %v539_v59 = vld [vmem:[%s6605_s2 + $0xd38] sm:$0xff] }
 0x15e   :  { %1239 = vmatpush.msrb.mxu1 %v499_v38  ;;  %1259 = vmatpush.msrb.mxu2 %v563_v39  ;;  %v607_v60 = vld [vmem:[%s6605_s2 + $0xf58] sm:$0xff] }
 0x15f   :  { %1214 = vmatpush.msra.mxu3 %v311_v40  ;;  %1220 = vmatpush.msrb.mxu0 %v431_v41  ;;  %v407_v62 = vld [vmem:[%s6605_s2 + $0x918] sm:$0xff] }
 0x160   :  { %1240 = vmatpush.msrb.mxu1 %v495_v21  ;;  %1260 = vmatpush.msrb.mxu2 %v559_v42  ;;  %v471_v63 = vld [vmem:[%s6605_s2 + $0xb18] sm:$0xff] }
 0x161   :  { %1279 = vmatpush.msrb.mxu3 %v627_v43  ;;  %1221 = vmatpush.msrb.mxu0 %v427_v26  ;;  %v535_v0 = vld [vmem:[%s6605_s2 + $0xd18] sm:$0xff]  ;;  %v5604_v26 = vpop.f32.mrf.mxu2 }
 0x162   :  { %1241 = vmatpush.msrb.mxu1 %v491_v44  ;;  %1261 = vmatpush.msrb.mxu2 %v555_v27  ;;  %v603_v4 = vld [vmem:[%s6605_s2 + $0xf38] sm:$0xff] }
 0x163   :  { %1280 = vmatpush.msrb.mxu3 %v623_v45  ;;  %1222 = vmatpush.msrb.mxu0 %v423_v46  ;;  %v403_v5 = vld [vmem:[%s6605_s2 + $0x8f8] sm:$0xff]  ;;  %v836_v45 = vpop.f32.mrf.mxu0 }
 0x164   :  { %1242 = vmatpush.msrb.mxu1 %v487_v47  ;;  %1262 = vmatpush.msrb.mxu2 %v551_v32  ;;  %v467_v6 = vld [vmem:[%s6605_s2 + $0xaf8] sm:$0xff] }
 0x165   :  { %1281 = vmatpush.msrb.mxu3 %v619_v48  ;;  %1223 = vmatpush.msrb.mxu0 %v419_v49  ;;  %v531_v7 = vld [vmem:[%s6605_s2 + $0xcf8] sm:$0xff]  ;;  %v1427_v48 = vld [vmem:[%s6607_s4 + $0x3e0] sm:$0xff] }
 0x166   :  { %1243 = vmatpush.msrb.mxu1 %v483_v50  ;;  %1263 = vmatpush.msrb.mxu2 %v547_v51  ;;  %v599_v8 = vld [vmem:[%s6605_s2 + $0xf18] sm:$0xff]  ;;  %v5629_v51 = vpop.f32.mrf.mxu3 }
 0x167   :  { %1282 = vmatpush.msrb.mxu3 %v615_v52  ;;  %1224 = vmatpush.msrb.mxu0 %v415_v53  ;;  %v399_v11 = vld [vmem:[%s6605_s2 + $0x8d8] sm:$0xff]  ;;  %v856_v52 = vpop.f32.mrf.mxu1  ;;  %v3692_v53 = vld.sshfl [vmem:[#allocation1 + $0x30] sm:$0xff pattern:$0x73625140] }
 0x168   :  { %1244 = vmatpush.msrb.mxu1 %v479_v54  ;;  %1264 = vmatpush.msrb.mxu2 %v543_v55  ;;  %v463_v12 = vld [vmem:[%s6605_s2 + $0xad8] sm:$0xff]  ;;  %v1359_v54 = vld [vmem:[%s6607_s4 + $0x1c0] sm:$0xff] }
 0x169   :  { %1283 = vmatpush.msrb.mxu3 %v611_v56  ;;  %1225 = vmatpush.msrb.mxu0 %v411_v57  ;;  %v527_v13 = vld [vmem:[%s6605_s2 + $0xcd8] sm:$0xff]  ;;  %v1423_v55 = vld [vmem:[%s6607_s4 + $0x3c0] sm:$0xff] }
 0x16a   :  { %1245 = vmatpush.msrb.mxu1 %v475_v58  ;;  %1265 = vmatpush.msrb.mxu2 %v539_v59  ;;  %v595_v14 = vld [vmem:[%s6605_s2 + $0xef8] sm:$0xff]  ;;  %v1491_v56 = vld [vmem:[%s6607_s4 + $0x5e0] sm:$0xff] }
 0x16b   :  { %1284 = vmatpush.msrb.mxu3 %v607_v60  ;;  %1226 = vmatpush.msrb.mxu0 %v407_v62  ;;  %v395_v15 = vld [vmem:[%s6605_s2 + $0x8b8] sm:$0xff]  ;;  %v3693_v58 = vld.sshfl [vmem:[#allocation1 + $0x20] sm:$0xff pattern:$0x73625140] }
 0x16c   :  { %1246 = vmatpush.msrb.mxu1 %v471_v63  ;;  %1266 = vmatpush.msrb.mxu2 %v535_v0  ;;  %v459_v16 = vld [vmem:[%s6605_s2 + $0xab8] sm:$0xff]  ;;  %v1355_v60 = vld [vmem:[%s6607_s4 + $0x1a0] sm:$0xff]  ;;  %v876_v63 = vpop.f32.mrf.mxu2 }
 0x16d   :  { %1285 = vmatpush.msrb.mxu3 %v603_v4  ;;  %1227 = vmatpush.msrb.mxu0 %v403_v5  ;;  %v523_v17 = vld [vmem:[%s6605_s2 + $0xcb8] sm:$0xff]  ;;  %v1487_v0 = vld [vmem:[%s6607_s4 + $0x5c0] sm:$0xff]  ;;  %v3695_v4 = vld.sshfl [vmem:[#allocation1 + $0x28] sm:$0xff pattern:$0x73625140] }
 0x16e   :  { %1247 = vmatpush.msrb.mxu1 %v467_v6  ;;  %1267 = vmatpush.msrb.mxu2 %v531_v7  ;;  %v591_v18 = vld [vmem:[%s6605_s2 + $0xed8] sm:$0xff]  ;;  %v1351_v5 = vld [vmem:[%s6607_s4 + $0x180] sm:$0xff] }
 0x16f   :  { %1286 = vmatpush.msrb.mxu3 %v599_v8  ;;  %1228 = vmatpush.msrb.mxu0 %v399_v11  ;;  %v391_v20 = vld [vmem:[%s6605_s2 + $0x898] sm:$0xff]  ;;  %v1415_v6 = vld [vmem:[%s6607_s4 + $0x380] sm:$0xff] }
 0x170   :  { %1248 = vmatpush.msrb.mxu1 %v463_v12  ;;  %1268 = vmatpush.msrb.mxu2 %v527_v13  ;;  %v455_v22 = vld [vmem:[%s6605_s2 + $0xa98] sm:$0xff]  ;;  %v1483_v7 = vld [vmem:[%s6607_s4 + $0x5a0] sm:$0xff]  ;;  %v896_v13 = vpop.f32.mrf.mxu3 }
 0x171   :  { %1287 = vmatpush.msrb.mxu3 %v595_v14  ;;  %1229 = vmatpush.msrb.mxu0 %v395_v15  ;;  %v519_v23 = vld [vmem:[%s6605_s2 + $0xc98] sm:$0xff]  ;;  %v1347_v11 = vld [vmem:[%s6607_s4 + $0x160] sm:$0xff] }
 0x172   :  { %1249 = vmatpush.msrb.mxu1 %v459_v16  ;;  %v587_v24 = vld [vmem:[%s6605_s2 + $0xeb8] sm:$0xff]  ;;  %1269 = vmatpush.msrb.mxu2 %v523_v17  ;;  %v1411_v12 = vld [vmem:[%s6607_s4 + $0x360] sm:$0xff] }
 0x173   :  { %1288 = vmatpush.msrb.mxu3 %v591_v18  ;;  %v387_v28 = vld [vmem:[%s6605_s2 + $0x878] sm:$0xff]  ;;  %1230 = vmatpush.msrb.mxu0 %v391_v20  ;;  %v1479_v14 = vld [vmem:[%s6607_s4 + $0x580] sm:$0xff] }
 0x174   :  { %1250 = vmatpush.msrb.mxu1 %v455_v22  ;;  %v451_v29 = vld [vmem:[%s6605_s2 + $0xa78] sm:$0xff]  ;;  %1270 = vmatpush.msrb.mxu2 %v519_v23  ;;  %v1343_v15 = vld [vmem:[%s6607_s4 + $0x140] sm:$0xff]  ;;  %v916_v23 = vpop.f32.mrf.mxu0 }
 0x175   :  { %v515_v1 = vld [vmem:[%s6605_s2 + $0xc78] sm:$0xff]  ;;  %1289 = vmatpush.msrb.mxu3 %v587_v24  ;;  %1195 = vmatmul.f32.vlgmr.msra.gmra.mxu2 %v3690_v31  ;;  %v1407_v16 = vld [vmem:[%s6607_s4 + $0x340] sm:$0xff] }
 0x176   :  { %v583_v30 = vld [vmem:[%s6605_s2 + $0xe98] sm:$0xff]  ;;  %1231 = vmatpush.msrb.mxu0 %v387_v28  ;;  %1251 = vmatpush.msrb.mxu1 %v451_v29  ;;  %v1475_v17 = vld [vmem:[%s6607_s4 + $0x560] sm:$0xff] }
 0x177   :  { %v383_v33 = vld [vmem:[%s6605_s2 + $0x858] sm:$0xff]  ;;  %1271 = vmatpush.msrb.mxu2 %v515_v1  ;;  %1290 = vmatpush.msrb.mxu3 %v583_v30  ;;  %v1339_v20 = vld [vmem:[%s6607_s4 + $0x120] sm:$0xff] }
 0x178   :  { %v5576_v34 = vld [vmem:[#allocation5] sm:$0xf]  ;;  %1155 = vmatmul.f32.vlgmr.msra.gmra.mxu0 %v5177_v25  ;;  %1175 = vmatmul.f32.vlgmr.msra.gmra.mxu1 %v5196_v9  ;;  %v1363_v9 = vld [vmem:[%s6607_s4 + $0x1e0] sm:$0xff] }
 0x179   :  { %v447_v36 = vld [vmem:[%s6605_s2 + $0xa58] sm:$0xff]  ;;  %1232 = vmatpush.msrb.mxu0 %v383_v33  ;;  %v630_v21 = vperm.slane %v5576_v34, 0  ;;  %v631_v43 = vperm.slane %v5576_v34, 1  ;;  %v1403_v22 = vld [vmem:[%s6607_s4 + $0x320] sm:$0xff] }
 0x17a   :  { %v511_v37 = vld [vmem:[%s6605_s2 + $0xc58] sm:$0xff]  ;;  %1252 = vmatpush.msrb.mxu1 %v447_v36  ;;  %v1471_v24 = vld [vmem:[%s6607_s4 + $0x540] sm:$0xff]  ;;  %v936_v36 = vpop.f32.mrf.mxu1 }
 0x17b   :  { %v579_v38 = vld [vmem:[%s6605_s2 + $0xe78] sm:$0xff]  ;;  %1272 = vmatpush.msrb.mxu2 %v511_v37  ;;  %v677_v32 = vadd.f32 %v5491_v61, %v630_v21  ;;  %v837_v50 = vadd.f32 %v836_v45, %v631_v43  ;;  %v1419_v61 = vld [vmem:[%s6607_s4 + $0x3a0] sm:$0xff] }
 0x17c   :  { %v3691_v39 = vld.sshfl [vmem:[#allocation1 + $0x18] sm:$0xff pattern:$0x73625140]  ;;  %1291 = vmatpush.msrb.mxu3 %v579_v38  ;;  %v1335_v28 = vld [vmem:[%s6607_s4 + $0x100] sm:$0xff] }
 0x17d   :  { %1215 = vmatmul.f32.vlgmr.msra.gmra.mxu3 %v3691_v39  ;;  %v379_v40 = vld [vmem:[%s6605_s2 + $0x838] sm:$0xff]  ;;  %v697_v57 = vadd.f32 %v5517_v10, %v677_v32  ;;  %v857_v62 = vadd.f32 %v856_v52, %v837_v50  ;;  %v1399_v29 = vld [vmem:[%s6607_s4 + $0x300] sm:$0xff]  ;;  %v976_v32 = vpop.f32.mrf.mxu3 }
 0x17e   :  { %v443_v41 = vld [vmem:[%s6605_s2 + $0xa38] sm:$0xff]  ;;  %1233 = vmatpush.msrb.mxu0 %v379_v40  ;;  %v1467_v1 = vld [vmem:[%s6607_s4 + $0x520] sm:$0xff] }
 0x17f   :  { %v507_v25 = vld [vmem:[%s6605_s2 + $0xc38] sm:$0xff]  ;;  %1253 = vmatpush.msrb.mxu1 %v443_v41  ;;  %v717_v8 = vadd.f32 %v5543_v19, %v697_v57  ;;  %v877_v10 = vadd.f32 %v876_v63, %v857_v62  ;;  %v1331_v31 = vld [vmem:[%s6607_s4 + $0xe0] sm:$0xff]  ;;  %v1360_v63 = vld [vmem:[%s6607_s4 + $0x1c8] sm:$0xff] }
 0x180   :  { %v575_v42 = vld [vmem:[%s6605_s2 + $0xe58] sm:$0xff]  ;;  %1273 = vmatpush.msrb.mxu2 %v507_v25  ;;  %v1395_v33 = vld [vmem:[%s6607_s4 + $0x2e0] sm:$0xff] }
 0x181   :  { %v375_v44 = vld [vmem:[%s6605_s2 + $0x818] sm:$0xff]  ;;  %1292 = vmatpush.msrb.mxu3 %v575_v42  ;;  %v737_v18 = vadd.f32 %v5568_v2, %v717_v8  ;;  %v897_v19 = vadd.f32 %v896_v13, %v877_v10  ;;  %v1463_v37 = vld [vmem:[%s6607_s4 + $0x500] sm:$0xff]  ;;  %v956_v42 = vpop.f32.mrf.mxu2  ;;  %v1352_v8 = vld [vmem:[%s6607_s4 + $0x188] sm:$0xff] }
 0x182   :  { %v439_v27 = vld [vmem:[%s6605_s2 + $0xa18] sm:$0xff]  ;;  %1234 = vmatpush.msrb.mxu0 %v375_v44  ;;  %v1391_v38 = vld [vmem:[%s6607_s4 + $0x2c0] sm:$0xff]  ;;  %v1416_v10 = vld [vmem:[%s6607_s4 + $0x388] sm:$0xff] }
 0x183   :  { %v503_v46 = vld [vmem:[%s6605_s2 + $0xc18] sm:$0xff]  ;;  %1254 = vmatpush.msrb.mxu1 %v439_v27  ;;  %1235 = vmatmul.f32.vlgmr.msrb.gmra.mxu0 %v3693_v58  ;;  %v757_v2 = vadd.f32 %v5557_v3, %v737_v18  ;;  %v917_v30 = vadd.f32 %v916_v23, %v897_v19  ;;  %v1327_v3 = vld [vmem:[%s6607_s4 + $0xc0] sm:$0xff]  ;;  %v1412_v13 = vld [vmem:[%s6607_s4 + $0x368] sm:$0xff] }
 0x184   :  { %v571_v47 = vld [vmem:[%s6605_s2 + $0xe38] sm:$0xff]  ;;  %1274 = vmatpush.msrb.mxu2 %v503_v46  ;;  %1569 = vmatpush.msra.mxu0 %v1363_v9  ;;  %v1459_v39 = vld [vmem:[%s6607_s4 + $0x4e0] sm:$0xff]  ;;  %v1340_v18 = vld [vmem:[%s6607_s4 + $0x128] sm:$0xff] }
 0x185   :  { %v567_v49 = vld [vmem:[%s6605_s2 + $0xe18] sm:$0xff]  ;;  %1293 = vmatpush.msrb.mxu3 %v571_v47  ;;  %1275 = vmatmul.f32.vlgmr.msrb.gmra.mxu2 %v3692_v53  ;;  %v777_v40 = vadd.f32 %v5578_v35, %v757_v2  ;;  %v937_v41 = vadd.f32 %v936_v36, %v917_v30  ;;  %v1323_v21 = vld [vmem:[%s6607_s4 + $0xa0] sm:$0xff]  ;;  %v1404_v19 = vld [vmem:[%s6607_s4 + $0x328] sm:$0xff]  ;;  %v632_v2 = vperm.slane %v5576_v34, 2 }
 0x186   :  { %1589 = vmatpush.msra.mxu1 %v1427_v48  ;;  %v3694_v59 = vld.sshfl [vmem:[#allocation1 + $0x38] sm:$0xff pattern:$0x73625140]  ;;  %1570 = vmatpush.msra.mxu0 %v1359_v54  ;;  %v1387_v25 = vld [vmem:[%s6607_s4 + $0x2a0] sm:$0xff]  ;;  %v1400_v23 = vld [vmem:[%s6607_s4 + $0x308] sm:$0xff] }
 0x187   :  { %1294 = vmatpush.msrb.mxu3 %v567_v49  ;;  %1255 = vmatmul.f32.vlgmr.msrb.gmra.mxu1 %v3695_v4  ;;  %v1455_v43 = vld [vmem:[%s6607_s4 + $0x4c0] sm:$0xff]  ;;  %v797_v45 = vadd.f32 %v5604_v26, %v777_v40  ;;  %v957_v46 = vadd.f32 %v956_v42, %v937_v41  ;;  %v1468_v30 = vld [vmem:[%s6607_s4 + $0x528] sm:$0xff] }
 0x188   :  { %1295 = vmatmul.f32.vlgmr.msrb.gmra.mxu3 %v3694_v59  ;;  %1590 = vmatpush.msra.mxu1 %v1423_v55  ;;  %v1319_v35 = vld [vmem:[%s6607_s4 + $0x80] sm:$0xff]  ;;  %v1392_v36 = vld [vmem:[%s6607_s4 + $0x2c8] sm:$0xff] }
 0x189   :  { %1609 = vmatpush.msra.mxu2 %v1491_v56  ;;  %1571 = vmatpush.msra.mxu0 %v1355_v60  ;;  %v1383_v44 = vld [vmem:[%s6607_s4 + $0x280] sm:$0xff]  ;;  %v817_v52 = vadd.f32 %v5629_v51, %v797_v45  ;;  %v977_v53 = vadd.f32 %v976_v32, %v957_v46  ;;  %v1364_v60 = vld [vmem:[%s6607_s4 + $0x1e8] sm:$0xff] }
 0x18a   :  { %1591 = vmatpush.msra.mxu1 %v1419_v61  ;;  %v1451_v27 = vld [vmem:[%s6607_s4 + $0x4a0] sm:$0xff]  ;;  %v1428_v61 = vld [vmem:[%s6607_s4 + $0x3e8] sm:$0xff] }
 0x18b   :  { %1610 = vmatpush.msra.mxu2 %v1487_v0  ;;  %1572 = vmatpush.msra.mxu0 %v1351_v5  ;;  %v1315_v47 = vld [vmem:[%s6607_s4 + $0x60] sm:$0xff]  ;;  %v5770_v58 = vmax.f32 %v817_v52, 0.0  ;;  %v5772_v59 = vmax.f32 %v977_v53, 0.0  ;;  %v1424_v0 = vld [vmem:[%s6607_s4 + $0x3c8] sm:$0xff] }
 0x18c   :  { %1592 = vmatpush.msra.mxu1 %v1415_v6  ;;  %v1379_v9 = vld [vmem:[%s6607_s4 + $0x260] sm:$0xff]  ;;  %v1356_v5 = vld [vmem:[%s6607_s4 + $0x1a8] sm:$0xff]  ;;  %v1056_v52 = vpop.f32.mrf.mxu3 }
 0x18d   :  { %1611 = vmatpush.msra.mxu2 %v1483_v7  ;;  %1573 = vmatpush.msra.mxu0 %v1347_v11  ;;  %v1447_v48 = vld [vmem:[%s6607_s4 + $0x480] sm:$0xff]  ;;  %v1420_v6 = vld [vmem:[%s6607_s4 + $0x3a8] sm:$0xff] }
 0x18e   :  { %1593 = vmatpush.msra.mxu1 %v1411_v12  ;;  %v1311_v26 = vld [vmem:[%s6607_s4 + $0x40] sm:$0xff]  ;;  %v1492_v7 = vld [vmem:[%s6607_s4 + $0x5e8] sm:$0xff] }
 0x18f   :  { %1612 = vmatpush.msra.mxu2 %v1479_v14  ;;  %1574 = vmatpush.msra.mxu0 %v1343_v15  ;;  %v1375_v49 = vld [vmem:[%s6607_s4 + $0x240] sm:$0xff]  ;;  %v1488_v11 = vld [vmem:[%s6607_s4 + $0x5c8] sm:$0xff] }
 0x190   :  { %1594 = vmatpush.msra.mxu1 %v1407_v16  ;;  %v1443_v50 = vld [vmem:[%s6607_s4 + $0x460] sm:$0xff]  ;;  %v1348_v12 = vld [vmem:[%s6607_s4 + $0x168] sm:$0xff] }
 0x191   :  { %1613 = vmatpush.msra.mxu2 %v1475_v17  ;;  %1575 = vmatpush.msra.mxu0 %v1339_v20  ;;  %v1307_v54 = vld [vmem:[%s6607_s4 + $0x20] sm:$0xff]  ;;  %v1484_v14 = vld [vmem:[%s6607_s4 + $0x5a8] sm:$0xff] }
 0x192   :  { %1595 = vmatpush.msra.mxu1 %v1403_v22  ;;  %v1371_v55 = vld [vmem:[%s6607_s4 + $0x220] sm:$0xff]  ;;  %v1344_v15 = vld [vmem:[%s6607_s4 + $0x148] sm:$0xff] }
 0x193   :  { %1614 = vmatpush.msra.mxu2 %v1471_v24  ;;  %1576 = vmatpush.msra.mxu0 %v1335_v28  ;;  %v1439_v56 = vld [vmem:[%s6607_s4 + $0x440] sm:$0xff]  ;;  %v1408_v16 = vld [vmem:[%s6607_s4 + $0x348] sm:$0xff] }
 0x194   :  { %1596 = vmatpush.msra.mxu1 %v1399_v29  ;;  %v1303_v51 = vld [vmem:[%s6607_s4] sm:$0xff]  ;;  %v1480_v17 = vld [vmem:[%s6607_s4 + $0x588] sm:$0xff] }
 0x195   :  { %1615 = vmatpush.msra.mxu2 %v1467_v1  ;;  %1577 = vmatpush.msra.mxu0 %v1331_v31  ;;  %v1367_v57 = vld [vmem:[%s6607_s4 + $0x200] sm:$0xff]  ;;  %v1476_v20 = vld [vmem:[%s6607_s4 + $0x568] sm:$0xff] }
 0x196   :  { %1597 = vmatpush.msra.mxu1 %v1395_v33  ;;  %v1435_v62 = vld [vmem:[%s6607_s4 + $0x420] sm:$0xff]  ;;  %v1336_v22 = vld [vmem:[%s6607_s4 + $0x108] sm:$0xff] }
 0x197   :  { %1616 = vmatpush.msra.mxu2 %v1463_v37  ;;  %1578 = vmatpush.msra.mxu0 %v1327_v3  ;;  %v1431_v4 = vld [vmem:[%s6607_s4 + $0x400] sm:$0xff]  ;;  %v1472_v24 = vld [vmem:[%s6607_s4 + $0x548] sm:$0xff]  ;;  %v996_v37 = vpop.f32.mrf.mxu0 }
 0x198   :  { %1598 = vmatpush.msra.mxu1 %v1391_v38  ;;  %v1555_v28 = vld [vmem:[%s6607_s4 + $0x7e0] sm:$0xff]  ;;  %v1332_v29 = vld [vmem:[%s6607_s4 + $0xe8] sm:$0xff]  ;;  %v997_v41 = vadd.f32 %v996_v37, %v632_v2  ;;  %v1349_v2 = vld [vmem:[%s6607_s4 + $0x170] sm:$0xff] }
 0x199   :  { %1617 = vmatpush.msra.mxu2 %v1459_v39  ;;  %1579 = vmatpush.msra.mxu0 %v1323_v21  ;;  %v1396_v1 = vld [vmem:[%s6607_s4 + $0x2e8] sm:$0xff]  ;;  %v1551_v31 = vld [vmem:[%s6607_s4 + $0x7c0] sm:$0xff]  ;;  %v1409_v37 = vld [vmem:[%s6607_s4 + $0x350] sm:$0xff] }
 0x19a   :  { %1599 = vmatpush.msra.mxu1 %v1387_v25  ;;  %1629 = vmatpush.msra.mxu3 %v1555_v28  ;;  %v1328_v33 = vld [vmem:[%s6607_s4 + $0xc8] sm:$0xff]  ;;  %v1547_v38 = vld [vmem:[%s6607_s4 + $0x7a0] sm:$0xff]  ;;  %v1417_v28 = vld [vmem:[%s6607_s4 + $0x390] sm:$0xff] }
 0x19b   :  { %1618 = vmatpush.msra.mxu2 %v1455_v43  ;;  %1580 = vmatpush.msra.mxu0 %v1319_v35  ;;  %v1464_v3 = vld [vmem:[%s6607_s4 + $0x508] sm:$0xff]  ;;  %v1543_v25 = vld [vmem:[%s6607_s4 + $0x780] sm:$0xff]  ;;  %v1016_v35 = vpop.f32.mrf.mxu1 }
 0x19c   :  { %1600 = vmatpush.msra.mxu1 %v1383_v44  ;;  %1630 = vmatpush.msra.mxu3 %v1551_v31  ;;  %v1324_v39 = vld [vmem:[%s6607_s4 + $0xa8] sm:$0xff]  ;;  %v1017_v44 = vadd.f32 %v1016_v35, %v997_v41  ;;  %v1539_v46 = vld [vmem:[%s6607_s4 + $0x760] sm:$0xff]  ;;  %v1493_v31 = vld [vmem:[%s6607_s4 + $0x5f0] sm:$0xff] }
 0x19d   :  { %1619 = vmatpush.msra.mxu2 %v1451_v27  ;;  %1581 = vmatpush.msra.mxu0 %v1315_v47  ;;  %v1388_v40 = vld [vmem:[%s6607_s4 + $0x2a8] sm:$0xff]  ;;  %v1036_v27 = vpop.f32.mrf.mxu2  ;;  %v1485_v41 = vld [vmem:[%s6607_s4 + $0x5b0] sm:$0xff]  ;;  %v1495_v35 = vld [vmem:[%s6607_s4 + $0x600] sm:$0xff] }
 0x19e   :  { %1601 = vmatpush.msra.mxu1 %v1379_v9  ;;  %1631 = vmatpush.msra.mxu3 %v1547_v38  ;;  %v1460_v21 = vld [vmem:[%s6607_s4 + $0x4e8] sm:$0xff]  ;;  %v1037_v32 = vadd.f32 %v1036_v27, %v1017_v44  ;;  %v1503_v38 = vld [vmem:[%s6607_s4 + $0x640] sm:$0xff]  ;;  %v1333_v27 = vld [vmem:[%s6607_s4 + $0xf0] sm:$0xff] }
 0x19f   :  { %1620 = vmatpush.msra.mxu2 %v1447_v48  ;;  %1582 = vmatpush.msra.mxu0 %v1311_v26  ;;  %v1320_v42 = vld [vmem:[%s6607_s4 + $0x88] sm:$0xff]  ;;  %v1535_v26 = vld [vmem:[%s6607_s4 + $0x740] sm:$0xff] }
 0x1a0   :  { %1602 = vmatpush.msra.mxu1 %v1375_v49  ;;  %v1384_v43 = vld [vmem:[%s6607_s4 + $0x288] sm:$0xff]  ;;  %1632 = vmatpush.msra.mxu3 %v1543_v25  ;;  %v1057_v53 = vadd.f32 %v1056_v52, %v1037_v32  ;;  %v1337_v25 = vld [vmem:[%s6607_s4 + $0x110] sm:$0xff] }
 0x1a1   :  { %1621 = vmatpush.msra.mxu2 %v1443_v50  ;;  %1583 = vmatpush.msra.mxu0 %v1307_v54  ;;  %v1456_v45 = vld [vmem:[%s6607_s4 + $0x4c8] sm:$0xff]  ;;  %v1477_v32 = vld [vmem:[%s6607_s4 + $0x570] sm:$0xff] }
 0x1a2   :  { %1603 = vmatpush.msra.mxu1 %v1371_v55  ;;  %v1316_v47 = vld [vmem:[%s6607_s4 + $0x68] sm:$0xff]  ;;  %1633 = vmatpush.msra.mxu3 %v1539_v46  ;;  %v1531_v55 = vld [vmem:[%s6607_s4 + $0x720] sm:$0xff]  ;;  %v1329_v46 = vld [vmem:[%s6607_s4 + $0xd0] sm:$0xff] }
 0x1a3   :  { %1622 = vmatpush.msra.mxu2 %v1439_v56  ;;  %1584 = vmatpush.msra.mxu0 %v1303_v51  ;;  %v1380_v9 = vld [vmem:[%s6607_s4 + $0x268] sm:$0xff]  ;;  %v1321_v52 = vld [vmem:[%s6607_s4 + $0x90] sm:$0xff] }
 0x1a4   :  { %1604 = vmatpush.msra.mxu1 %v1367_v57  ;;  %1585 = vmatmul.f32.vlgmr.msra.gmra.mxu0 %v5770_v58  ;;  %v1452_v48 = vld [vmem:[%s6607_s4 + $0x4a8] sm:$0xff] }
 0x1a5   :  { %1605 = vmatmul.f32.vlgmr.msra.gmra.mxu1 %v5772_v59  ;;  %1649 = vmatpush.msrb.mxu0 %v1364_v60  ;;  %v1312_v49 = vld [vmem:[%s6607_s4 + $0x48] sm:$0xff] }
 0x1a6   :  { %1669 = vmatpush.msrb.mxu1 %v1428_v61  ;;  %1623 = vmatpush.msra.mxu2 %v1435_v62  ;;  %v1376_v50 = vld [vmem:[%s6607_s4 + $0x248] sm:$0xff]  ;;  %v1527_v61 = vld [vmem:[%s6607_s4 + $0x700] sm:$0xff] }
 0x1a7   :  { %1650 = vmatpush.msrb.mxu0 %v1360_v63  ;;  %1634 = vmatpush.msra.mxu3 %v1535_v26  ;;  %v1448_v54 = vld [vmem:[%s6607_s4 + $0x488] sm:$0xff]  ;;  %v1389_v26 = vld [vmem:[%s6607_s4 + $0x2b0] sm:$0xff] }
 0x1a8   :  { %1670 = vmatpush.msrb.mxu1 %v1424_v0  ;;  %1624 = vmatpush.msra.mxu2 %v1431_v4  ;;  %v1308_v56 = vld [vmem:[%s6607_s4 + $0x28] sm:$0xff]  ;;  %v1523_v4 = vld [vmem:[%s6607_s4 + $0x6e0] sm:$0xff] }
 0x1a9   :  { %1651 = vmatpush.msrb.mxu0 %v1356_v5  ;;  %v1372_v51 = vld [vmem:[%s6607_s4 + $0x228] sm:$0xff]  ;;  %1635 = vmatpush.msra.mxu3 %v1531_v55  ;;  %v1365_v5 = vld [vmem:[%s6607_s4 + $0x1f0] sm:$0xff] }
 0x1aa   :  { %1671 = vmatpush.msrb.mxu1 %v1420_v6  ;;  %1689 = vmatpush.msrb.mxu2 %v1492_v7  ;;  %v1444_v60 = vld [vmem:[%s6607_s4 + $0x468] sm:$0xff]  ;;  %v1429_v6 = vld [vmem:[%s6607_s4 + $0x3f0] sm:$0xff] }
 0x1ab   :  { %1652 = vmatpush.msrb.mxu0 %v1352_v8  ;;  %v1304_v62 = vld [vmem:[%s6607_s4 + $0x8] sm:$0xff]  ;;  %1636 = vmatpush.msra.mxu3 %v1527_v61  ;;  %v1469_v55 = vld [vmem:[%s6607_s4 + $0x530] sm:$0xff] }
 0x1ac   :  { %1672 = vmatpush.msrb.mxu1 %v1416_v10  ;;  %1690 = vmatpush.msrb.mxu2 %v1488_v11  ;;  %v1368_v63 = vld [vmem:[%s6607_s4 + $0x208] sm:$0xff]  ;;  %v1313_v61 = vld [vmem:[%s6607_s4 + $0x50] sm:$0xff] }
 0x1ad   :  { %1653 = vmatpush.msrb.mxu0 %v1348_v12  ;;  %1637 = vmatpush.msra.mxu3 %v1523_v4  ;;  %v1440_v11 = vld [vmem:[%s6607_s4 + $0x448] sm:$0xff]  ;;  %v1361_v12 = vld [vmem:[%s6607_s4 + $0x1d0] sm:$0xff] }
 0x1ae   :  { %1673 = vmatpush.msrb.mxu1 %v1412_v13  ;;  %1691 = vmatpush.msrb.mxu2 %v1484_v14  ;;  %v1425_v13 = vld [vmem:[%s6607_s4 + $0x3d0] sm:$0xff]  ;;  %v1556_v44 = vld [vmem:[%s6607_s4 + $0x7e8] sm:$0xff] }
 0x1af   :  { %1654 = vmatpush.msrb.mxu0 %v1344_v15  ;;  %v1436_v15 = vld [vmem:[%s6607_s4 + $0x428] sm:$0xff]  ;;  %v1309_v4 = vld [vmem:[%s6607_s4 + $0x30] sm:$0xff] }
 0x1b0   :  { %1674 = vmatpush.msrb.mxu1 %v1408_v16  ;;  %1692 = vmatpush.msrb.mxu2 %v1480_v17  ;;  %v1519_v16 = vld [vmem:[%s6607_s4 + $0x6c0] sm:$0xff]  ;;  %v1357_v17 = vld [vmem:[%s6607_s4 + $0x1b0] sm:$0xff] }
 0x1b1   :  { %1655 = vmatpush.msrb.mxu0 %v1340_v18  ;;  %v1421_v18 = vld [vmem:[%s6607_s4 + $0x3b0] sm:$0xff]  ;;  %1638 = vmatpush.msra.mxu3 %v1519_v16  ;;  %v1362_v16 = vld [vmem:[%s6607_s4 + $0x1d8] sm:$0xff] }
 0x1b2   :  { %1675 = vmatpush.msrb.mxu1 %v1404_v19  ;;  %1693 = vmatpush.msrb.mxu2 %v1476_v20 }
 0x1b3   :  { %1656 = vmatpush.msrb.mxu0 %v1336_v22  ;;  %v1432_v22 = vld [vmem:[%s6607_s4 + $0x408] sm:$0xff] }
 0x1b4   :  { %1676 = vmatpush.msrb.mxu1 %v1400_v23  ;;  %1694 = vmatpush.msrb.mxu2 %v1472_v24  ;;  %v1515_v23 = vld [vmem:[%s6607_s4 + $0x6a0] sm:$0xff]  ;;  %v1353_v24 = vld [vmem:[%s6607_s4 + $0x190] sm:$0xff] }
 0x1b5   :  { %1657 = vmatpush.msrb.mxu0 %v1332_v29  ;;  %1639 = vmatpush.msra.mxu3 %v1515_v23  ;;  %v1445_v23 = vld [vmem:[%s6607_s4 + $0x470] sm:$0xff] }
 0x1b6   :  { %1677 = vmatpush.msrb.mxu1 %v1396_v1  ;;  %1695 = vmatpush.msrb.mxu2 %v1468_v30  ;;  %v1511_v1 = vld [vmem:[%s6607_s4 + $0x680] sm:$0xff]  ;;  %v1413_v30 = vld [vmem:[%s6607_s4 + $0x370] sm:$0xff] }
 0x1b7   :  { %1658 = vmatpush.msrb.mxu0 %v1328_v33  ;;  %v1076_v57 = vpop.f32.mrf.mxu0  ;;  %1640 = vmatpush.msra.mxu3 %v1511_v1  ;;  %v1507_v33 = vld [vmem:[%s6607_s4 + $0x660] sm:$0xff]  ;;  %v1418_v1 = vld [vmem:[%s6607_s4 + $0x398] sm:$0xff] }
 0x1b8   :  { %1678 = vmatpush.msrb.mxu1 %v1392_v36  ;;  %1696 = vmatpush.msrb.mxu2 %v1464_v3  ;;  %v1077_v0 = vadd.f32 %v1076_v57, %v1057_v53  ;;  %v1345_v36 = vld [vmem:[%s6607_s4 + $0x150] sm:$0xff]  ;;  %v1540_v57 = vld [vmem:[%s6607_s4 + $0x768] sm:$0xff] }
 0x1b9   :  { %1659 = vmatpush.msrb.mxu0 %v1324_v39  ;;  %1641 = vmatpush.msra.mxu3 %v1507_v33  ;;  %v1489_v3 = vld [vmem:[%s6607_s4 + $0x5d0] sm:$0xff]  ;;  %v1414_v33 = vld [vmem:[%s6607_s4 + $0x378] sm:$0xff] }
 0x1ba   :  { %1679 = vmatpush.msrb.mxu1 %v1388_v40  ;;  %1697 = vmatpush.msrb.mxu2 %v1460_v21  ;;  %v1341_v39 = vld [vmem:[%s6607_s4 + $0x130] sm:$0xff]  ;;  %v1499_v21 = vld [vmem:[%s6607_s4 + $0x620] sm:$0xff] }
 0x1bb   :  { %1660 = vmatpush.msrb.mxu0 %v1320_v42  ;;  %v1405_v40 = vld [vmem:[%s6607_s4 + $0x330] sm:$0xff]  ;;  %1642 = vmatpush.msra.mxu3 %v1503_v38  ;;  %v1410_v38 = vld [vmem:[%s6607_s4 + $0x358] sm:$0xff] }
 0x1bc   :  { %1680 = vmatpush.msrb.mxu1 %v1384_v43  ;;  %1698 = vmatpush.msrb.mxu2 %v1456_v45  ;;  %v1401_v42 = vld [vmem:[%s6607_s4 + $0x310] sm:$0xff] }
 0x1bd   :  { %1661 = vmatpush.msrb.mxu0 %v1316_v47  ;;  %1643 = vmatpush.msra.mxu3 %v1499_v21  ;;  %v1481_v43 = vld [vmem:[%s6607_s4 + $0x590] sm:$0xff]  ;;  %v1406_v21 = vld [vmem:[%s6607_s4 + $0x338] sm:$0xff] }
 0x1be   :  { %1681 = vmatpush.msrb.mxu1 %v1380_v9  ;;  %1699 = vmatpush.msrb.mxu2 %v1452_v48  ;;  %v1096_v7 = vpop.f32.mrf.mxu1  ;;  %v1397_v45 = vld [vmem:[%s6607_s4 + $0x2f0] sm:$0xff]  ;;  %v1552_v9 = vld [vmem:[%s6607_s4 + $0x7c8] sm:$0xff] }
 0x1bf   :  { %1662 = vmatpush.msrb.mxu0 %v1312_v49  ;;  %v1097_v8 = vadd.f32 %v1096_v7, %v1077_v0  ;;  %v1116_v10 = vpop.f32.mrf.mxu2  ;;  %1644 = vmatpush.msra.mxu3 %v1495_v35  ;;  %v1393_v47 = vld [vmem:[%s6607_s4 + $0x2d0] sm:$0xff]  ;;  %v1548_v49 = vld [vmem:[%s6607_s4 + $0x7a8] sm:$0xff]  ;;  %v1494_v35 = vld [vmem:[%s6607_s4 + $0x5f8] sm:$0xff] }
 0x1c0   :  { %1682 = vmatpush.msrb.mxu1 %v1376_v50  ;;  %1700 = vmatpush.msrb.mxu2 %v1448_v54  ;;  %v1325_v48 = vld [vmem:[%s6607_s4 + $0xb0] sm:$0xff]  ;;  %v1544_v54 = vld [vmem:[%s6607_s4 + $0x788] sm:$0xff] }
 0x1c1   :  { %1663 = vmatpush.msrb.mxu0 %v1308_v56  ;;  %v1117_v14 = vadd.f32 %v1116_v10, %v1097_v8  ;;  %1709 = vmatpush.msrb.mxu3 %v1556_v44  ;;  %v1473_v50 = vld [vmem:[%s6607_s4 + $0x550] sm:$0xff]  ;;  %v1496_v44 = vld [vmem:[%s6607_s4 + $0x608] sm:$0xff] }
 0x1c2   :  { %1683 = vmatpush.msrb.mxu1 %v1372_v51  ;;  %1701 = vmatpush.msrb.mxu2 %v1444_v60  ;;  %v1136_v19 = vpop.f32.mrf.mxu3  ;;  %v1385_v53 = vld [vmem:[%s6607_s4 + $0x290] sm:$0xff] }
 0x1c3   :  { %1664 = vmatpush.msrb.mxu0 %v1304_v62  ;;  %v1137_v20 = vadd.f32 %v1136_v19, %v1117_v14  ;;  %1710 = vmatpush.msrb.mxu3 %v1552_v9  ;;  %v1317_v56 = vld [vmem:[%s6607_s4 + $0x70] sm:$0xff]  ;;  %v1520_v19 = vld [vmem:[%s6607_s4 + $0x6c8] sm:$0xff]  ;;  %v1394_v9 = vld [vmem:[%s6607_s4 + $0x2d8] sm:$0xff] }
 0x1c4   :  { %1684 = vmatpush.msrb.mxu1 %v1368_v63  ;;  %1665 = vmatmul.f32.vlgmr.msrb.gmra.mxu0 %v5770_v58  ;;  %v1381_v51 = vld [vmem:[%s6607_s4 + $0x270] sm:$0xff]  ;;  %v1536_v63 = vld [vmem:[%s6607_s4 + $0x748] sm:$0xff] }
 0x1c5   :  { %1685 = vmatmul.f32.vlgmr.msrb.gmra.mxu1 %v5772_v59  ;;  %1729 = vmatpush.msra.mxu0 %v1365_v5  ;;  %v5986_v29 = vmax.f32 %v1137_v20, 0.0  ;;  %v1465_v60 = vld [vmem:[%s6607_s4 + $0x510] sm:$0xff]  ;;  %v1358_v20 = vld [vmem:[%s6607_s4 + $0x1b8] sm:$0xff] }
 0x1c6   :  { %1749 = vmatpush.msra.mxu1 %v1429_v6  ;;  %1702 = vmatpush.msrb.mxu2 %v1440_v11  ;;  %v1377_v62 = vld [vmem:[%s6607_s4 + $0x250] sm:$0xff]  ;;  %v1532_v6 = vld [vmem:[%s6607_s4 + $0x728] sm:$0xff] }
 0x1c7   :  { %1730 = vmatpush.msra.mxu0 %v1361_v12  ;;  %1625 = vmatmul.f32.vlgmr.msra.gmra.mxu2 %v5986_v29  ;;  %v1461_v0 = vld [vmem:[%s6607_s4 + $0x4f0] sm:$0xff]  ;;  %v1528_v11 = vld [vmem:[%s6607_s4 + $0x708] sm:$0xff]  ;;  %v1366_v12 = vld [vmem:[%s6607_s4 + $0x1f8] sm:$0xff] }
 0x1c8   :  { %1750 = vmatpush.msra.mxu1 %v1425_v13  ;;  %1703 = vmatpush.msrb.mxu2 %v1436_v15  ;;  %v1373_v5 = vld [vmem:[%s6607_s4 + $0x230] sm:$0xff]  ;;  %v1430_v13 = vld [vmem:[%s6607_s4 + $0x3f8] sm:$0xff]  ;;  %v1524_v15 = vld [vmem:[%s6607_s4 + $0x6e8] sm:$0xff] }
 0x1c9   :  { %1731 = vmatpush.msra.mxu0 %v1357_v17  ;;  %1711 = vmatpush.msrb.mxu3 %v1548_v49  ;;  %v1457_v7 = vld [vmem:[%s6607_s4 + $0x4d0] sm:$0xff]  ;;  %v1426_v17 = vld [vmem:[%s6607_s4 + $0x3d8] sm:$0xff]  ;;  %v633_v49 = vperm.slane %v5576_v34, 3 }
 0x1ca   :  { %1751 = vmatpush.msra.mxu1 %v1421_v18  ;;  %1704 = vmatpush.msrb.mxu2 %v1432_v22  ;;  %v1305_v8 = vld [vmem:[%s6607_s4 + $0x10] sm:$0xff]  ;;  %v1422_v22 = vld [vmem:[%s6607_s4 + $0x3b8] sm:$0xff] }
 0x1cb   :  { %1732 = vmatpush.msra.mxu0 %v1353_v24  ;;  %1712 = vmatpush.msrb.mxu3 %v1544_v54  ;;  %v1369_v10 = vld [vmem:[%s6607_s4 + $0x210] sm:$0xff]  ;;  %v1516_v24 = vld [vmem:[%s6607_s4 + $0x6a8] sm:$0xff]  ;;  %v1478_v34 = vld [vmem:[%s6607_s4 + $0x578] sm:$0xff] }
 0x1cc   :  { %1752 = vmatpush.msra.mxu1 %v1417_v28  ;;  %1769 = vmatpush.msra.mxu2 %v1493_v31  ;;  %v1453_v14 = vld [vmem:[%s6607_s4 + $0x4b0] sm:$0xff]  ;;  %v1354_v28 = vld [vmem:[%s6607_s4 + $0x198] sm:$0xff] }
 0x1cd   :  { %1733 = vmatpush.msra.mxu0 %v1349_v2  ;;  %1713 = vmatpush.msrb.mxu3 %v1540_v57  ;;  %v1449_v18 = vld [vmem:[%s6607_s4 + $0x490] sm:$0xff]  ;;  %v1350_v31 = vld [vmem:[%s6607_s4 + $0x178] sm:$0xff] }
 0x1ce   :  { %1753 = vmatpush.msra.mxu1 %v1413_v30  ;;  %1770 = vmatpush.msra.mxu2 %v1489_v3  ;;  %v1441_v2 = vld [vmem:[%s6607_s4 + $0x450] sm:$0xff]  ;;  %v1512_v30 = vld [vmem:[%s6607_s4 + $0x688] sm:$0xff]  ;;  %v1346_v3 = vld [vmem:[%s6607_s4 + $0x158] sm:$0xff] }
 0x1cf   :  { %1734 = vmatpush.msra.mxu0 %v1345_v36  ;;  %1705 = vmatmul.f32.vlgmr.msrb.gmra.mxu2 %v5986_v29  ;;  %v1437_v36 = vld [vmem:[%s6607_s4 + $0x430] sm:$0xff]  ;;  %v1474_v57 = vld [vmem:[%s6607_s4 + $0x558] sm:$0xff] }
 0x1d0   :  { %1754 = vmatpush.msra.mxu1 %v1409_v37  ;;  %1771 = vmatpush.msra.mxu2 %v1485_v41  ;;  %v1508_v37 = vld [vmem:[%s6607_s4 + $0x668] sm:$0xff]  ;;  %v1342_v41 = vld [vmem:[%s6607_s4 + $0x138] sm:$0xff] }
 0x1d1   :  { %1735 = vmatpush.msra.mxu0 %v1341_v39  ;;  %1714 = vmatpush.msrb.mxu3 %v1536_v63  ;;  %v1433_v39 = vld [vmem:[%s6607_s4 + $0x410] sm:$0xff]  ;;  %v1470_v63 = vld [vmem:[%s6607_s4 + $0x538] sm:$0xff] }
 0x1d2   :  { %1755 = vmatpush.msra.mxu1 %v1405_v40  ;;  %1772 = vmatpush.msra.mxu2 %v1481_v43  ;;  %v1504_v40 = vld [vmem:[%s6607_s4 + $0x648] sm:$0xff]  ;;  %v1402_v43 = vld [vmem:[%s6607_s4 + $0x318] sm:$0xff] }
 0x1d3   :  { %1736 = vmatpush.msra.mxu0 %v1337_v25  ;;  %1715 = vmatpush.msrb.mxu3 %v1532_v6  ;;  %v1500_v25 = vld [vmem:[%s6607_s4 + $0x628] sm:$0xff]  ;;  %v1374_v6 = vld [vmem:[%s6607_s4 + $0x238] sm:$0xff] }
 0x1d4   :  { %1756 = vmatpush.msra.mxu1 %v1401_v42  ;;  %1773 = vmatpush.msra.mxu2 %v1477_v32  ;;  %v1338_v42 = vld [vmem:[%s6607_s4 + $0x118] sm:$0xff] }
 0x1d5   :  { %1737 = vmatpush.msra.mxu0 %v1333_v27  ;;  %1716 = vmatpush.msrb.mxu3 %v1528_v11  ;;  %v1334_v27 = vld [vmem:[%s6607_s4 + $0xf8] sm:$0xff] }
 0x1d6   :  { %1757 = vmatpush.msra.mxu1 %v1397_v45  ;;  %1774 = vmatpush.msra.mxu2 %v1473_v50  ;;  %v1398_v45 = vld [vmem:[%s6607_s4 + $0x2f8] sm:$0xff] }
 0x1d7   :  { %1738 = vmatpush.msra.mxu0 %v1329_v46  ;;  %1717 = vmatpush.msrb.mxu3 %v1524_v15  ;;  %v1490_v46 = vld [vmem:[%s6607_s4 + $0x5d8] sm:$0xff] }
 0x1d8   :  { %1758 = vmatpush.msra.mxu1 %v1393_v47  ;;  %1775 = vmatpush.msra.mxu2 %v1469_v55  ;;  %v1330_v47 = vld [vmem:[%s6607_s4 + $0xd8] sm:$0xff] }
 0x1d9   :  { %1739 = vmatpush.msra.mxu0 %v1325_v48  ;;  %1718 = vmatpush.msrb.mxu3 %v1520_v19  ;;  %v1486_v32 = vld [vmem:[%s6607_s4 + $0x5b8] sm:$0xff] }
 0x1da   :  { %1759 = vmatpush.msra.mxu1 %v1389_v26  ;;  %1776 = vmatpush.msra.mxu2 %v1465_v60  ;;  %v1326_v48 = vld [vmem:[%s6607_s4 + $0xb8] sm:$0xff] }
 0x1db   :  { %1740 = vmatpush.msra.mxu0 %v1321_v52  ;;  %1719 = vmatpush.msrb.mxu3 %v1516_v24  ;;  %v1390_v26 = vld [vmem:[%s6607_s4 + $0x2b8] sm:$0xff] }
 0x1dc   :  { %1760 = vmatpush.msra.mxu1 %v1385_v53  ;;  %1777 = vmatpush.msra.mxu2 %v1461_v0  ;;  %v1482_v50 = vld [vmem:[%s6607_s4 + $0x598] sm:$0xff] }
 0x1dd   :  { %1741 = vmatpush.msra.mxu0 %v1317_v56  ;;  %1720 = vmatpush.msrb.mxu3 %v1512_v30  ;;  %v1322_v52 = vld [vmem:[%s6607_s4 + $0x98] sm:$0xff]  ;;  %v1557_v30 = vld [vmem:[%s6607_s4 + $0x7f0] sm:$0xff] }
 0x1de   :  { %1761 = vmatpush.msra.mxu1 %v1381_v51  ;;  %1778 = vmatpush.msra.mxu2 %v1457_v7  ;;  %v1386_v53 = vld [vmem:[%s6607_s4 + $0x298] sm:$0xff] }
 0x1df   :  { %1742 = vmatpush.msra.mxu0 %v1313_v61  ;;  %1721 = vmatpush.msrb.mxu3 %v1508_v37  ;;  %v1318_v55 = vld [vmem:[%s6607_s4 + $0x78] sm:$0xff]  ;;  %v1549_v37 = vld [vmem:[%s6607_s4 + $0x7b0] sm:$0xff] }
 0x1e0   :  { %1762 = vmatpush.msra.mxu1 %v1377_v62  ;;  %1779 = vmatpush.msra.mxu2 %v1453_v14  ;;  %v1382_v56 = vld [vmem:[%s6607_s4 + $0x278] sm:$0xff] }
 0x1e1   :  { %1743 = vmatpush.msra.mxu0 %v1309_v4  ;;  %1722 = vmatpush.msrb.mxu3 %v1504_v40  ;;  %v1314_v60 = vld [vmem:[%s6607_s4 + $0x58] sm:$0xff]  ;;  %v1533_v40 = vld [vmem:[%s6607_s4 + $0x730] sm:$0xff] }
 0x1e2   :  { %1763 = vmatpush.msra.mxu1 %v1373_v5  ;;  %1780 = vmatpush.msra.mxu2 %v1449_v18  ;;  %v1378_v61 = vld [vmem:[%s6607_s4 + $0x258] sm:$0xff] }
 0x1e3   :  { %1744 = vmatpush.msra.mxu0 %v1305_v8  ;;  %1723 = vmatpush.msrb.mxu3 %v1500_v25  ;;  %v1310_v5 = vld [vmem:[%s6607_s4 + $0x38] sm:$0xff]  ;;  %v1517_v25 = vld [vmem:[%s6607_s4 + $0x6b0] sm:$0xff] }
 0x1e4   :  { %1764 = vmatpush.msra.mxu1 %v1369_v10  ;;  %1745 = vmatmul.f32.vlgmr.msra.gmra.mxu0 %v5770_v58  ;;  %v1466_v7 = vld [vmem:[%s6607_s4 + $0x518] sm:$0xff] }
 0x1e5   :  { %1765 = vmatmul.f32.vlgmr.msra.gmra.mxu1 %v5772_v59  ;;  %1809 = vmatpush.msrb.mxu0 %v1366_v12  ;;  %v1306_v10 = vld [vmem:[%s6607_s4 + $0x18] sm:$0xff] }
 0x1e6   :  { %1829 = vmatpush.msrb.mxu1 %v1430_v13  ;;  %1781 = vmatpush.msra.mxu2 %v1445_v23  ;;  %v1370_v11 = vld [vmem:[%s6607_s4 + $0x218] sm:$0xff] }
 0x1e7   :  { %1810 = vmatpush.msrb.mxu0 %v1362_v16  ;;  %1724 = vmatpush.msrb.mxu3 %v1496_v44  ;;  %v1462_v13 = vld [vmem:[%s6607_s4 + $0x4f8] sm:$0xff]  ;;  %v1501_v44 = vld [vmem:[%s6607_s4 + $0x630] sm:$0xff] }
 0x1e8   :  { %1830 = vmatpush.msrb.mxu1 %v1426_v17  ;;  %1782 = vmatpush.msra.mxu2 %v1441_v2  ;;  %v1458_v15 = vld [vmem:[%s6607_s4 + $0x4d8] sm:$0xff] }
 0x1e9   :  { %1811 = vmatpush.msrb.mxu0 %v1358_v20  ;;  %v1454_v18 = vld [vmem:[%s6607_s4 + $0x4b8] sm:$0xff] }
 0x1ea   :  { %1831 = vmatpush.msrb.mxu1 %v1422_v22  ;;  %1783 = vmatpush.msra.mxu2 %v1437_v36  ;;  %v1450_v22 = vld [vmem:[%s6607_s4 + $0x498] sm:$0xff] }
 0x1eb   :  { %1812 = vmatpush.msrb.mxu0 %v1354_v28  ;;  %v1434_v36 = vld [vmem:[%s6607_s4 + $0x418] sm:$0xff] }
 0x1ec   :  { %1832 = vmatpush.msrb.mxu1 %v1418_v1  ;;  %1784 = vmatpush.msra.mxu2 %v1433_v39  ;;  %v1442_v1 = vld [vmem:[%s6607_s4 + $0x458] sm:$0xff]  ;;  %v1537_v39 = vld [vmem:[%s6607_s4 + $0x750] sm:$0xff] }
 0x1ed   :  { %1813 = vmatpush.msrb.mxu0 %v1350_v31  ;;  %1785 = vmatmul.f32.vlgmr.msra.gmra.mxu2 %v5986_v29  ;;  %v1438_v31 = vld [vmem:[%s6607_s4 + $0x438] sm:$0xff] }
 0x1ee   :  { %1833 = vmatpush.msrb.mxu1 %v1414_v33  ;;  %1849 = vmatpush.msrb.mxu2 %v1494_v35  ;;  %v1553_v33 = vld [vmem:[%s6607_s4 + $0x7d0] sm:$0xff] }
 0x1ef   :  { %1814 = vmatpush.msrb.mxu0 %v1346_v3  ;;  %v1545_v3 = vld [vmem:[%s6607_s4 + $0x790] sm:$0xff] }
 0x1f0   :  { %1834 = vmatpush.msrb.mxu1 %v1410_v38  ;;  %1850 = vmatpush.msrb.mxu2 %v1490_v46  ;;  %v1541_v38 = vld [vmem:[%s6607_s4 + $0x770] sm:$0xff]  ;;  %v1554_v46 = vld [vmem:[%s6607_s4 + $0x7d8] sm:$0xff] }
 0x1f1   :  { %1815 = vmatpush.msrb.mxu0 %v1342_v41  ;;  %v1525_v41 = vld [vmem:[%s6607_s4 + $0x6f0] sm:$0xff] }
 0x1f2   :  { %1835 = vmatpush.msrb.mxu1 %v1406_v21  ;;  %1851 = vmatpush.msrb.mxu2 %v1486_v32  ;;  %v1521_v21 = vld [vmem:[%s6607_s4 + $0x6d0] sm:$0xff]  ;;  %v1542_v32 = vld [vmem:[%s6607_s4 + $0x778] sm:$0xff] }
 0x1f3   :  { %1816 = vmatpush.msrb.mxu0 %v1338_v42  ;;  %v1513_v42 = vld [vmem:[%s6607_s4 + $0x690] sm:$0xff] }
 0x1f4   :  { %1836 = vmatpush.msrb.mxu1 %v1402_v43  ;;  %1852 = vmatpush.msrb.mxu2 %v1482_v50  ;;  %v1509_v43 = vld [vmem:[%s6607_s4 + $0x670] sm:$0xff]  ;;  %v1526_v50 = vld [vmem:[%s6607_s4 + $0x6f8] sm:$0xff] }
 0x1f5   :  { %1817 = vmatpush.msrb.mxu0 %v1334_v27  ;;  %v1156_v54 = vpop.f32.mrf.mxu0  ;;  %v1176_v62 = vpop.f32.mrf.mxu1  ;;  %v1505_v35 = vld [vmem:[%s6607_s4 + $0x650] sm:$0xff] }
 0x1f6   :  { %1837 = vmatpush.msrb.mxu1 %v1398_v45  ;;  %v1157_v51 = vadd.f32 %v1156_v54, %v633_v49  ;;  %1853 = vmatpush.msrb.mxu2 %v1478_v34  ;;  %v1497_v27 = vld [vmem:[%s6607_s4 + $0x610] sm:$0xff]  ;;  %v1558_v45 = vld [vmem:[%s6607_s4 + $0x7f8] sm:$0xff] }
 0x1f7   :  { %1818 = vmatpush.msrb.mxu0 %v1330_v47  ;;  %v1550_v47 = vld [vmem:[%s6607_s4 + $0x7b8] sm:$0xff] }
 0x1f8   :  { %1838 = vmatpush.msrb.mxu1 %v1394_v9  ;;  %v1177_v0 = vadd.f32 %v1176_v62, %v1157_v51  ;;  %v1196_v4 = vpop.f32.mrf.mxu2  ;;  %1854 = vmatpush.msrb.mxu2 %v1474_v57  ;;  %v1546_v9 = vld [vmem:[%s6607_s4 + $0x798] sm:$0xff] }
 0x1f9   :  { %1819 = vmatpush.msrb.mxu0 %v1326_v48  ;;  %v1538_v48 = vld [vmem:[%s6607_s4 + $0x758] sm:$0xff] }
 0x1fa   :  { %1839 = vmatpush.msrb.mxu1 %v1390_v26  ;;  %v1197_v8 = vadd.f32 %v1196_v4, %v1177_v0  ;;  %1855 = vmatpush.msrb.mxu2 %v1470_v63  ;;  %v1534_v26 = vld [vmem:[%s6607_s4 + $0x738] sm:$0xff] }
 0x1fb   :  { %1820 = vmatpush.msrb.mxu0 %v1322_v52  ;;  %v1530_v49 = vld [vmem:[%s6607_s4 + $0x718] sm:$0xff] }
 0x1fc   :  { %1840 = vmatpush.msrb.mxu1 %v1386_v53  ;;  %1856 = vmatpush.msrb.mxu2 %v1466_v7  ;;  %v1522_v52 = vld [vmem:[%s6607_s4 + $0x6d8] sm:$0xff] }
 0x1fd   :  { %1821 = vmatpush.msrb.mxu0 %v1318_v55  ;;  %v1518_v53 = vld [vmem:[%s6607_s4 + $0x6b8] sm:$0xff] }
 0x1fe   :  { %1841 = vmatpush.msrb.mxu1 %v1382_v56  ;;  %1857 = vmatpush.msrb.mxu2 %v1462_v13  ;;  %v1514_v34 = vld [vmem:[%s6607_s4 + $0x698] sm:$0xff] }
 0x1ff   :  { %1822 = vmatpush.msrb.mxu0 %v1314_v60  ;;  %v1510_v54 = vld [vmem:[%s6607_s4 + $0x678] sm:$0xff] }
 0x200   :  { %1842 = vmatpush.msrb.mxu1 %v1378_v61  ;;  %v1216_v12 = vpop.f32.mrf.mxu3  ;;  %v1236_v16 = vpop.f32.mrf.mxu0  ;;  %1858 = vmatpush.msrb.mxu2 %v1458_v15  ;;  %v1506_v55 = vld [vmem:[%s6607_s4 + $0x658] sm:$0xff]  ;;  %v6429_v61 = vld [vmem:[%s6608_s5] sm:$0xf] }
 0x201   :  { %1823 = vmatpush.msrb.mxu0 %v1310_v5  ;;  %v1217_v14 = vadd.f32 %v1216_v12, %v1197_v8  ;;  %v1502_v56 = vld [vmem:[%s6607_s4 + $0x638] sm:$0xff]  ;;  %v1562_v63 = vperm.slane %v6429_v61, 1  ;;  %v1561_v4 = vperm.slane %v6429_v61, 0 }
 0x202   :  { %1843 = vmatpush.msrb.mxu1 %v1374_v6  ;;  %1859 = vmatpush.msrb.mxu2 %v1454_v18  ;;  %v1498_v51 = vld [vmem:[%s6607_s4 + $0x618] sm:$0xff]  ;;  %v2034_v18 = vld [vmem:[#allocation7 + $0x3e8] sm:$0xff] }
 0x203   :  { %1824 = vmatpush.msrb.mxu0 %v1306_v10  ;;  %v1237_v17 = vadd.f32 %v1236_v16, %v1217_v14  ;;  %v1969_v14 = vld [vmem:[#allocation7 + $0x1e0] sm:$0xff]  ;;  %v1970_v16 = vld [vmem:[#allocation7 + $0x1e8] sm:$0xff] }
 0x204   :  { %1844 = vmatpush.msrb.mxu1 %v1370_v11  ;;  %1825 = vmatmul.f32.vlgmr.msrb.gmra.mxu0 %v5770_v58  ;;  %v1256_v19 = vpop.f32.mrf.mxu1  ;;  %v1446_v58 = vld [vmem:[%s6607_s4 + $0x478] sm:$0xff] }
 0x205   :  { %1845 = vmatmul.f32.vlgmr.msrb.gmra.mxu1 %v5772_v59  ;;  %v1257_v20 = vadd.f32 %v1256_v19, %v1237_v17  ;;  %1860 = vmatpush.msrb.mxu2 %v1450_v22  ;;  %v2033_v15 = vld [vmem:[#allocation7 + $0x3e0] sm:$0xff] }
 0x206   :  { %2053 = vmatpush.msra.mxu0 %v1969_v14  ;;  %2073 = vmatpush.msra.mxu1 %v2033_v15  ;;  %v1965_v19 = vld [vmem:[#allocation7 + $0x1c0] sm:$0xff]  ;;  %v1914_v15 = vld [vmem:[#allocation7 + $0x28] sm:$0xff] }
 0x207   :  { %1861 = vmatpush.msrb.mxu2 %v1446_v58  ;;  %v2030_v58 = vld [vmem:[#allocation7 + $0x3c8] sm:$0xff]  ;;  %v1977_v14 = vld [vmem:[#allocation7 + $0x220] sm:$0xff] }
 0x208   :  { %v1276_v23 = vpop.f32.mrf.mxu2  ;;  %2054 = vmatpush.msra.mxu0 %v1965_v19  ;;  %v1910_v19 = vld [vmem:[#allocation7 + $0x8] sm:$0xff] }
 0x209   :  { %v1277_v24 = vadd.f32 %v1276_v23, %v1257_v20  ;;  %1862 = vmatpush.msrb.mxu2 %v1442_v1  ;;  %v2029_v20 = vld [vmem:[#allocation7 + $0x3c0] sm:$0xff]  ;;  %v1962_v1 = vld [vmem:[#allocation7 + $0x1a8] sm:$0xff] }
 0x20a   :  { %2074 = vmatpush.msra.mxu1 %v2029_v20  ;;  %v1974_v20 = vld [vmem:[#allocation7 + $0x208] sm:$0xff] }
 0x20b   :  { %v1296_v28 = vpop.f32.mrf.mxu3  ;;  %1863 = vmatpush.msrb.mxu2 %v1438_v31 }
 0x20c   :  { %v1297_v59 = vadd.f32 %v1296_v28, %v1277_v24  ;;  %v1966_v24 = vld [vmem:[#allocation7 + $0x1c8] sm:$0xff]  ;;  %v1961_v28 = vld [vmem:[#allocation7 + $0x1a0] sm:$0xff] }
 0x20d   :  { %1864 = vmatpush.msrb.mxu2 %v1434_v36  ;;  %v2021_v36 = vld [vmem:[#allocation7 + $0x380] sm:$0xff]  ;;  %2055 = vmatpush.msra.mxu0 %v1961_v28  ;;  %v1967_v28 = vld [vmem:[#allocation7 + $0x1d0] sm:$0xff] }
 0x20e   :  { %v6317_v2 = vmax.f32 %v1297_v59, 0.0  ;;  %1865 = vmatmul.f32.vlgmr.msrb.gmra.mxu2 %v5986_v29  ;;  %v1529_v29 = vld [vmem:[%s6607_s4 + $0x710] sm:$0xff]  ;;  %v2025_v59 = vld [vmem:[#allocation7 + $0x3a0] sm:$0xff] }
 0x20f   :  { %2093 = vmatpush.msra.mxu2 %v1970_v16  ;;  %2075 = vmatpush.msra.mxu1 %v2025_v59  ;;  %v1978_v16 = vld [vmem:[#allocation7 + $0x228] sm:$0xff]  ;;  %v2031_v59 = vld [vmem:[#allocation7 + $0x3d0] sm:$0xff] }
 0x210   :  { %1645 = vmatmul.f32.vlgmr.msra.gmra.mxu3 %v6317_v2 }
 0x211   :  { %1789 = vmatpush.msra.mxu3 %v1557_v30  ;;  %2094 = vmatpush.msra.mxu2 %v1966_v24  ;;  %v1972_v24 = vld [vmem:[#allocation7 + $0x1f8] sm:$0xff] }
 0x212   :  { %2076 = vmatpush.msra.mxu1 %v2021_v36  ;;  %v2028_v36 = vld [vmem:[#allocation7 + $0x3b8] sm:$0xff] }
 0x213   :  { %1790 = vmatpush.msra.mxu3 %v1553_v33  ;;  %v1957_v33 = vld [vmem:[#allocation7 + $0x180] sm:$0xff]  ;;  %2095 = vmatpush.msra.mxu2 %v1962_v1  ;;  %v1968_v1 = vld [vmem:[#allocation7 + $0x1d8] sm:$0xff] }
 0x214   :  { %2056 = vmatpush.msra.mxu0 %v1957_v33  ;;  %v1964_v33 = vld [vmem:[#allocation7 + $0x1b8] sm:$0xff] }
 0x215   :  { %1791 = vmatpush.msra.mxu3 %v1549_v37  ;;  %v1958_v37 = vld [vmem:[#allocation7 + $0x188] sm:$0xff] }
 0x216   :  { %2096 = vmatpush.msra.mxu2 %v1958_v37 }
 0x217   :  { %1792 = vmatpush.msra.mxu3 %v1545_v3  ;;  %v2022_v3 = vld [vmem:[#allocation7 + $0x388] sm:$0xff] }
 0x218   :  { %1725 = vmatmul.f32.vlgmr.msrb.gmra.mxu3 %v6317_v2 }
 0x219   :  { %1793 = vmatpush.msra.mxu3 %v1541_v38 }
 0x21b   :  { %1794 = vmatpush.msra.mxu3 %v1537_v39  ;;  %v1953_v39 = vld [vmem:[#allocation7 + $0x160] sm:$0xff] }
 0x21c   :  { %2057 = vmatpush.msra.mxu0 %v1953_v39  ;;  %v2023_v39 = vld [vmem:[#allocation7 + $0x390] sm:$0xff] }
 0x21d   :  { %1795 = vmatpush.msra.mxu3 %v1533_v40  ;;  %v2017_v40 = vld [vmem:[#allocation7 + $0x360] sm:$0xff] }
 0x21e   :  { %2077 = vmatpush.msra.mxu1 %v2017_v40  ;;  %v1960_v40 = vld [vmem:[#allocation7 + $0x198] sm:$0xff] }
 0x21f   :  { %1796 = vmatpush.msra.mxu3 %v1529_v29  ;;  %v1954_v29 = vld [vmem:[#allocation7 + $0x168] sm:$0xff] }
 0x220   :  { %2097 = vmatpush.msra.mxu2 %v1954_v29  ;;  %v2024_v29 = vld [vmem:[#allocation7 + $0x398] sm:$0xff] }
 0x221   :  { %1797 = vmatpush.msra.mxu3 %v1525_v41  ;;  %v1586_v57 = vpop.f32.mrf.mxu0  ;;  %v2018_v41 = vld [vmem:[#allocation7 + $0x368] sm:$0xff] }
 0x222   :  { %v1606_v62 = vpop.f32.mrf.mxu1  ;;  %v1587_v7 = vadd.f32 %v1586_v57, %v1561_v4  ;;  %v1994_v57 = vld [vmem:[#allocation7 + $0x2a8] sm:$0xff]  ;;  %v1921_v4 = vld [vmem:[#allocation7 + $0x60] sm:$0xff] }
 0x223   :  { %1798 = vmatpush.msra.mxu3 %v1521_v21  ;;  %v1949_v21 = vld [vmem:[#allocation7 + $0x140] sm:$0xff] }
 0x224   :  { %v1607_v12 = vadd.f32 %v1606_v62, %v1587_v7  ;;  %2058 = vmatpush.msra.mxu0 %v1949_v21  ;;  %v1989_v62 = vld [vmem:[#allocation7 + $0x280] sm:$0xff]  ;;  %v1986_v7 = vld [vmem:[#allocation7 + $0x268] sm:$0xff]  ;;  %v2019_v21 = vld [vmem:[#allocation7 + $0x370] sm:$0xff] }
 0x225   :  { %1799 = vmatpush.msra.mxu3 %v1517_v25  ;;  %v2013_v25 = vld [vmem:[#allocation7 + $0x340] sm:$0xff] }
 0x226   :  { %2078 = vmatpush.msra.mxu1 %v2013_v25  ;;  %v1956_v25 = vld [vmem:[#allocation7 + $0x178] sm:$0xff] }
 0x227   :  { %1800 = vmatpush.msra.mxu3 %v1513_v42  ;;  %v1950_v42 = vld [vmem:[#allocation7 + $0x148] sm:$0xff] }
 0x228   :  { %2098 = vmatpush.msra.mxu2 %v1950_v42  ;;  %v1563_v42 = vperm.slane %v6429_v61, 2 }
 0x229   :  { %1801 = vmatpush.msra.mxu3 %v1509_v43  ;;  %v2014_v43 = vld [vmem:[#allocation7 + $0x348] sm:$0xff] }
 0x22b   :  { %1802 = vmatpush.msra.mxu3 %v1505_v35  ;;  %v1945_v35 = vld [vmem:[#allocation7 + $0x120] sm:$0xff] }
 0x22c   :  { %2059 = vmatpush.msra.mxu0 %v1945_v35  ;;  %v1951_v35 = vld [vmem:[#allocation7 + $0x150] sm:$0xff] }
 0x22d   :  { %1803 = vmatpush.msra.mxu3 %v1501_v44  ;;  %v2009_v44 = vld [vmem:[#allocation7 + $0x320] sm:$0xff] }
 0x22e   :  { %2079 = vmatpush.msra.mxu1 %v2009_v44  ;;  %v2015_v44 = vld [vmem:[#allocation7 + $0x350] sm:$0xff] }
 0x22f   :  { %1804 = vmatpush.msra.mxu3 %v1497_v27  ;;  %v1946_v27 = vld [vmem:[#allocation7 + $0x128] sm:$0xff] }
 0x230   :  { %1805 = vmatmul.f32.vlgmr.msra.gmra.mxu3 %v6317_v2  ;;  %2099 = vmatpush.msra.mxu2 %v1946_v27  ;;  %v1952_v27 = vld [vmem:[#allocation7 + $0x158] sm:$0xff] }
 0x231   :  { %1869 = vmatpush.msrb.mxu3 %v1558_v45  ;;  %v2010_v45 = vld [vmem:[#allocation7 + $0x328] sm:$0xff] }
 0x233   :  { %1870 = vmatpush.msrb.mxu3 %v1554_v46  ;;  %v1941_v46 = vld [vmem:[#allocation7 + $0x100] sm:$0xff] }
 0x234   :  { %2060 = vmatpush.msra.mxu0 %v1941_v46 }
 0x235   :  { %1871 = vmatpush.msrb.mxu3 %v1550_v47  ;;  %v2005_v47 = vld [vmem:[#allocation7 + $0x300] sm:$0xff] }
 0x236   :  { %2080 = vmatpush.msra.mxu1 %v2005_v47 }
 0x237   :  { %1872 = vmatpush.msrb.mxu3 %v1546_v9  ;;  %v1942_v9 = vld [vmem:[#allocation7 + $0x108] sm:$0xff] }
 0x238   :  { %2100 = vmatpush.msra.mxu2 %v1942_v9  ;;  %v1947_v9 = vld [vmem:[#allocation7 + $0x130] sm:$0xff] }
 0x239   :  { %1873 = vmatpush.msrb.mxu3 %v1542_v32  ;;  %v2006_v32 = vld [vmem:[#allocation7 + $0x308] sm:$0xff] }
 0x23b   :  { %1874 = vmatpush.msrb.mxu3 %v1538_v48  ;;  %v1937_v48 = vld [vmem:[#allocation7 + $0xe0] sm:$0xff] }
 0x23c   :  { %2061 = vmatpush.msra.mxu0 %v1937_v48  ;;  %v1948_v48 = vld [vmem:[#allocation7 + $0x138] sm:$0xff] }
 0x23d   :  { %1875 = vmatpush.msrb.mxu3 %v1534_v26  ;;  %v2001_v26 = vld [vmem:[#allocation7 + $0x2e0] sm:$0xff] }
 0x23e   :  { %2081 = vmatpush.msra.mxu1 %v2001_v26 }
 0x23f   :  { %1876 = vmatpush.msrb.mxu3 %v1530_v49  ;;  %v1938_v49 = vld [vmem:[#allocation7 + $0xe8] sm:$0xff] }
 0x240   :  { %2101 = vmatpush.msra.mxu2 %v1938_v49  ;;  %v1564_v49 = vperm.slane %v6429_v61, 3 }
 0x241   :  { %1877 = vmatpush.msrb.mxu3 %v1526_v50  ;;  %v1666_v0 = vpop.f32.mrf.mxu0  ;;  %v2002_v50 = vld [vmem:[#allocation7 + $0x2e8] sm:$0xff] }
 0x242   :  { %v1667_v6 = vadd.f32 %v1666_v0, %v1562_v63  ;;  %v1686_v8 = vpop.f32.mrf.mxu1  ;;  %v1926_v63 = vld [vmem:[#allocation7 + $0x88] sm:$0xff] }
 0x243   :  { %1878 = vmatpush.msrb.mxu3 %v1522_v52  ;;  %v1933_v52 = vld [vmem:[#allocation7 + $0xc0] sm:$0xff]  ;;  %v1990_v0 = vld [vmem:[#allocation7 + $0x288] sm:$0xff] }
 0x244   :  { %v1687_v11 = vadd.f32 %v1686_v8, %v1667_v6  ;;  %2062 = vmatpush.msra.mxu0 %v1933_v52  ;;  %v1922_v6 = vld [vmem:[#allocation7 + $0x68] sm:$0xff]  ;;  %v1917_v8 = vld [vmem:[#allocation7 + $0x40] sm:$0xff] }
 0x245   :  { %1879 = vmatpush.msrb.mxu3 %v1518_v53  ;;  %v1997_v53 = vld [vmem:[#allocation7 + $0x2c0] sm:$0xff] }
 0x246   :  { %2082 = vmatpush.msra.mxu1 %v1997_v53  ;;  %v1943_v53 = vld [vmem:[#allocation7 + $0x110] sm:$0xff] }
 0x247   :  { %1880 = vmatpush.msrb.mxu3 %v1514_v34  ;;  %v1934_v34 = vld [vmem:[#allocation7 + $0xc8] sm:$0xff] }
 0x248   :  { %2102 = vmatpush.msra.mxu2 %v1934_v34  ;;  %v2007_v34 = vld [vmem:[#allocation7 + $0x310] sm:$0xff] }
 0x249   :  { %1881 = vmatpush.msrb.mxu3 %v1510_v54  ;;  %v1998_v54 = vld [vmem:[#allocation7 + $0x2c8] sm:$0xff] }
 0x24a   :  { %v1626_v60 = vpop.f32.mrf.mxu2 }
 0x24b   :  { %1882 = vmatpush.msrb.mxu3 %v1506_v55  ;;  %v1627_v22 = vadd.f32 %v1626_v60, %v1607_v12  ;;  %v1929_v55 = vld [vmem:[#allocation7 + $0xa0] sm:$0xff]  ;;  %v1982_v12 = vld [vmem:[#allocation7 + $0x248] sm:$0xff] }
 0x24c   :  { %v1925_v60 = vld [vmem:[#allocation7 + $0x80] sm:$0xff]  ;;  %2063 = vmatpush.msra.mxu0 %v1929_v55  ;;  %v2008_v55 = vld [vmem:[#allocation7 + $0x318] sm:$0xff] }
 0x24d   :  { %1883 = vmatpush.msrb.mxu3 %v1502_v56  ;;  %v1993_v56 = vld [vmem:[#allocation7 + $0x2a0] sm:$0xff] }
 0x24e   :  { %2083 = vmatpush.msra.mxu1 %v1993_v56  ;;  %2064 = vmatpush.msra.mxu0 %v1925_v60  ;;  %v1939_v56 = vld [vmem:[#allocation7 + $0xf0] sm:$0xff]  ;;  %v1940_v60 = vld [vmem:[#allocation7 + $0xf8] sm:$0xff] }
 0x24f   :  { %1884 = vmatpush.msrb.mxu3 %v1498_v51  ;;  %v1930_v51 = vld [vmem:[#allocation7 + $0xa8] sm:$0xff] }
 0x250   :  { %1885 = vmatmul.f32.vlgmr.msrb.gmra.mxu3 %v6317_v2  ;;  %v2026_v2 = vld [vmem:[#allocation7 + $0x3a8] sm:$0xff]  ;;  %2103 = vmatpush.msra.mxu2 %v1930_v51  ;;  %v2003_v51 = vld [vmem:[#allocation7 + $0x2f0] sm:$0xff] }
 0x251   :  { %2113 = vmatpush.msra.mxu3 %v2034_v18  ;;  %2084 = vmatpush.msra.mxu1 %v1989_v62  ;;  %v1973_v18 = vld [vmem:[#allocation7 + $0x200] sm:$0xff]  ;;  %v2004_v62 = vld [vmem:[#allocation7 + $0x2f8] sm:$0xff] }
 0x252   :  { %v1706_v10 = vpop.f32.mrf.mxu2  ;;  %2104 = vmatpush.msra.mxu2 %v1926_v63  ;;  %2065 = vmatpush.msra.mxu0 %v1921_v4  ;;  %v1999_v4 = vld [vmem:[#allocation7 + $0x2d0] sm:$0xff] }
 0x253   :  { %v1707_v13 = vadd.f32 %v1706_v10, %v1687_v11  ;;  %2114 = vmatpush.msra.mxu3 %v2030_v58  ;;  %v1981_v10 = vld [vmem:[#allocation7 + $0x240] sm:$0xff]  ;;  %v1918_v11 = vld [vmem:[#allocation7 + $0x48] sm:$0xff]  ;;  %v2036_v58 = vld [vmem:[#allocation7 + $0x3f8] sm:$0xff] }
 0x254   :  { %2105 = vmatpush.msra.mxu2 %v1922_v6  ;;  %2066 = vmatpush.msra.mxu0 %v1917_v8  ;;  %v2000_v6 = vld [vmem:[#allocation7 + $0x2d8] sm:$0xff]  ;;  %v1931_v8 = vld [vmem:[#allocation7 + $0xb0] sm:$0xff] }
 0x255   :  { %2115 = vmatpush.msra.mxu3 %v2026_v2  ;;  %v2032_v2 = vld [vmem:[#allocation7 + $0x3d8] sm:$0xff] }
 0x256   :  { %2106 = vmatpush.msra.mxu2 %v1918_v11 }
 0x257   :  { %2116 = vmatpush.msra.mxu3 %v2022_v3  ;;  %v1959_v3 = vld [vmem:[#allocation7 + $0x190] sm:$0xff] }
 0x258   :  { %2107 = vmatpush.msra.mxu2 %v1914_v15 }
 0x259   :  { %2117 = vmatpush.msra.mxu3 %v2018_v41  ;;  %v1955_v41 = vld [vmem:[#allocation7 + $0x170] sm:$0xff] }
 0x25a   :  { %2108 = vmatpush.msra.mxu2 %v1910_v19  ;;  %v1928_v19 = vld [vmem:[#allocation7 + $0x98] sm:$0xff] }
 0x25b   :  { %2118 = vmatpush.msra.mxu3 %v2014_v43  ;;  %v2020_v43 = vld [vmem:[#allocation7 + $0x378] sm:$0xff] }
 0x25c   :  { %2173 = vmatpush.msrb.mxu2 %v1972_v24  ;;  %v1987_v24 = vld [vmem:[#allocation7 + $0x270] sm:$0xff] }
 0x25d   :  { %2119 = vmatpush.msra.mxu3 %v2010_v45  ;;  %v2016_v45 = vld [vmem:[#allocation7 + $0x358] sm:$0xff] }
 0x25e   :  { %2174 = vmatpush.msrb.mxu2 %v1968_v1 }
 0x25f   :  { %2120 = vmatpush.msra.mxu3 %v2006_v32  ;;  %v2011_v32 = vld [vmem:[#allocation7 + $0x330] sm:$0xff] }
 0x260   :  { %2175 = vmatpush.msrb.mxu2 %v1964_v33  ;;  %v1920_v33 = vld [vmem:[#allocation7 + $0x58] sm:$0xff] }
 0x261   :  { %2121 = vmatpush.msra.mxu3 %v2002_v50  ;;  %v1746_v37 = vpop.f32.mrf.mxu0  ;;  %v2012_v50 = vld [vmem:[#allocation7 + $0x338] sm:$0xff] }
 0x262   :  { %2176 = vmatpush.msrb.mxu2 %v1960_v40  ;;  %v1766_v46 = vpop.f32.mrf.mxu1  ;;  %v1747_v26 = vadd.f32 %v1746_v37, %v1563_v42  ;;  %v1979_v40 = vld [vmem:[#allocation7 + $0x230] sm:$0xff] }
 0x263   :  { %2122 = vmatpush.msra.mxu3 %v1998_v54  ;;  %v1944_v54 = vld [vmem:[#allocation7 + $0x118] sm:$0xff]  ;;  %v1911_v42 = vld [vmem:[#allocation7 + $0x10] sm:$0xff] }
 0x264   :  { %2177 = vmatpush.msrb.mxu2 %v1956_v25  ;;  %v1767_v61 = vadd.f32 %v1766_v46, %v1747_v26  ;;  %v1895_v46 = vld [vmem:[%s6604_s1] sm:$0xf] }
 0x265   :  { %2123 = vmatpush.msra.mxu3 %v1994_v57 }
 0x266   :  { %2178 = vmatpush.msrb.mxu2 %v1952_v27  ;;  %v1976_v27 = vld [vmem:[#allocation7 + $0x218] sm:$0xff] }
 0x267   :  { %2124 = vmatpush.msra.mxu3 %v1990_v0  ;;  %v1935_v0 = vld [vmem:[#allocation7 + $0xd0] sm:$0xff] }
 0x268   :  { %2179 = vmatpush.msrb.mxu2 %v1948_v48 }
 0x269   :  { %2125 = vmatpush.msra.mxu3 %v1986_v7 }
 0x26a   :  { %2180 = vmatpush.msrb.mxu2 %v1944_v54  ;;  %v2721_v54 = vld [vmem:[#allocation10 + $0xfc0] sm:$0xff] }
 0x26b   :  { %2126 = vmatpush.msra.mxu3 %v1982_v12 }
 0x26c   :  { %2181 = vmatpush.msrb.mxu2 %v1940_v60  ;;  %v2321_v60 = vld [vmem:[#allocation10 + $0x340] sm:$0xff] }
 0x26d   :  { %2127 = vmatpush.msra.mxu3 %v1978_v16 }
 0x26f   :  { %2128 = vmatpush.msra.mxu3 %v1974_v20  ;;  %v1992_v20 = vld [vmem:[#allocation7 + $0x298] sm:$0xff] }
 0x270   :  { %v1786_v47 = vpop.f32.mrf.mxu2 }
 0x271   :  { %2193 = vmatpush.msrb.mxu3 %v2036_v58  ;;  %v1787_v7 = vadd.f32 %v1786_v47, %v1767_v61  ;;  %v2705_v61 = vld [vmem:[#allocation10 + $0xf40] sm:$0xff] }
 0x273   :  { %2194 = vmatpush.msrb.mxu3 %v2032_v2 }
 0x275   :  { %2195 = vmatpush.msrb.mxu3 %v2028_v36  ;;  %v1984_v36 = vld [vmem:[#allocation7 + $0x258] sm:$0xff] }
 0x277   :  { %2196 = vmatpush.msrb.mxu3 %v2024_v29  ;;  %v1916_v29 = vld [vmem:[#allocation7 + $0x38] sm:$0xff] }
 0x279   :  { %2197 = vmatpush.msrb.mxu3 %v2020_v43  ;;  %v1975_v43 = vld [vmem:[#allocation7 + $0x210] sm:$0xff] }
 0x27b   :  { %2198 = vmatpush.msrb.mxu3 %v2016_v45 }
 0x27d   :  { %2199 = vmatpush.msrb.mxu3 %v2012_v50  ;;  %v2465_v50 = vld [vmem:[#allocation10 + $0x7c0] sm:$0xff] }
 0x27f   :  { %2200 = vmatpush.msrb.mxu3 %v2008_v55  ;;  %v2329_v55 = vld [vmem:[#allocation10 + $0x380] sm:$0xff] }
 0x281   :  { %v1826_v52 = vpop.f32.mrf.mxu0  ;;  %2201 = vmatpush.msrb.mxu3 %v2004_v62  ;;  %v2577_v62 = vld [vmem:[#allocation10 + $0xb40] sm:$0xff] }
 0x282   :  { %v1827_v63 = vadd.f32 %v1826_v52, %v1564_v49  ;;  %v1846_v11 = vpop.f32.mrf.mxu1  ;;  %v2337_v49 = vld [vmem:[#allocation10 + $0x3c0] sm:$0xff] }
 0x283   :  { %2202 = vmatpush.msrb.mxu3 %v2000_v6  ;;  %v2305_v6 = vld [vmem:[#allocation10 + $0x2c0] sm:$0xff] }
 0x284   :  { %v1847_v15 = vadd.f32 %v1846_v11, %v1827_v63  ;;  %v2313_v63 = vld [vmem:[#allocation10 + $0x300] sm:$0xff] }
 0x285   :  { %v2297_v11 = vld [vmem:[#allocation10 + $0x280] sm:$0xff] }
 0x291   :  { %v1866_v12 = vpop.f32.mrf.mxu2 }
 0x293   :  { %v1646_v5 = vpop.f32.mrf.mxu3 }
 0x294   :  { %v1647_v30 = vadd.f32 %v1646_v5, %v1627_v22  ;;  %v1985_v5 = vld [vmem:[#allocation7 + $0x260] sm:$0xff]  ;;  %v1971_v22 = vld [vmem:[#allocation7 + $0x1f0] sm:$0xff] }
 0x295   :  { %2085 = vmatpush.msra.mxu1 %v1985_v5  ;;  %v1936_v5 = vld [vmem:[#allocation7 + $0xd8] sm:$0xff] }
 0x296   :  { %2182 = vmatpush.msrb.mxu2 %v1936_v5  ;;  %v2697_v5 = vld [vmem:[#allocation10 + $0xf00] sm:$0xff] }
 0x297   :  { %2086 = vmatpush.msra.mxu1 %v1981_v10  ;;  %v1995_v10 = vld [vmem:[#allocation7 + $0x2b0] sm:$0xff] }
 0x299   :  { %2087 = vmatpush.msra.mxu1 %v1977_v14  ;;  %v1996_v14 = vld [vmem:[#allocation7 + $0x2b8] sm:$0xff] }
 0x29a   :  { %2203 = vmatpush.msrb.mxu3 %v1996_v14  ;;  %v2681_v14 = vld [vmem:[#allocation10 + $0xe80] sm:$0xff] }
 0x29b   :  { %v1726_v17 = vpop.f32.mrf.mxu3  ;;  %2088 = vmatpush.msra.mxu1 %v1973_v18  ;;  %v1991_v18 = vld [vmem:[#allocation7 + $0x290] sm:$0xff] }
 0x29c   :  { %v1727_v23 = vadd.f32 %v1726_v17, %v1707_v13  ;;  %v1913_v13 = vld [vmem:[#allocation7 + $0x20] sm:$0xff]  ;;  %2204 = vmatpush.msrb.mxu3 %v1992_v20 }
 0x29d   :  { %2067 = vmatpush.msra.mxu0 %v1913_v13  ;;  %v1909_v17 = vld [vmem:[#allocation7] sm:$0xff]  ;;  %v1932_v13 = vld [vmem:[#allocation7 + $0xb8] sm:$0xff] }
 0x29e   :  { %v1905_v31 = vrot.slane %v1727_v23, 6  ;;  %v2035_v23 = vld [vmem:[#allocation7 + $0x3f0] sm:$0xff]  ;;  %2183 = vmatpush.msrb.mxu2 %v1932_v13  ;;  %v2553_v13 = vld [vmem:[#allocation10 + $0xa80] sm:$0xff] }
 0x29f   :  { %2068 = vmatpush.msra.mxu0 %v1909_v17  ;;  %2153 = vmatpush.msrb.mxu1 %v2035_v23  ;;  %v1927_v17 = vld [vmem:[#allocation7 + $0x90] sm:$0xff]  ;;  %v2409_v20 = vld [vmem:[#allocation10 + $0x600] sm:$0xff] }
 0x2a0   :  { %v6434_v38 = vsel %vm1899_vm0, %v1647_v30, %v1905_v31  ;;  %v1963_v30 = vld [vmem:[#allocation7 + $0x1b0] sm:$0xff]  ;;  %2184 = vmatpush.msrb.mxu2 %v1928_v19  ;;  %v2281_v19 = vld [vmem:[#allocation10 + $0x200] sm:$0xff] }
 0x2a1   :  { %3566 = vst [vmem:[#allocation14] sm:$0xf] %v6434_v38  ;;  %2133 = vmatpush.msrb.mxu0 %v1971_v22  ;;  %2154 = vmatpush.msrb.mxu1 %v2031_v59  ;;  %v2027_v31 = vld [vmem:[#allocation7 + $0x3b0] sm:$0xff]  ;;  %v1867_v22 = vadd.f32 %v1866_v12, %v1847_v15  ;;  %v1988_v59 = vld [vmem:[#allocation7 + $0x278] sm:$0xff]  ;;  %v2425_v12 = vld [vmem:[#allocation10 + $0x680] sm:$0xff] }
 0x2a2   :  { %v1923_v23 = vld [vmem:[#allocation7 + $0x70] sm:$0xff]  ;;  %2205 = vmatpush.msrb.mxu3 %v1988_v59  ;;  %v2289_v15 = vld [vmem:[#allocation10 + $0x240] sm:$0xff] }
 0x2a3   :  { %2134 = vmatpush.msrb.mxu0 %v1967_v28  ;;  %2155 = vmatpush.msrb.mxu1 %v2027_v31  ;;  %v1924_v28 = vld [vmem:[#allocation7 + $0x78] sm:$0xff]  ;;  %v1983_v31 = vld [vmem:[#allocation7 + $0x250] sm:$0xff]  ;;  %v2657_v59 = vld [vmem:[#allocation10 + $0xdc0] sm:$0xff] }
 0x2a4   :  { %2185 = vmatpush.msrb.mxu2 %v1924_v28  ;;  %2206 = vmatpush.msrb.mxu3 %v1984_v36  ;;  %v2529_v28 = vld [vmem:[#allocation10 + $0x9c0] sm:$0xff] }
 0x2a5   :  { %2135 = vmatpush.msrb.mxu0 %v1963_v30  ;;  %2156 = vmatpush.msrb.mxu1 %v2023_v39  ;;  %v1919_v30 = vld [vmem:[#allocation7 + $0x50] sm:$0xff]  ;;  %v2385_v36 = vld [vmem:[#allocation10 + $0x540] sm:$0xff] }
 0x2a6   :  { %v1915_v39 = vld [vmem:[#allocation7 + $0x30] sm:$0xff]  ;;  %2186 = vmatpush.msrb.mxu2 %v1920_v33  ;;  %v2257_v33 = vld [vmem:[#allocation10 + $0x140] sm:$0xff] }
 0x2a7   :  { %2136 = vmatpush.msrb.mxu0 %v1959_v3  ;;  %2157 = vmatpush.msrb.mxu1 %v2019_v21 }
 0x2a8   :  { %2187 = vmatpush.msrb.mxu2 %v1916_v29  ;;  %v2505_v29 = vld [vmem:[#allocation10 + $0x900] sm:$0xff] }
 0x2a9   :  { %2137 = vmatpush.msrb.mxu0 %v1955_v41  ;;  %2158 = vmatpush.msrb.mxu1 %v2015_v44  ;;  %v1980_v41 = vld [vmem:[#allocation7 + $0x238] sm:$0xff] }
 0x2aa   :  { %v1912_v44 = vld [vmem:[#allocation7 + $0x18] sm:$0xff]  ;;  %2207 = vmatpush.msrb.mxu3 %v1980_v41  ;;  %v2633_v41 = vld [vmem:[#allocation10 + $0xd00] sm:$0xff] }
 0x2ab   :  { %2138 = vmatpush.msrb.mxu0 %v1951_v35  ;;  %2159 = vmatpush.msrb.mxu1 %v2011_v32 }
 0x2ac   :  { %2188 = vmatpush.msrb.mxu2 %v1912_v44  ;;  %2208 = vmatpush.msrb.mxu3 %v1976_v27  ;;  %v2361_v44 = vld [vmem:[#allocation10 + $0x480] sm:$0xff] }
 0x2ad   :  { %2139 = vmatpush.msrb.mxu0 %v1947_v9  ;;  %2160 = vmatpush.msrb.mxu1 %v2007_v34  ;;  %v2593_v34 = vld [vmem:[#allocation10 + $0xbc0] sm:$0xff] }
 0x2ae   :  { %v2489_v27 = vld [vmem:[#allocation10 + $0x880] sm:$0xff] }
 0x2af   :  { %2140 = vmatpush.msrb.mxu0 %v1943_v53  ;;  %2161 = vmatpush.msrb.mxu1 %v2003_v51  ;;  %v2585_v51 = vld [vmem:[#allocation10 + $0xb80] sm:$0xff] }
 0x2b1   :  { %2141 = vmatpush.msrb.mxu0 %v1939_v56  ;;  %2162 = vmatpush.msrb.mxu1 %v1999_v4  ;;  %v2457_v56 = vld [vmem:[#allocation10 + $0x780] sm:$0xff] }
 0x2b2   :  { %v2569_v4 = vld [vmem:[#allocation10 + $0xb00] sm:$0xff] }
 0x2b3   :  { %v1806_v57 = vpop.f32.mrf.mxu3  ;;  %2142 = vmatpush.msrb.mxu0 %v1935_v0  ;;  %2163 = vmatpush.msrb.mxu1 %v1995_v10  ;;  %v2441_v0 = vld [vmem:[#allocation10 + $0x700] sm:$0xff] }
 0x2b4   :  { %v1807_v16 = vadd.f32 %v1806_v57, %v1787_v7  ;;  %v2713_v57 = vld [vmem:[#allocation10 + $0xf80] sm:$0xff] }
 0x2b5   :  { %2143 = vmatpush.msrb.mxu0 %v1931_v8  ;;  %2164 = vmatpush.msrb.mxu1 %v1991_v18  ;;  %v2433_v7 = vld [vmem:[#allocation10 + $0x6c0] sm:$0xff] }
 0x2b6   :  { %v1889_v1 = vmul.f32 0.5, %v1807_v16  ;;  %v2561_v8 = vld [vmem:[#allocation10 + $0xac0] sm:$0xff] }
 0x2b7   :  { %2144 = vmatpush.msrb.mxu0 %v1927_v17  ;;  %2165 = vmatpush.msrb.mxu1 %v1987_v24  ;;  %v2689_v10 = vld [vmem:[#allocation10 + $0xec0] sm:$0xff] }
 0x2b8   :  { %v1891_v21 = vmul.f32 1.442695, %v1889_v1  ;;  %v2545_v17 = vld [vmem:[#allocation10 + $0xa40] sm:$0xff] }
 0x2b9   :  { %2145 = vmatpush.msrb.mxu0 %v1923_v23  ;;  %2166 = vmatpush.msrb.mxu1 %v1983_v31  ;;  %v2673_v18 = vld [vmem:[#allocation10 + $0xe40] sm:$0xff] }
 0x2ba   :  { %v2665_v23 = vld [vmem:[#allocation10 + $0xe00] sm:$0xff] }
 0x2bb   :  { %2146 = vmatpush.msrb.mxu0 %v1919_v30  ;;  %2167 = vmatpush.msrb.mxu1 %v1979_v40  ;;  %v2273_v24 = vld [vmem:[#allocation10 + $0x1c0] sm:$0xff] }
 0x2bc   :  { %v2265_v1 = vld [vmem:[#allocation10 + $0x180] sm:$0xff] }
 0x2bd   :  { %2147 = vmatpush.msrb.mxu0 %v1915_v39  ;;  %2168 = vmatpush.msrb.mxu1 %v1975_v43  ;;  %v2521_v30 = vld [vmem:[#allocation10 + $0x980] sm:$0xff] }
 0x2be   :  { %v2649_v31 = vld [vmem:[#allocation10 + $0xd80] sm:$0xff] }
 0x2bf   :  { %2148 = vmatpush.msrb.mxu0 %v1911_v42  ;;  %v2249_v39 = vld [vmem:[#allocation10 + $0x100] sm:$0xff] }
 0x2c0   :  { %v2377_v40 = vld [vmem:[#allocation10 + $0x500] sm:$0xff] }
 0x2c1   :  { %v2497_v42 = vld [vmem:[#allocation10 + $0x8c0] sm:$0xff] }
 0x2c2   :  { %v2625_v43 = vld [vmem:[#allocation10 + $0xcc0] sm:$0xff] }
 0x2d3   :  { %v1886_v58 = vpop.f32.mrf.mxu3 }
 0x2d4   :  { %v1887_v2 = vadd.f32 %v1886_v58, %v1867_v22  ;;  %v2537_v22 = vld [vmem:[#allocation10 + $0xa00] sm:$0xff] }
 0x2d5   :  { %v2401_v58 = vld [vmem:[#allocation10 + $0x5c0] sm:$0xff] }
 0x2d6   :  { %v1890_v37 = vmul.f32 0.5, %v1887_v2  ;;  %v3569_v3 = vrot.slane %v1887_v2, 6  ;;  %v2393_v2 = vld [vmem:[#allocation10 + $0x580] sm:$0xff] }
 0x2d8   :  { %v1893_v25 = vmul.f32 1.442695, %v1890_v37  ;;  %v3570_v35 = vsel %vm1899_vm0, %v1807_v16, %v3569_v3  ;;  %v2417_v16 = vld [vmem:[#allocation10 + $0x640] sm:$0xff] }
 0x2d9   :  { %3572 = vst [vmem:[#allocation15] sm:$0xf] %v3570_v35  ;;  %v2513_v37 = vld [vmem:[#allocation10 + $0x940] sm:$0xff] }
 0x2da   :  { %3652 = vpow2.f32 %v1893_v25  ;;  %v2641_v3 = vld [vmem:[#allocation10 + $0xd40] sm:$0xff]  ;;  %3616 = dma.vmem_to_hbm [thread:$0]  %s3612_s24, 64, %s3614_s22, [#allocation16]  }
 0x2db   :  { %3654 = vpow2.f32 %v1891_v21  ;;  %v2241_v21 = vld [vmem:[#allocation10 + $0xc0] sm:$0xff] }
 0x2dc   :  { %v2369_v25 = vld [vmem:[#allocation10 + $0x4c0] sm:$0xff] }
 0x2dd   :  { %v2233_v35 = vld [vmem:[#allocation10 + $0x80] sm:$0xff] }
 0x2e0   :  { %v3653_v45 = vpop.eup %3652 }
 0x2e1   :  { %v1898_v47 = vrot.slane %v3653_v45, 6  ;;  %v3655_v9 = vpop.eup %3654  ;;  %v2617_v45 = vld [vmem:[#allocation10 + $0xc80] sm:$0xff] }
 0x2e3   :  { %v1900_v32 = vsel %vm1899_vm0, %v3655_v9, %v1898_v47  ;;  %v2353_v47 = vld [vmem:[#allocation10 + $0x440] sm:$0xff] }
 0x2e4   :  { %v1902_v48 = vmul.f32 %v1900_v32, %v1895_v46  ;;  %v2225_v46 = vld [vmem:[#allocation10 + $0x40] sm:$0xff] }
 0x2e5   :  { %v2481_v9 = vld [vmem:[#allocation10 + $0x840] sm:$0xff] }
 0x2e6   :  { %v1908_v26 = vadd.f32 %v6434_v38, %v1902_v48  ;;  %v2449_v38 = vld [vmem:[#allocation10 + $0x740] sm:$0xff] }
 0x2e7   :  { %v2609_v32 = vld [vmem:[#allocation10 + $0xc40] sm:$0xff] }
 0x2e8   :  { %2048 = vst [vmem:[#allocation1] ss:$4 sm:$0xff] %v1908_v26  ;;  %v2217_v48 = vld [vmem:[#allocation10] sm:$0xff] }
 0x2e9   :  { %3565 = vst [vmem:[#allocation12] sm:$0xf] %v1908_v26  ;;  %v2345_v26 = vld [vmem:[#allocation10 + $0x400] sm:$0xff] }
 0x2ea   :  { %3594 = dma.vmem_to_hbm [thread:$0]  %s3590_s17, 64, %s3592_s15, [#allocation13]  }
 0x2eb   :  { %3605 = dma.vmem_to_hbm [thread:$0]  %s3601_s19, 64, %s3603_s20, [#allocation13]  }
 0x2ef   :  { %v2049_v52 = vld.sshfl [vmem:[#allocation1] sm:$0xff pattern:$0x73625140]  ;;  %v2050_v53 = vld.sshfl [vmem:[#allocation1 + $0x8] sm:$0xff pattern:$0x73625140] }
 0x2f0   :  { %2069 = vmatmul.f32.vlgmr.msra.gmra.mxu0 %v2049_v52  ;;  %2089 = vmatmul.f32.vlgmr.msra.gmra.mxu1 %v2050_v53 }
 0x2f1   :  { %2109 = vmatmul.f32.vlgmr.msra.gmra.mxu2 %v2049_v52  ;;  %2129 = vmatmul.f32.vlgmr.msra.gmra.mxu3 %v2050_v53 }
 0x2f2   :  { %2747 = vmatpush.msra.mxu0 %v2337_v49  ;;  %2767 = vmatpush.msra.mxu1 %v2465_v50  ;;  %v2338_v49 = vld [vmem:[#allocation10 + $0x3c8] sm:$0xff] }
 0x2f3   :  { %2787 = vmatpush.msra.mxu2 %v2593_v34  ;;  %2807 = vmatpush.msra.mxu3 %v2721_v54  ;;  %v2466_v50 = vld [vmem:[#allocation10 + $0x7c8] sm:$0xff] }
 0x2f4   :  { %2748 = vmatpush.msra.mxu0 %v2329_v55  ;;  %2768 = vmatpush.msra.mxu1 %v2457_v56  ;;  %v2330_v34 = vld [vmem:[#allocation10 + $0x388] sm:$0xff] }
 0x2f5   :  { %2788 = vmatpush.msra.mxu2 %v2585_v51  ;;  %2808 = vmatpush.msra.mxu3 %v2713_v57  ;;  %v2458_v54 = vld [vmem:[#allocation10 + $0x788] sm:$0xff] }
 0x2f6   :  { %2749 = vmatpush.msra.mxu0 %v2321_v60  ;;  %2769 = vmatpush.msra.mxu1 %v2449_v38  ;;  %v2594_v55 = vld [vmem:[#allocation10 + $0xbc8] sm:$0xff] }
 0x2f7   :  { %2789 = vmatpush.msra.mxu2 %v2577_v62  ;;  %2809 = vmatpush.msra.mxu3 %v2705_v61  ;;  %v2722_v56 = vld [vmem:[#allocation10 + $0xfc8] sm:$0xff] }
 0x2f8   :  { %2149 = vmatmul.f32.vlgmr.msrb.gmra.mxu0 %v2049_v52  ;;  %2169 = vmatmul.f32.vlgmr.msrb.gmra.mxu1 %v2050_v53  ;;  %v2322_v51 = vld [vmem:[#allocation10 + $0x348] sm:$0xff] }
 0x2f9   :  { %2189 = vmatmul.f32.vlgmr.msrb.gmra.mxu2 %v2049_v52  ;;  %2209 = vmatmul.f32.vlgmr.msrb.gmra.mxu3 %v2050_v53  ;;  %v2473_v52 = vld [vmem:[#allocation10 + $0x800] sm:$0xff]  ;;  %v2450_v57 = vld [vmem:[#allocation10 + $0x748] sm:$0xff] }
 0x2fa   :  { %2750 = vmatpush.msra.mxu0 %v2313_v63  ;;  %2770 = vmatpush.msra.mxu1 %v2441_v0  ;;  %v2601_v53 = vld [vmem:[#allocation10 + $0xc00] sm:$0xff]  ;;  %v2586_v60 = vld [vmem:[#allocation10 + $0xb88] sm:$0xff] }
 0x2fb   :  { %2790 = vmatpush.msra.mxu2 %v2569_v4  ;;  %2810 = vmatpush.msra.mxu3 %v2697_v5  ;;  %v2714_v38 = vld [vmem:[#allocation10 + $0xf88] sm:$0xff] }
 0x2fc   :  { %2751 = vmatpush.msra.mxu0 %v2305_v6  ;;  %2771 = vmatpush.msra.mxu1 %v2433_v7  ;;  %v2314_v62 = vld [vmem:[#allocation10 + $0x308] sm:$0xff] }
 0x2fd   :  { %2791 = vmatpush.msra.mxu2 %v2561_v8  ;;  %2811 = vmatpush.msra.mxu3 %v2689_v10  ;;  %v2442_v61 = vld [vmem:[#allocation10 + $0x708] sm:$0xff] }
 0x2fe   :  { %2752 = vmatpush.msra.mxu0 %v2297_v11  ;;  %2772 = vmatpush.msra.mxu1 %v2425_v12  ;;  %v2578_v63 = vld [vmem:[#allocation10 + $0xb48] sm:$0xff] }
 0x2ff   :  { %2792 = vmatpush.msra.mxu2 %v2553_v13  ;;  %2812 = vmatpush.msra.mxu3 %v2681_v14  ;;  %v2706_v0 = vld [vmem:[#allocation10 + $0xf48] sm:$0xff] }
 0x300   :  { %2753 = vmatpush.msra.mxu0 %v2289_v15  ;;  %2773 = vmatpush.msra.mxu1 %v2417_v16  ;;  %v2306_v4 = vld [vmem:[#allocation10 + $0x2c8] sm:$0xff] }
 0x301   :  { %2793 = vmatpush.msra.mxu2 %v2545_v17  ;;  %2813 = vmatpush.msra.mxu3 %v2673_v18  ;;  %v2434_v5 = vld [vmem:[#allocation10 + $0x6c8] sm:$0xff] }
 0x302   :  { %2754 = vmatpush.msra.mxu0 %v2281_v19  ;;  %2774 = vmatpush.msra.mxu1 %v2409_v20  ;;  %v2570_v6 = vld [vmem:[#allocation10 + $0xb08] sm:$0xff] }
 0x303   :  { %2794 = vmatpush.msra.mxu2 %v2537_v22  ;;  %2814 = vmatpush.msra.mxu3 %v2665_v23  ;;  %v2698_v7 = vld [vmem:[#allocation10 + $0xf08] sm:$0xff] }
 0x304   :  { %2755 = vmatpush.msra.mxu0 %v2273_v24  ;;  %2775 = vmatpush.msra.mxu1 %v2401_v58  ;;  %v2298_v8 = vld [vmem:[#allocation10 + $0x288] sm:$0xff] }
 0x305   :  { %2795 = vmatpush.msra.mxu2 %v2529_v28  ;;  %2815 = vmatpush.msra.mxu3 %v2657_v59  ;;  %v2426_v10 = vld [vmem:[#allocation10 + $0x688] sm:$0xff] }
 0x306   :  { %2756 = vmatpush.msra.mxu0 %v2265_v1  ;;  %2776 = vmatpush.msra.mxu1 %v2393_v2  ;;  %v2562_v11 = vld [vmem:[#allocation10 + $0xac8] sm:$0xff] }
 0x307   :  { %2796 = vmatpush.msra.mxu2 %v2521_v30  ;;  %2816 = vmatpush.msra.mxu3 %v2649_v31  ;;  %v2690_v12 = vld [vmem:[#allocation10 + $0xec8] sm:$0xff] }
 0x308   :  { %2757 = vmatpush.msra.mxu0 %v2257_v33  ;;  %2777 = vmatpush.msra.mxu1 %v2385_v36  ;;  %v2290_v13 = vld [vmem:[#allocation10 + $0x248] sm:$0xff] }
 0x309   :  { %2797 = vmatpush.msra.mxu2 %v2513_v37  ;;  %2817 = vmatpush.msra.mxu3 %v2641_v3  ;;  %v2418_v14 = vld [vmem:[#allocation10 + $0x648] sm:$0xff] }
 0x30a   :  { %2758 = vmatpush.msra.mxu0 %v2249_v39  ;;  %2778 = vmatpush.msra.mxu1 %v2377_v40  ;;  %v2554_v15 = vld [vmem:[#allocation10 + $0xa88] sm:$0xff] }
 0x30b   :  { %2798 = vmatpush.msra.mxu2 %v2505_v29  ;;  %2818 = vmatpush.msra.mxu3 %v2633_v41  ;;  %v2282_v16 = vld [vmem:[#allocation10 + $0x208] sm:$0xff] }
 0x30c   :  { %2759 = vmatpush.msra.mxu0 %v2241_v21  ;;  %2779 = vmatpush.msra.mxu1 %v2369_v25  ;;  %v2410_v17 = vld [vmem:[#allocation10 + $0x608] sm:$0xff] }
 0x30d   :  { %2799 = vmatpush.msra.mxu2 %v2497_v42  ;;  %2819 = vmatpush.msra.mxu3 %v2625_v43  ;;  %v2546_v18 = vld [vmem:[#allocation10 + $0xa48] sm:$0xff] }
 0x30e   :  { %2760 = vmatpush.msra.mxu0 %v2233_v35  ;;  %2780 = vmatpush.msra.mxu1 %v2361_v44  ;;  %v2274_v19 = vld [vmem:[#allocation10 + $0x1c8] sm:$0xff] }
 0x30f   :  { %2800 = vmatpush.msra.mxu2 %v2489_v27  ;;  %2820 = vmatpush.msra.mxu3 %v2617_v45  ;;  %v2402_v20 = vld [vmem:[#allocation10 + $0x5c8] sm:$0xff] }
 0x310   :  { %2761 = vmatpush.msra.mxu0 %v2225_v46  ;;  %2781 = vmatpush.msra.mxu1 %v2353_v47  ;;  %v2538_v22 = vld [vmem:[#allocation10 + $0xa08] sm:$0xff] }
 0x311   :  { %2801 = vmatpush.msra.mxu2 %v2481_v9  ;;  %2821 = vmatpush.msra.mxu3 %v2609_v32  ;;  %v2266_v23 = vld [vmem:[#allocation10 + $0x188] sm:$0xff] }
 0x312   :  { %2762 = vmatpush.msra.mxu0 %v2217_v48  ;;  %2782 = vmatpush.msra.mxu1 %v2345_v26  ;;  %v2258_v24 = vld [vmem:[#allocation10 + $0x148] sm:$0xff] }
 0x313   :  { %2802 = vmatpush.msra.mxu2 %v2473_v52  ;;  %2822 = vmatpush.msra.mxu3 %v2601_v53  ;;  %v2250_v58 = vld [vmem:[#allocation10 + $0x108] sm:$0xff]  ;;  %v2037_v52 = vld [vmem:[#allocation8] sm:$0xf] }
 0x314   :  { %2827 = vmatpush.msrb.mxu0 %v2338_v49  ;;  %2847 = vmatpush.msrb.mxu1 %v2466_v50  ;;  %v2242_v28 = vld [vmem:[#allocation10 + $0xc8] sm:$0xff]  ;;  %v2039_v53 = vperm.slane %v2037_v52, 0 }
 0x315   :  { %2867 = vmatpush.msrb.mxu2 %v2594_v55  ;;  %2887 = vmatpush.msrb.mxu3 %v2722_v56  ;;  %v2394_v59 = vld [vmem:[#allocation10 + $0x588] sm:$0xff] }
 0x316   :  { %2828 = vmatpush.msrb.mxu0 %v2330_v34  ;;  %2848 = vmatpush.msrb.mxu1 %v2458_v54  ;;  %v2530_v1 = vld [vmem:[#allocation10 + $0x9c8] sm:$0xff] }
 0x317   :  { %2868 = vmatpush.msrb.mxu2 %v2586_v60  ;;  %2888 = vmatpush.msrb.mxu3 %v2714_v38  ;;  %v2682_v2 = vld [vmem:[#allocation10 + $0xe88] sm:$0xff]  ;;  %v2339_v60 = vld [vmem:[#allocation10 + $0x3d0] sm:$0xff]  ;;  %v2041_v38 = vperm.slane %v2037_v52, 2 }
 0x318   :  { %2829 = vmatpush.msrb.mxu0 %v2322_v51  ;;  %2849 = vmatpush.msrb.mxu1 %v2450_v57  ;;  %v2234_v30 = vld [vmem:[#allocation10 + $0x88] sm:$0xff]  ;;  %v2040_v51 = vperm.slane %v2037_v52, 1 }
 0x319   :  { %2869 = vmatpush.msrb.mxu2 %v2578_v63  ;;  %2889 = vmatpush.msrb.mxu3 %v2706_v0  ;;  %v2386_v31 = vld [vmem:[#allocation10 + $0x548] sm:$0xff]  ;;  %v2331_v63 = vld [vmem:[#allocation10 + $0x390] sm:$0xff] }
 0x31a   :  { %2830 = vmatpush.msrb.mxu0 %v2314_v62  ;;  %2850 = vmatpush.msrb.mxu1 %v2442_v61  ;;  %v2522_v33 = vld [vmem:[#allocation10 + $0x988] sm:$0xff] }
 0x31b   :  { %2870 = vmatpush.msrb.mxu2 %v2570_v6  ;;  %2890 = vmatpush.msrb.mxu3 %v2698_v7  ;;  %v2674_v36 = vld [vmem:[#allocation10 + $0xe48] sm:$0xff]  ;;  %v2323_v6 = vld [vmem:[#allocation10 + $0x350] sm:$0xff] }
 0x31c   :  { %2831 = vmatpush.msrb.mxu0 %v2306_v4  ;;  %2851 = vmatpush.msrb.mxu1 %v2434_v5  ;;  %v2226_v37 = vld [vmem:[#allocation10 + $0x48] sm:$0xff] }
 0x31d   :  { %2871 = vmatpush.msrb.mxu2 %v2562_v11  ;;  %2891 = vmatpush.msrb.mxu3 %v2690_v12  ;;  %v2378_v3 = vld [vmem:[#allocation10 + $0x508] sm:$0xff]  ;;  %v2315_v11 = vld [vmem:[#allocation10 + $0x310] sm:$0xff] }
 0x31e   :  { %2832 = vmatpush.msrb.mxu0 %v2298_v8  ;;  %2852 = vmatpush.msrb.mxu1 %v2426_v10  ;;  %v2514_v39 = vld [vmem:[#allocation10 + $0x948] sm:$0xff] }
 0x31f   :  { %2872 = vmatpush.msrb.mxu2 %v2554_v15  ;;  %2892 = vmatpush.msrb.mxu3 %v2682_v2  ;;  %v2666_v40 = vld [vmem:[#allocation10 + $0xe08] sm:$0xff]  ;;  %v2443_v2 = vld [vmem:[#allocation10 + $0x710] sm:$0xff] }
 0x320   :  { %2833 = vmatpush.msrb.mxu0 %v2290_v13  ;;  %2853 = vmatpush.msrb.mxu1 %v2418_v14  ;;  %v2218_v29 = vld [vmem:[#allocation10 + $0x8] sm:$0xff]  ;;  %v2467_v13 = vld [vmem:[#allocation10 + $0x7d0] sm:$0xff]  ;;  %v2042_v14 = vperm.slane %v2037_v52, 3 }
 0x321   :  { %2873 = vmatpush.msrb.mxu2 %v2546_v18  ;;  %2893 = vmatpush.msrb.mxu3 %v2674_v36  ;;  %v2370_v41 = vld [vmem:[#allocation10 + $0x4c8] sm:$0xff]  ;;  %v2459_v18 = vld [vmem:[#allocation10 + $0x790] sm:$0xff] }
 0x322   :  { %2834 = vmatpush.msrb.mxu0 %v2282_v16  ;;  %2854 = vmatpush.msrb.mxu1 %v2410_v17  ;;  %v2506_v21 = vld [vmem:[#allocation10 + $0x908] sm:$0xff]  ;;  %v2595_v16 = vld [vmem:[#allocation10 + $0xbd0] sm:$0xff] }
 0x323   :  { %2874 = vmatpush.msrb.mxu2 %v2538_v22  ;;  %2894 = vmatpush.msrb.mxu3 %v2666_v40  ;;  %v2658_v25 = vld [vmem:[#allocation10 + $0xdc8] sm:$0xff]  ;;  %v2307_v17 = vld [vmem:[#allocation10 + $0x2d0] sm:$0xff] }
 0x324   :  { %2835 = vmatpush.msrb.mxu0 %v2274_v19  ;;  %2855 = vmatpush.msrb.mxu1 %v2402_v20  ;;  %v2362_v42 = vld [vmem:[#allocation10 + $0x488] sm:$0xff]  ;;  %v2587_v20 = vld [vmem:[#allocation10 + $0xb90] sm:$0xff] }
 0x325   :  { %2875 = vmatpush.msrb.mxu2 %v2530_v1  ;;  %2895 = vmatpush.msrb.mxu3 %v2658_v25  ;;  %v2498_v43 = vld [vmem:[#allocation10 + $0x8c8] sm:$0xff]  ;;  %v2291_v1 = vld [vmem:[#allocation10 + $0x250] sm:$0xff] }
 0x326   :  { %2836 = vmatpush.msrb.mxu0 %v2266_v23  ;;  %2856 = vmatpush.msrb.mxu1 %v2394_v59  ;;  %v2650_v35 = vld [vmem:[#allocation10 + $0xd88] sm:$0xff]  ;;  %v2299_v23 = vld [vmem:[#allocation10 + $0x290] sm:$0xff] }
 0x327   :  { %2876 = vmatpush.msrb.mxu2 %v2522_v33  ;;  %2896 = vmatpush.msrb.mxu3 %v2650_v35  ;;  %v2354_v44 = vld [vmem:[#allocation10 + $0x448] sm:$0xff]  ;;  %v2435_v33 = vld [vmem:[#allocation10 + $0x6d0] sm:$0xff] }
 0x328   :  { %2837 = vmatpush.msrb.mxu0 %v2258_v24  ;;  %2857 = vmatpush.msrb.mxu1 %v2386_v31  ;;  %v2490_v27 = vld [vmem:[#allocation10 + $0x888] sm:$0xff]  ;;  %v2451_v24 = vld [vmem:[#allocation10 + $0x750] sm:$0xff] }
 0x329   :  { %2877 = vmatpush.msrb.mxu2 %v2514_v39  ;;  %v2642_v45 = vld [vmem:[#allocation10 + $0xd48] sm:$0xff]  ;;  %v2283_v31 = vld [vmem:[#allocation10 + $0x210] sm:$0xff] }
 0x32a   :  { %2838 = vmatpush.msrb.mxu0 %v2250_v58  ;;  %2858 = vmatpush.msrb.mxu1 %v2378_v3  ;;  %v2346_v46 = vld [vmem:[#allocation10 + $0x408] sm:$0xff]  ;;  %v2571_v36 = vld [vmem:[#allocation10 + $0xb10] sm:$0xff] }
 0x32b   :  { %2878 = vmatpush.msrb.mxu2 %v2506_v21  ;;  %v2482_v47 = vld [vmem:[#allocation10 + $0x848] sm:$0xff]  ;;  %2897 = vmatpush.msrb.mxu3 %v2642_v45  ;;  %v2275_v3 = vld [vmem:[#allocation10 + $0x1d0] sm:$0xff] }
 0x32c   :  { %2839 = vmatpush.msrb.mxu0 %v2242_v28  ;;  %2859 = vmatpush.msrb.mxu1 %v2370_v41  ;;  %v2634_v9 = vld [vmem:[#allocation10 + $0xd08] sm:$0xff]  ;;  %v2579_v28 = vld [vmem:[#allocation10 + $0xb50] sm:$0xff] }
 0x32d   :  { %2879 = vmatpush.msrb.mxu2 %v2498_v43  ;;  %2898 = vmatpush.msrb.mxu3 %v2634_v9  ;;  %v2474_v32 = vld [vmem:[#allocation10 + $0x808] sm:$0xff]  ;;  %v2427_v39 = vld [vmem:[#allocation10 + $0x690] sm:$0xff] }
 0x32e   :  { %2840 = vmatpush.msrb.mxu0 %v2234_v30  ;;  %2860 = vmatpush.msrb.mxu1 %v2362_v42  ;;  %v2626_v48 = vld [vmem:[#allocation10 + $0xcc8] sm:$0xff]  ;;  %v2563_v40 = vld [vmem:[#allocation10 + $0xad0] sm:$0xff] }
 0x32f   :  { %2880 = vmatpush.msrb.mxu2 %v2490_v27  ;;  %2899 = vmatpush.msrb.mxu3 %v2626_v48  ;;  %v2618_v26 = vld [vmem:[#allocation10 + $0xc88] sm:$0xff]  ;;  %v2267_v41 = vld [vmem:[#allocation10 + $0x190] sm:$0xff] }
 0x330   :  { %2841 = vmatpush.msrb.mxu0 %v2226_v37  ;;  %2861 = vmatpush.msrb.mxu1 %v2354_v44  ;;  %v2610_v49 = vld [vmem:[#allocation10 + $0xc48] sm:$0xff]  ;;  %v2723_v37 = vld [vmem:[#allocation10 + $0xfd0] sm:$0xff] }
 0x331   :  { %2881 = vmatpush.msrb.mxu2 %v2482_v47  ;;  %2900 = vmatpush.msrb.mxu3 %v2618_v26  ;;  %v2602_v50 = vld [vmem:[#allocation10 + $0xc08] sm:$0xff]  ;;  %v2419_v21 = vld [vmem:[#allocation10 + $0x650] sm:$0xff] }
 0x332   :  { %2842 = vmatpush.msrb.mxu0 %v2218_v29  ;;  %2862 = vmatpush.msrb.mxu1 %v2346_v46  ;;  %v2715_v29 = vld [vmem:[#allocation10 + $0xf90] sm:$0xff] }
 0x333   :  { %2882 = vmatpush.msrb.mxu2 %v2474_v32  ;;  %2901 = vmatpush.msrb.mxu3 %v2610_v49  ;;  %v2555_v25 = vld [vmem:[#allocation10 + $0xa90] sm:$0xff] }
 0x334   :  { %v2707_v42 = vld [vmem:[#allocation10 + $0xf50] sm:$0xff] }
 0x335   :  { %2902 = vmatpush.msrb.mxu3 %v2602_v50  ;;  %v2259_v43 = vld [vmem:[#allocation10 + $0x150] sm:$0xff] }
 0x336   :  { %v2411_v35 = vld [vmem:[#allocation10 + $0x610] sm:$0xff] }
 0x337   :  { %v2547_v44 = vld [vmem:[#allocation10 + $0xa50] sm:$0xff] }
 0x338   :  { %v2699_v27 = vld [vmem:[#allocation10 + $0xf10] sm:$0xff] }
 0x339   :  { %v2251_v45 = vld [vmem:[#allocation10 + $0x110] sm:$0xff] }
 0x33a   :  { %v2403_v46 = vld [vmem:[#allocation10 + $0x5d0] sm:$0xff] }
 0x33b   :  { %v2539_v47 = vld [vmem:[#allocation10 + $0xa10] sm:$0xff] }
 0x33c   :  { %v2691_v9 = vld [vmem:[#allocation10 + $0xed0] sm:$0xff] }
 0x33d   :  { %v2243_v32 = vld [vmem:[#allocation10 + $0xd0] sm:$0xff] }
 0x33e   :  { %v2395_v48 = vld [vmem:[#allocation10 + $0x590] sm:$0xff] }
 0x33f   :  { %v2531_v26 = vld [vmem:[#allocation10 + $0x9d0] sm:$0xff] }
 0x340   :  { %v2683_v49 = vld [vmem:[#allocation10 + $0xe90] sm:$0xff] }
 0x341   :  { %v2235_v50 = vld [vmem:[#allocation10 + $0x90] sm:$0xff] }
 0x342   :  { %v2387_v52 = vld [vmem:[#allocation10 + $0x550] sm:$0xff] }
 0x36d   :  { %v2070_v34 = vpop.f32.mrf.mxu0  ;;  %v2090_v54 = vpop.f32.mrf.mxu1 }
 0x36e   :  { %v2071_v55 = vadd.f32 %v2070_v34, %v2039_v53  ;;  %v2523_v53 = vld [vmem:[#allocation10 + $0x990] sm:$0xff] }
 0x36f   :  { %v2675_v34 = vld [vmem:[#allocation10 + $0xe50] sm:$0xff] }
 0x370   :  { %v2091_v56 = vadd.f32 %v2090_v54, %v2071_v55  ;;  %v2227_v54 = vld [vmem:[#allocation10 + $0x50] sm:$0xff] }
 0x371   :  { %v2379_v55 = vld [vmem:[#allocation10 + $0x510] sm:$0xff] }
 0x372   :  { %v6445_v57 = vmax.f32 %v2091_v56, 0.0  ;;  %v2515_v56 = vld [vmem:[#allocation10 + $0x950] sm:$0xff] }
 0x374   :  { %v2110_v62 = vpop.f32.mrf.mxu2  ;;  %v2130_v61 = vpop.f32.mrf.mxu3  ;;  %2763 = vmatmul.f32.vlgmr.msra.gmra.mxu0 %v6445_v57 }
 0x375   :  { %v2111_v0 = vadd.f32 %v2110_v62, %v2040_v51  ;;  %2907 = vmatpush.msra.mxu0 %v2339_v60  ;;  %v2150_v4 = vpop.f32.mrf.mxu0  ;;  %v2170_v8 = vpop.f32.mrf.mxu1  ;;  %v2667_v51 = vld [vmem:[#allocation10 + $0xe10] sm:$0xff] }
 0x376   :  { %v2151_v5 = vadd.f32 %v2150_v4, %v2041_v38  ;;  %v2219_v60 = vld [vmem:[#allocation10 + $0x10] sm:$0xff] }
 0x377   :  { %v2131_v7 = vadd.f32 %v2130_v61, %v2111_v0  ;;  %2908 = vmatpush.msra.mxu0 %v2331_v63  ;;  %v2371_v38 = vld [vmem:[#allocation10 + $0x4d0] sm:$0xff]  ;;  %v2340_v0 = vld [vmem:[#allocation10 + $0x3d8] sm:$0xff] }
 0x378   :  { %v2171_v10 = vadd.f32 %v2170_v8, %v2151_v5  ;;  %v2507_v62 = vld [vmem:[#allocation10 + $0x910] sm:$0xff] }
 0x379   :  { %v6448_v12 = vmax.f32 %v2131_v7, 0.0  ;;  %2909 = vmatpush.msra.mxu0 %v2323_v6  ;;  %v2659_v61 = vld [vmem:[#allocation10 + $0xdd0] sm:$0xff]  ;;  %v2332_v7 = vld [vmem:[#allocation10 + $0x398] sm:$0xff] }
 0x37a   :  { %v6450_v15 = vmax.f32 %v2171_v10, 0.0  ;;  %v2363_v63 = vld [vmem:[#allocation10 + $0x490] sm:$0xff] }
 0x37b   :  { %2783 = vmatmul.f32.vlgmr.msra.gmra.mxu1 %v6448_v12  ;;  %2910 = vmatpush.msra.mxu0 %v2315_v11  ;;  %v2499_v4 = vld [vmem:[#allocation10 + $0x8d0] sm:$0xff] }
 0x37c   :  { %2927 = vmatpush.msra.mxu1 %v2467_v13  ;;  %v2190_v19 = vpop.f32.mrf.mxu2  ;;  %2803 = vmatmul.f32.vlgmr.msra.gmra.mxu2 %v6450_v15  ;;  %v2210_v58 = vpop.f32.mrf.mxu3  ;;  %v2651_v5 = vld [vmem:[#allocation10 + $0xd90] sm:$0xff]  ;;  %v2324_v13 = vld [vmem:[#allocation10 + $0x358] sm:$0xff] }
 0x37d   :  { %v2191_v22 = vadd.f32 %v2190_v19, %v2042_v14  ;;  %2843 = vmatmul.f32.vlgmr.msrb.gmra.mxu0 %v6445_v57  ;;  %2947 = vmatpush.msra.mxu2 %v2595_v16  ;;  %v2355_v6 = vld [vmem:[#allocation10 + $0x450] sm:$0xff] }
 0x37e   :  { %2911 = vmatpush.msra.mxu0 %v2307_v17  ;;  %2928 = vmatpush.msra.mxu1 %v2459_v18  ;;  %v2491_v8 = vld [vmem:[#allocation10 + $0x890] sm:$0xff]  ;;  %v2316_v17 = vld [vmem:[#allocation10 + $0x318] sm:$0xff] }
 0x37f   :  { %v2211_v59 = vadd.f32 %v2210_v58, %v2191_v22  ;;  %2948 = vmatpush.msra.mxu2 %v2587_v20  ;;  %v2643_v10 = vld [vmem:[#allocation10 + $0xd50] sm:$0xff]  ;;  %v2468_v18 = vld [vmem:[#allocation10 + $0x7d8] sm:$0xff] }
 0x380   :  { %2912 = vmatpush.msra.mxu0 %v2299_v23  ;;  %2929 = vmatpush.msra.mxu1 %v2451_v24  ;;  %v2347_v11 = vld [vmem:[#allocation10 + $0x410] sm:$0xff]  ;;  %v2308_v22 = vld [vmem:[#allocation10 + $0x2d8] sm:$0xff] }
 0x381   :  { %v6455_v30 = vmax.f32 %v2211_v59, 0.0  ;;  %2949 = vmatpush.msra.mxu2 %v2579_v28  ;;  %v2483_v14 = vld [vmem:[#allocation10 + $0x850] sm:$0xff]  ;;  %v2460_v23 = vld [vmem:[#allocation10 + $0x798] sm:$0xff] }
 0x382   :  { %2913 = vmatpush.msra.mxu0 %v2291_v1  ;;  %2930 = vmatpush.msra.mxu1 %v2443_v2  ;;  %v2635_v16 = vld [vmem:[#allocation10 + $0xd10] sm:$0xff]  ;;  %v2596_v24 = vld [vmem:[#allocation10 + $0xbd8] sm:$0xff] }
 0x383   :  { %2823 = vmatmul.f32.vlgmr.msra.gmra.mxu3 %v6455_v30  ;;  %2863 = vmatmul.f32.vlgmr.msrb.gmra.mxu1 %v6448_v12  ;;  %v2475_v19 = vld [vmem:[#allocation10 + $0x810] sm:$0xff]  ;;  %v2300_v28 = vld [vmem:[#allocation10 + $0x298] sm:$0xff] }
 0x384   :  { %2914 = vmatpush.msra.mxu0 %v2283_v31  ;;  %2931 = vmatpush.msra.mxu1 %v2435_v33  ;;  %v2627_v20 = vld [vmem:[#allocation10 + $0xcd0] sm:$0xff]  ;;  %v2452_v59 = vld [vmem:[#allocation10 + $0x758] sm:$0xff] }
 0x385   :  { %2950 = vmatpush.msra.mxu2 %v2571_v36  ;;  %2967 = vmatpush.msra.mxu3 %v2723_v37  ;;  %v2619_v58 = vld [vmem:[#allocation10 + $0xc90] sm:$0xff]  ;;  %v2588_v1 = vld [vmem:[#allocation10 + $0xb98] sm:$0xff] }
 0x386   :  { %2883 = vmatmul.f32.vlgmr.msrb.gmra.mxu2 %v6450_v15  ;;  %2915 = vmatpush.msra.mxu0 %v2275_v3  ;;  %v2611_v2 = vld [vmem:[#allocation10 + $0xc50] sm:$0xff]  ;;  %v2292_v31 = vld [vmem:[#allocation10 + $0x258] sm:$0xff] }
 0x387   :  { %2932 = vmatpush.msra.mxu1 %v2427_v39  ;;  %2951 = vmatpush.msra.mxu2 %v2563_v40  ;;  %v2444_v33 = vld [vmem:[#allocation10 + $0x718] sm:$0xff]  ;;  %v2603_v37 = vld [vmem:[#allocation10 + $0xc10] sm:$0xff] }
 0x388   :  { %2968 = vmatpush.msra.mxu3 %v2715_v29  ;;  %2916 = vmatpush.msra.mxu0 %v2267_v41  ;;  %v2580_v36 = vld [vmem:[#allocation10 + $0xb58] sm:$0xff] }
 0x389   :  { %2933 = vmatpush.msra.mxu1 %v2419_v21  ;;  %2952 = vmatpush.msra.mxu2 %v2555_v25  ;;  %v2284_v3 = vld [vmem:[#allocation10 + $0x218] sm:$0xff] }
 0x38a   :  { %2969 = vmatpush.msra.mxu3 %v2707_v42  ;;  %2917 = vmatpush.msra.mxu0 %v2259_v43  ;;  %v2436_v39 = vld [vmem:[#allocation10 + $0x6d8] sm:$0xff] }
 0x38b   :  { %2934 = vmatpush.msra.mxu1 %v2411_v35  ;;  %2953 = vmatpush.msra.mxu2 %v2547_v44  ;;  %v2572_v40 = vld [vmem:[#allocation10 + $0xb18] sm:$0xff] }
 0x38c   :  { %2970 = vmatpush.msra.mxu3 %v2699_v27  ;;  %2918 = vmatpush.msra.mxu0 %v2251_v45  ;;  %v2724_v29 = vld [vmem:[#allocation10 + $0xfd8] sm:$0xff] }
 0x38d   :  { %2903 = vmatmul.f32.vlgmr.msrb.gmra.mxu3 %v6455_v30  ;;  %2935 = vmatpush.msra.mxu1 %v2403_v46  ;;  %v2276_v41 = vld [vmem:[#allocation10 + $0x1d8] sm:$0xff] }
 0x38e   :  { %2954 = vmatpush.msra.mxu2 %v2539_v47  ;;  %2971 = vmatpush.msra.mxu3 %v2691_v9  ;;  %v2428_v21 = vld [vmem:[#allocation10 + $0x698] sm:$0xff] }
 0x38f   :  { %2919 = vmatpush.msra.mxu0 %v2243_v32  ;;  %2936 = vmatpush.msra.mxu1 %v2395_v48  ;;  %v2564_v25 = vld [vmem:[#allocation10 + $0xad8] sm:$0xff] }
 0x390   :  { %2955 = vmatpush.msra.mxu2 %v2531_v26  ;;  %2972 = vmatpush.msra.mxu3 %v2683_v49  ;;  %v2716_v42 = vld [vmem:[#allocation10 + $0xf98] sm:$0xff] }
 0x391   :  { %2920 = vmatpush.msra.mxu0 %v2235_v50  ;;  %2937 = vmatpush.msra.mxu1 %v2387_v52  ;;  %v2268_v43 = vld [vmem:[#allocation10 + $0x198] sm:$0xff] }
 0x392   :  { %2956 = vmatpush.msra.mxu2 %v2523_v53  ;;  %2973 = vmatpush.msra.mxu3 %v2675_v34  ;;  %v2420_v35 = vld [vmem:[#allocation10 + $0x658] sm:$0xff] }
 0x393   :  { %2921 = vmatpush.msra.mxu0 %v2227_v54  ;;  %2938 = vmatpush.msra.mxu1 %v2379_v55  ;;  %v2556_v44 = vld [vmem:[#allocation10 + $0xa98] sm:$0xff] }
 0x394   :  { %2957 = vmatpush.msra.mxu2 %v2515_v56  ;;  %2974 = vmatpush.msra.mxu3 %v2667_v51  ;;  %v2708_v27 = vld [vmem:[#allocation10 + $0xf58] sm:$0xff] }
 0x395   :  { %2922 = vmatpush.msra.mxu0 %v2219_v60  ;;  %2939 = vmatpush.msra.mxu1 %v2371_v38  ;;  %v2260_v45 = vld [vmem:[#allocation10 + $0x158] sm:$0xff] }
 0x396   :  { %2958 = vmatpush.msra.mxu2 %v2507_v62  ;;  %2975 = vmatpush.msra.mxu3 %v2659_v61  ;;  %v2412_v46 = vld [vmem:[#allocation10 + $0x618] sm:$0xff] }
 0x397   :  { %2923 = vmatmul.f32.vlgmr.msra.gmra.mxu0 %v6445_v57  ;;  %2940 = vmatpush.msra.mxu1 %v2363_v63  ;;  %v2548_v47 = vld [vmem:[#allocation10 + $0xa58] sm:$0xff] }
 0x398   :  { %2987 = vmatpush.msrb.mxu0 %v2340_v0  ;;  %2959 = vmatpush.msra.mxu2 %v2499_v4  ;;  %v2700_v9 = vld [vmem:[#allocation10 + $0xf18] sm:$0xff] }
 0x399   :  { %2976 = vmatpush.msra.mxu3 %v2651_v5  ;;  %2941 = vmatpush.msra.mxu1 %v2355_v6  ;;  %v2252_v32 = vld [vmem:[#allocation10 + $0x118] sm:$0xff] }
 0x39a   :  { %2988 = vmatpush.msrb.mxu0 %v2332_v7  ;;  %2960 = vmatpush.msra.mxu2 %v2491_v8  ;;  %v2404_v48 = vld [vmem:[#allocation10 + $0x5d8] sm:$0xff]  ;;  %v2341_v7 = vld [vmem:[#allocation10 + $0x3e0] sm:$0xff] }
 0x39b   :  { %2977 = vmatpush.msra.mxu3 %v2643_v10  ;;  %2942 = vmatpush.msra.mxu1 %v2347_v11  ;;  %v2540_v26 = vld [vmem:[#allocation10 + $0xa18] sm:$0xff] }
 0x39c   :  { %2989 = vmatpush.msrb.mxu0 %v2324_v13  ;;  %2961 = vmatpush.msra.mxu2 %v2483_v14  ;;  %v2692_v49 = vld [vmem:[#allocation10 + $0xed8] sm:$0xff]  ;;  %v2333_v13 = vld [vmem:[#allocation10 + $0x3a0] sm:$0xff] }
 0x39d   :  { %2978 = vmatpush.msra.mxu3 %v2635_v16  ;;  %2943 = vmatmul.f32.vlgmr.msra.gmra.mxu1 %v6448_v12  ;;  %v2244_v50 = vld [vmem:[#allocation10 + $0xd8] sm:$0xff] }
 0x39e   :  { %2990 = vmatpush.msrb.mxu0 %v2316_v17  ;;  %3007 = vmatpush.msrb.mxu1 %v2468_v18  ;;  %v2396_v52 = vld [vmem:[#allocation10 + $0x598] sm:$0xff]  ;;  %v2325_v18 = vld [vmem:[#allocation10 + $0x360] sm:$0xff] }
 0x39f   :  { %2962 = vmatpush.msra.mxu2 %v2475_v19  ;;  %2979 = vmatpush.msra.mxu3 %v2627_v20  ;;  %v2532_v53 = vld [vmem:[#allocation10 + $0x9d8] sm:$0xff] }
 0x3a0   :  { %2963 = vmatmul.f32.vlgmr.msra.gmra.mxu2 %v6450_v15  ;;  %2991 = vmatpush.msrb.mxu0 %v2308_v22  ;;  %v2684_v34 = vld [vmem:[#allocation10 + $0xe98] sm:$0xff]  ;;  %v2317_v22 = vld [vmem:[#allocation10 + $0x320] sm:$0xff] }
 0x3a1   :  { %3008 = vmatpush.msrb.mxu1 %v2460_v23  ;;  %3027 = vmatpush.msrb.mxu2 %v2596_v24  ;;  %v2236_v54 = vld [vmem:[#allocation10 + $0x98] sm:$0xff]  ;;  %v2469_v23 = vld [vmem:[#allocation10 + $0x7e0] sm:$0xff] }
 0x3a2   :  { %2980 = vmatpush.msra.mxu3 %v2619_v58  ;;  %2992 = vmatpush.msrb.mxu0 %v2300_v28  ;;  %v2388_v55 = vld [vmem:[#allocation10 + $0x558] sm:$0xff]  ;;  %v2309_v28 = vld [vmem:[#allocation10 + $0x2e0] sm:$0xff] }
 0x3a3   :  { %3009 = vmatpush.msrb.mxu1 %v2452_v59  ;;  %3028 = vmatpush.msrb.mxu2 %v2588_v1  ;;  %v2524_v56 = vld [vmem:[#allocation10 + $0x998] sm:$0xff]  ;;  %v2461_v59 = vld [vmem:[#allocation10 + $0x7a0] sm:$0xff] }
 0x3a4   :  { %2981 = vmatpush.msra.mxu3 %v2611_v2  ;;  %2993 = vmatpush.msrb.mxu0 %v2292_v31  ;;  %v2676_v51 = vld [vmem:[#allocation10 + $0xe58] sm:$0xff]  ;;  %v2597_v1 = vld [vmem:[#allocation10 + $0xbe0] sm:$0xff] }
 0x3a5   :  { %3010 = vmatpush.msrb.mxu1 %v2444_v33  ;;  %3029 = vmatpush.msrb.mxu2 %v2580_v36  ;;  %v2228_v60 = vld [vmem:[#allocation10 + $0x58] sm:$0xff]  ;;  %v2301_v31 = vld [vmem:[#allocation10 + $0x2a0] sm:$0xff] }
 0x3a6   :  { %2982 = vmatpush.msra.mxu3 %v2603_v37  ;;  %2994 = vmatpush.msrb.mxu0 %v2284_v3  ;;  %v2380_v38 = vld [vmem:[#allocation10 + $0x518] sm:$0xff]  ;;  %v2453_v33 = vld [vmem:[#allocation10 + $0x760] sm:$0xff] }
 0x3a7   :  { %2983 = vmatmul.f32.vlgmr.msra.gmra.mxu3 %v6455_v30  ;;  %3011 = vmatpush.msrb.mxu1 %v2436_v39  ;;  %v2516_v62 = vld [vmem:[#allocation10 + $0x958] sm:$0xff]  ;;  %v2589_v36 = vld [vmem:[#allocation10 + $0xba0] sm:$0xff] }
 0x3a8   :  { %3030 = vmatpush.msrb.mxu2 %v2572_v40  ;;  %3047 = vmatpush.msrb.mxu3 %v2724_v29  ;;  %v2668_v61 = vld [vmem:[#allocation10 + $0xe18] sm:$0xff]  ;;  %v2293_v3 = vld [vmem:[#allocation10 + $0x260] sm:$0xff] }
 0x3a9   :  { %2995 = vmatpush.msrb.mxu0 %v2276_v41  ;;  %3012 = vmatpush.msrb.mxu1 %v2428_v21  ;;  %v2220_v63 = vld [vmem:[#allocation10 + $0x18] sm:$0xff]  ;;  %v2445_v39 = vld [vmem:[#allocation10 + $0x720] sm:$0xff] }
 0x3aa   :  { %3031 = vmatpush.msrb.mxu2 %v2564_v25  ;;  %3048 = vmatpush.msrb.mxu3 %v2716_v42  ;;  %v2372_v0 = vld [vmem:[#allocation10 + $0x4d8] sm:$0xff]  ;;  %v2581_v40 = vld [vmem:[#allocation10 + $0xb60] sm:$0xff] }
 0x3ab   :  { %2996 = vmatpush.msrb.mxu0 %v2268_v43  ;;  %3013 = vmatpush.msrb.mxu1 %v2420_v35  ;;  %v2508_v4 = vld [vmem:[#allocation10 + $0x918] sm:$0xff]  ;;  %v2285_v41 = vld [vmem:[#allocation10 + $0x220] sm:$0xff] }
 0x3ac   :  { %3032 = vmatpush.msrb.mxu2 %v2556_v44  ;;  %3049 = vmatpush.msrb.mxu3 %v2708_v27  ;;  %v2660_v5 = vld [vmem:[#allocation10 + $0xdd8] sm:$0xff]  ;;  %v2437_v21 = vld [vmem:[#allocation10 + $0x6e0] sm:$0xff] }
 0x3ad   :  { %2997 = vmatpush.msrb.mxu0 %v2260_v45  ;;  %3014 = vmatpush.msrb.mxu1 %v2412_v46  ;;  %v2364_v6 = vld [vmem:[#allocation10 + $0x498] sm:$0xff]  ;;  %v2573_v25 = vld [vmem:[#allocation10 + $0xb20] sm:$0xff] }
 0x3ae   :  { %3033 = vmatpush.msrb.mxu2 %v2548_v47  ;;  %3050 = vmatpush.msrb.mxu3 %v2700_v9  ;;  %v2500_v8 = vld [vmem:[#allocation10 + $0x8d8] sm:$0xff]  ;;  %v2725_v42 = vld [vmem:[#allocation10 + $0xfe0] sm:$0xff] }
 0x3af   :  { %2998 = vmatpush.msrb.mxu0 %v2252_v32  ;;  %3015 = vmatpush.msrb.mxu1 %v2404_v48  ;;  %v2652_v10 = vld [vmem:[#allocation10 + $0xd98] sm:$0xff]  ;;  %v2277_v43 = vld [vmem:[#allocation10 + $0x1e0] sm:$0xff] }
 0x3b0   :  { %3034 = vmatpush.msrb.mxu2 %v2540_v26  ;;  %3051 = vmatpush.msrb.mxu3 %v2692_v49  ;;  %v2356_v11 = vld [vmem:[#allocation10 + $0x458] sm:$0xff]  ;;  %v2429_v35 = vld [vmem:[#allocation10 + $0x6a0] sm:$0xff] }
 0x3b1   :  { %2999 = vmatpush.msrb.mxu0 %v2244_v50  ;;  %3016 = vmatpush.msrb.mxu1 %v2396_v52  ;;  %v2492_v14 = vld [vmem:[#allocation10 + $0x898] sm:$0xff]  ;;  %v2565_v44 = vld [vmem:[#allocation10 + $0xae0] sm:$0xff] }
 0x3b2   :  { %3035 = vmatpush.msrb.mxu2 %v2532_v53  ;;  %3052 = vmatpush.msrb.mxu3 %v2684_v34  ;;  %v2644_v16 = vld [vmem:[#allocation10 + $0xd58] sm:$0xff]  ;;  %v2717_v27 = vld [vmem:[#allocation10 + $0xfa0] sm:$0xff] }
 0x3b3   :  { %3000 = vmatpush.msrb.mxu0 %v2236_v54  ;;  %3017 = vmatpush.msrb.mxu1 %v2388_v55  ;;  %v2348_v17 = vld [vmem:[#allocation10 + $0x418] sm:$0xff]  ;;  %v2269_v45 = vld [vmem:[#allocation10 + $0x1a0] sm:$0xff] }
 0x3b4   :  { %3036 = vmatpush.msrb.mxu2 %v2524_v56  ;;  %3053 = vmatpush.msrb.mxu3 %v2676_v51  ;;  %v2484_v19 = vld [vmem:[#allocation10 + $0x858] sm:$0xff]  ;;  %v2421_v46 = vld [vmem:[#allocation10 + $0x660] sm:$0xff] }
 0x3b5   :  { %3001 = vmatpush.msrb.mxu0 %v2228_v60  ;;  %3018 = vmatpush.msrb.mxu1 %v2380_v38  ;;  %v2636_v20 = vld [vmem:[#allocation10 + $0xd18] sm:$0xff]  ;;  %v2557_v47 = vld [vmem:[#allocation10 + $0xaa0] sm:$0xff] }
 0x3b6   :  { %3037 = vmatpush.msrb.mxu2 %v2516_v62  ;;  %3054 = vmatpush.msrb.mxu3 %v2668_v61  ;;  %v2476_v24 = vld [vmem:[#allocation10 + $0x818] sm:$0xff]  ;;  %v2709_v9 = vld [vmem:[#allocation10 + $0xf60] sm:$0xff] }
 0x3b7   :  { %3002 = vmatpush.msrb.mxu0 %v2220_v63  ;;  %3019 = vmatpush.msrb.mxu1 %v2372_v0  ;;  %v2628_v58 = vld [vmem:[#allocation10 + $0xcd8] sm:$0xff]  ;;  %v2261_v32 = vld [vmem:[#allocation10 + $0x160] sm:$0xff] }
 0x3b8   :  { %3038 = vmatpush.msrb.mxu2 %v2508_v4  ;;  %3055 = vmatpush.msrb.mxu3 %v2660_v5  ;;  %v2620_v2 = vld [vmem:[#allocation10 + $0xc98] sm:$0xff]  ;;  %v2413_v48 = vld [vmem:[#allocation10 + $0x620] sm:$0xff] }
 0x3b9   :  { %3003 = vmatmul.f32.vlgmr.msrb.gmra.mxu0 %v6445_v57  ;;  %3020 = vmatpush.msrb.mxu1 %v2364_v6  ;;  %v2612_v37 = vld [vmem:[#allocation10 + $0xc58] sm:$0xff]  ;;  %v2549_v26 = vld [vmem:[#allocation10 + $0xa60] sm:$0xff] }
 0x3ba   :  { %3067 = vmatpush.msra.mxu0 %v2341_v7  ;;  %3039 = vmatpush.msrb.mxu2 %v2500_v8  ;;  %v2604_v29 = vld [vmem:[#allocation10 + $0xc18] sm:$0xff]  ;;  %v2701_v49 = vld [vmem:[#allocation10 + $0xf20] sm:$0xff] }
 0x3bb   :  { %3056 = vmatpush.msrb.mxu3 %v2652_v10  ;;  %3021 = vmatpush.msrb.mxu1 %v2356_v11  ;;  %v2253_v50 = vld [vmem:[#allocation10 + $0x120] sm:$0xff] }
 0x3bc   :  { %3068 = vmatpush.msra.mxu0 %v2333_v13  ;;  %3040 = vmatpush.msrb.mxu2 %v2492_v14  ;;  %v2405_v52 = vld [vmem:[#allocation10 + $0x5e0] sm:$0xff]  ;;  %v2342_v13 = vld [vmem:[#allocation10 + $0x3e8] sm:$0xff] }
 0x3bd   :  { %3057 = vmatpush.msrb.mxu3 %v2644_v16  ;;  %3022 = vmatpush.msrb.mxu1 %v2348_v17  ;;  %v2541_v53 = vld [vmem:[#allocation10 + $0xa20] sm:$0xff] }
 0x3be   :  { %3069 = vmatpush.msra.mxu0 %v2325_v18  ;;  %3041 = vmatpush.msrb.mxu2 %v2484_v19  ;;  %v2693_v34 = vld [vmem:[#allocation10 + $0xee0] sm:$0xff]  ;;  %v2334_v18 = vld [vmem:[#allocation10 + $0x3a8] sm:$0xff] }
 0x3bf   :  { %3058 = vmatpush.msrb.mxu3 %v2636_v20  ;;  %3023 = vmatmul.f32.vlgmr.msrb.gmra.mxu1 %v6448_v12  ;;  %v2245_v54 = vld [vmem:[#allocation10 + $0xe0] sm:$0xff] }
 0x3c0   :  { %3070 = vmatpush.msra.mxu0 %v2317_v22  ;;  %3087 = vmatpush.msra.mxu1 %v2469_v23  ;;  %v2397_v55 = vld [vmem:[#allocation10 + $0x5a0] sm:$0xff]  ;;  %v2326_v23 = vld [vmem:[#allocation10 + $0x368] sm:$0xff] }
 0x3c1   :  { %3042 = vmatpush.msrb.mxu2 %v2476_v24  ;;  %3059 = vmatpush.msrb.mxu3 %v2628_v58  ;;  %v2533_v56 = vld [vmem:[#allocation10 + $0x9e0] sm:$0xff] }
 0x3c2   :  { %3043 = vmatmul.f32.vlgmr.msrb.gmra.mxu2 %v6450_v15  ;;  %3071 = vmatpush.msra.mxu0 %v2309_v28  ;;  %v2685_v51 = vld [vmem:[#allocation10 + $0xea0] sm:$0xff]  ;;  %v2318_v28 = vld [vmem:[#allocation10 + $0x328] sm:$0xff] }
 0x3c3   :  { %3088 = vmatpush.msra.mxu1 %v2461_v59  ;;  %3107 = vmatpush.msra.mxu2 %v2597_v1  ;;  %v2237_v60 = vld [vmem:[#allocation10 + $0xa0] sm:$0xff]  ;;  %v2470_v59 = vld [vmem:[#allocation10 + $0x7e8] sm:$0xff] }
 0x3c4   :  { %3060 = vmatpush.msrb.mxu3 %v2620_v2  ;;  %3072 = vmatpush.msra.mxu0 %v2301_v31  ;;  %v2389_v38 = vld [vmem:[#allocation10 + $0x560] sm:$0xff]  ;;  %v2310_v31 = vld [vmem:[#allocation10 + $0x2e8] sm:$0xff] }
 0x3c5   :  { %3089 = vmatpush.msra.mxu1 %v2453_v33  ;;  %3108 = vmatpush.msra.mxu2 %v2589_v36  ;;  %v2525_v62 = vld [vmem:[#allocation10 + $0x9a0] sm:$0xff]  ;;  %v2462_v33 = vld [vmem:[#allocation10 + $0x7a8] sm:$0xff] }
 0x3c6   :  { %3061 = vmatpush.msrb.mxu3 %v2612_v37  ;;  %3073 = vmatpush.msra.mxu0 %v2293_v3  ;;  %v2677_v61 = vld [vmem:[#allocation10 + $0xe60] sm:$0xff]  ;;  %v2598_v36 = vld [vmem:[#allocation10 + $0xbe8] sm:$0xff] }
 0x3c7   :  { %3090 = vmatpush.msra.mxu1 %v2445_v39  ;;  %3109 = vmatpush.msra.mxu2 %v2581_v40  ;;  %v2229_v63 = vld [vmem:[#allocation10 + $0x60] sm:$0xff]  ;;  %v2302_v3 = vld [vmem:[#allocation10 + $0x2a8] sm:$0xff] }
 0x3c8   :  { %3062 = vmatpush.msrb.mxu3 %v2604_v29  ;;  %3074 = vmatpush.msra.mxu0 %v2285_v41  ;;  %v2381_v0 = vld [vmem:[#allocation10 + $0x520] sm:$0xff]  ;;  %v2454_v39 = vld [vmem:[#allocation10 + $0x768] sm:$0xff] }
 0x3c9   :  { %3063 = vmatmul.f32.vlgmr.msrb.gmra.mxu3 %v6455_v30  ;;  %3091 = vmatpush.msra.mxu1 %v2437_v21  ;;  %v2517_v4 = vld [vmem:[#allocation10 + $0x960] sm:$0xff]  ;;  %v2590_v40 = vld [vmem:[#allocation10 + $0xba8] sm:$0xff] }
 0x3ca   :  { %3110 = vmatpush.msra.mxu2 %v2573_v25  ;;  %3127 = vmatpush.msra.mxu3 %v2725_v42  ;;  %v2669_v5 = vld [vmem:[#allocation10 + $0xe20] sm:$0xff]  ;;  %v2294_v41 = vld [vmem:[#allocation10 + $0x268] sm:$0xff] }
 0x3cb   :  { %3075 = vmatpush.msra.mxu0 %v2277_v43  ;;  %3092 = vmatpush.msra.mxu1 %v2429_v35  ;;  %v2221_v6 = vld [vmem:[#allocation10 + $0x20] sm:$0xff]  ;;  %v2446_v21 = vld [vmem:[#allocation10 + $0x728] sm:$0xff] }
 0x3cc   :  { %3111 = vmatpush.msra.mxu2 %v2565_v44  ;;  %3128 = vmatpush.msra.mxu3 %v2717_v27  ;;  %v2373_v7 = vld [vmem:[#allocation10 + $0x4e0] sm:$0xff]  ;;  %v2582_v25 = vld [vmem:[#allocation10 + $0xb68] sm:$0xff] }
 0x3cd   :  { %3076 = vmatpush.msra.mxu0 %v2269_v45  ;;  %3093 = vmatpush.msra.mxu1 %v2421_v46  ;;  %v2509_v8 = vld [vmem:[#allocation10 + $0x920] sm:$0xff]  ;;  %v2286_v43 = vld [vmem:[#allocation10 + $0x228] sm:$0xff] }
 0x3ce   :  { %3112 = vmatpush.msra.mxu2 %v2557_v47  ;;  %3129 = vmatpush.msra.mxu3 %v2709_v9  ;;  %v2661_v10 = vld [vmem:[#allocation10 + $0xde0] sm:$0xff]  ;;  %v2438_v35 = vld [vmem:[#allocation10 + $0x6e8] sm:$0xff] }
 0x3cf   :  { %3077 = vmatpush.msra.mxu0 %v2261_v32  ;;  %3094 = vmatpush.msra.mxu1 %v2413_v48  ;;  %v2365_v11 = vld [vmem:[#allocation10 + $0x4a0] sm:$0xff]  ;;  %v2574_v44 = vld [vmem:[#allocation10 + $0xb28] sm:$0xff] }
 0x3d0   :  { %3113 = vmatpush.msra.mxu2 %v2549_v26  ;;  %3130 = vmatpush.msra.mxu3 %v2701_v49  ;;  %v2501_v14 = vld [vmem:[#allocation10 + $0x8e0] sm:$0xff]  ;;  %v2726_v27 = vld [vmem:[#allocation10 + $0xfe8] sm:$0xff] }
 0x3d1   :  { %3078 = vmatpush.msra.mxu0 %v2253_v50  ;;  %3095 = vmatpush.msra.mxu1 %v2405_v52  ;;  %v2653_v16 = vld [vmem:[#allocation10 + $0xda0] sm:$0xff]  ;;  %v2278_v45 = vld [vmem:[#allocation10 + $0x1e8] sm:$0xff] }
 0x3d2   :  { %3114 = vmatpush.msra.mxu2 %v2541_v53  ;;  %3131 = vmatpush.msra.mxu3 %v2693_v34  ;;  %v2357_v17 = vld [vmem:[#allocation10 + $0x460] sm:$0xff]  ;;  %v2430_v46 = vld [vmem:[#allocation10 + $0x6a8] sm:$0xff] }
 0x3d3   :  { %3079 = vmatpush.msra.mxu0 %v2245_v54  ;;  %3096 = vmatpush.msra.mxu1 %v2397_v55  ;;  %v2493_v19 = vld [vmem:[#allocation10 + $0x8a0] sm:$0xff]  ;;  %v2566_v47 = vld [vmem:[#allocation10 + $0xae8] sm:$0xff] }
 0x3d4   :  { %3115 = vmatpush.msra.mxu2 %v2533_v56  ;;  %3132 = vmatpush.msra.mxu3 %v2685_v51  ;;  %v2645_v20 = vld [vmem:[#allocation10 + $0xd60] sm:$0xff]  ;;  %v2718_v9 = vld [vmem:[#allocation10 + $0xfa8] sm:$0xff] }
 0x3d5   :  { %3080 = vmatpush.msra.mxu0 %v2237_v60  ;;  %3097 = vmatpush.msra.mxu1 %v2389_v38  ;;  %v2349_v22 = vld [vmem:[#allocation10 + $0x420] sm:$0xff]  ;;  %v2270_v32 = vld [vmem:[#allocation10 + $0x1a8] sm:$0xff] }
 0x3d6   :  { %3116 = vmatpush.msra.mxu2 %v2525_v62  ;;  %3133 = vmatpush.msra.mxu3 %v2677_v61  ;;  %v2485_v24 = vld [vmem:[#allocation10 + $0x860] sm:$0xff]  ;;  %v2422_v48 = vld [vmem:[#allocation10 + $0x668] sm:$0xff] }
 0x3d7   :  { %3081 = vmatpush.msra.mxu0 %v2229_v63  ;;  %3098 = vmatpush.msra.mxu1 %v2381_v0  ;;  %v2637_v58 = vld [vmem:[#allocation10 + $0xd20] sm:$0xff]  ;;  %v2558_v26 = vld [vmem:[#allocation10 + $0xaa8] sm:$0xff] }
 0x3d8   :  { %3117 = vmatpush.msra.mxu2 %v2517_v4  ;;  %3134 = vmatpush.msra.mxu3 %v2669_v5  ;;  %v2477_v1 = vld [vmem:[#allocation10 + $0x820] sm:$0xff]  ;;  %v2710_v49 = vld [vmem:[#allocation10 + $0xf68] sm:$0xff] }
 0x3d9   :  { %3082 = vmatpush.msra.mxu0 %v2221_v6  ;;  %3099 = vmatpush.msra.mxu1 %v2373_v7  ;;  %v2629_v2 = vld [vmem:[#allocation10 + $0xce0] sm:$0xff]  ;;  %v2262_v50 = vld [vmem:[#allocation10 + $0x168] sm:$0xff] }
 0x3da   :  { %3118 = vmatpush.msra.mxu2 %v2509_v8  ;;  %3135 = vmatpush.msra.mxu3 %v2661_v10  ;;  %v2621_v37 = vld [vmem:[#allocation10 + $0xca0] sm:$0xff]  ;;  %v2414_v52 = vld [vmem:[#allocation10 + $0x628] sm:$0xff] }
 0x3db   :  { %3083 = vmatmul.f32.vlgmr.msra.gmra.mxu0 %v6445_v57  ;;  %3100 = vmatpush.msra.mxu1 %v2365_v11  ;;  %v2613_v29 = vld [vmem:[#allocation10 + $0xc60] sm:$0xff]  ;;  %v2550_v53 = vld [vmem:[#allocation10 + $0xa68] sm:$0xff] }
 0x3dc   :  { %3147 = vmatpush.msrb.mxu0 %v2342_v13  ;;  %3119 = vmatpush.msra.mxu2 %v2501_v14  ;;  %v2605_v42 = vld [vmem:[#allocation10 + $0xc20] sm:$0xff]  ;;  %v2702_v34 = vld [vmem:[#allocation10 + $0xf28] sm:$0xff] }
 0x3dd   :  { %3136 = vmatpush.msra.mxu3 %v2653_v16  ;;  %3101 = vmatpush.msra.mxu1 %v2357_v17  ;;  %v2254_v54 = vld [vmem:[#allocation10 + $0x128] sm:$0xff] }
 0x3de   :  { %3148 = vmatpush.msrb.mxu0 %v2334_v18  ;;  %3120 = vmatpush.msra.mxu2 %v2493_v19  ;;  %v2406_v55 = vld [vmem:[#allocation10 + $0x5e8] sm:$0xff]  ;;  %v2343_v18 = vld [vmem:[#allocation10 + $0x3f0] sm:$0xff] }
 0x3df   :  { %3137 = vmatpush.msra.mxu3 %v2645_v20  ;;  %3102 = vmatpush.msra.mxu1 %v2349_v22  ;;  %v2542_v56 = vld [vmem:[#allocation10 + $0xa28] sm:$0xff] }
 0x3e0   :  { %3149 = vmatpush.msrb.mxu0 %v2326_v23  ;;  %3121 = vmatpush.msra.mxu2 %v2485_v24  ;;  %v2694_v51 = vld [vmem:[#allocation10 + $0xee8] sm:$0xff]  ;;  %v2335_v23 = vld [vmem:[#allocation10 + $0x3b0] sm:$0xff] }
 0x3e1   :  { %3138 = vmatpush.msra.mxu3 %v2637_v58  ;;  %3103 = vmatmul.f32.vlgmr.msra.gmra.mxu1 %v6448_v12  ;;  %v2246_v60 = vld [vmem:[#allocation10 + $0xe8] sm:$0xff] }
 0x3e2   :  { %3150 = vmatpush.msrb.mxu0 %v2318_v28  ;;  %3167 = vmatpush.msrb.mxu1 %v2470_v59  ;;  %v2398_v38 = vld [vmem:[#allocation10 + $0x5a8] sm:$0xff]  ;;  %v2327_v59 = vld [vmem:[#allocation10 + $0x370] sm:$0xff] }
 0x3e3   :  { %3122 = vmatpush.msra.mxu2 %v2477_v1  ;;  %3139 = vmatpush.msra.mxu3 %v2629_v2  ;;  %v2534_v62 = vld [vmem:[#allocation10 + $0x9e8] sm:$0xff] }
 0x3e4   :  { %3123 = vmatmul.f32.vlgmr.msra.gmra.mxu2 %v6450_v15  ;;  %3151 = vmatpush.msrb.mxu0 %v2310_v31  ;;  %v2686_v61 = vld [vmem:[#allocation10 + $0xea8] sm:$0xff]  ;;  %v2319_v31 = vld [vmem:[#allocation10 + $0x330] sm:$0xff] }
 0x3e5   :  { %3168 = vmatpush.msrb.mxu1 %v2462_v33  ;;  %3187 = vmatpush.msrb.mxu2 %v2598_v36  ;;  %v2238_v63 = vld [vmem:[#allocation10 + $0xa8] sm:$0xff]  ;;  %v2471_v33 = vld [vmem:[#allocation10 + $0x7f0] sm:$0xff] }
 0x3e6   :  { %3140 = vmatpush.msra.mxu3 %v2621_v37  ;;  %3152 = vmatpush.msrb.mxu0 %v2302_v3  ;;  %v2390_v0 = vld [vmem:[#allocation10 + $0x568] sm:$0xff]  ;;  %v2311_v3 = vld [vmem:[#allocation10 + $0x2f0] sm:$0xff] }
 0x3e7   :  { %3169 = vmatpush.msrb.mxu1 %v2454_v39  ;;  %3188 = vmatpush.msrb.mxu2 %v2590_v40  ;;  %v2526_v4 = vld [vmem:[#allocation10 + $0x9a8] sm:$0xff]  ;;  %v2463_v39 = vld [vmem:[#allocation10 + $0x7b0] sm:$0xff] }
 0x3e8   :  { %3141 = vmatpush.msra.mxu3 %v2613_v29  ;;  %3153 = vmatpush.msrb.mxu0 %v2294_v41  ;;  %v2678_v5 = vld [vmem:[#allocation10 + $0xe68] sm:$0xff]  ;;  %v2599_v40 = vld [vmem:[#allocation10 + $0xbf0] sm:$0xff] }
 0x3e9   :  { %3170 = vmatpush.msrb.mxu1 %v2446_v21  ;;  %3189 = vmatpush.msrb.mxu2 %v2582_v25  ;;  %v2230_v6 = vld [vmem:[#allocation10 + $0x68] sm:$0xff]  ;;  %v2303_v41 = vld [vmem:[#allocation10 + $0x2b0] sm:$0xff] }
 0x3ea   :  { %3142 = vmatpush.msra.mxu3 %v2605_v42  ;;  %3154 = vmatpush.msrb.mxu0 %v2286_v43  ;;  %v2382_v7 = vld [vmem:[#allocation10 + $0x528] sm:$0xff]  ;;  %v2455_v21 = vld [vmem:[#allocation10 + $0x770] sm:$0xff] }
 0x3eb   :  { %3143 = vmatmul.f32.vlgmr.msra.gmra.mxu3 %v6455_v30  ;;  %3171 = vmatpush.msrb.mxu1 %v2438_v35  ;;  %v2518_v8 = vld [vmem:[#allocation10 + $0x968] sm:$0xff]  ;;  %v2591_v25 = vld [vmem:[#allocation10 + $0xbb0] sm:$0xff] }
 0x3ec   :  { %3190 = vmatpush.msrb.mxu2 %v2574_v44  ;;  %3207 = vmatpush.msrb.mxu3 %v2726_v27  ;;  %v2670_v10 = vld [vmem:[#allocation10 + $0xe28] sm:$0xff]  ;;  %v2295_v43 = vld [vmem:[#allocation10 + $0x270] sm:$0xff] }
 0x3ed   :  { %3155 = vmatpush.msrb.mxu0 %v2278_v45  ;;  %3172 = vmatpush.msrb.mxu1 %v2430_v46  ;;  %v2222_v11 = vld [vmem:[#allocation10 + $0x28] sm:$0xff]  ;;  %v2447_v35 = vld [vmem:[#allocation10 + $0x730] sm:$0xff] }
 0x3ee   :  { %3191 = vmatpush.msrb.mxu2 %v2566_v47  ;;  %3208 = vmatpush.msrb.mxu3 %v2718_v9  ;;  %v2374_v13 = vld [vmem:[#allocation10 + $0x4e8] sm:$0xff]  ;;  %v2583_v44 = vld [vmem:[#allocation10 + $0xb70] sm:$0xff] }
 0x3ef   :  { %3156 = vmatpush.msrb.mxu0 %v2270_v32  ;;  %3173 = vmatpush.msrb.mxu1 %v2422_v48  ;;  %v2510_v14 = vld [vmem:[#allocation10 + $0x928] sm:$0xff]  ;;  %v2287_v45 = vld [vmem:[#allocation10 + $0x230] sm:$0xff] }
 0x3f0   :  { %3192 = vmatpush.msrb.mxu2 %v2558_v26  ;;  %3209 = vmatpush.msrb.mxu3 %v2710_v49  ;;  %v2662_v16 = vld [vmem:[#allocation10 + $0xde8] sm:$0xff]  ;;  %v2439_v46 = vld [vmem:[#allocation10 + $0x6f0] sm:$0xff] }
 0x3f1   :  { %3157 = vmatpush.msrb.mxu0 %v2262_v50  ;;  %3174 = vmatpush.msrb.mxu1 %v2414_v52  ;;  %v2366_v17 = vld [vmem:[#allocation10 + $0x4a8] sm:$0xff]  ;;  %v2575_v47 = vld [vmem:[#allocation10 + $0xb30] sm:$0xff] }
 0x3f2   :  { %3193 = vmatpush.msrb.mxu2 %v2550_v53  ;;  %3210 = vmatpush.msrb.mxu3 %v2702_v34  ;;  %v2502_v19 = vld [vmem:[#allocation10 + $0x8e8] sm:$0xff]  ;;  %v2727_v9 = vld [vmem:[#allocation10 + $0xff0] sm:$0xff] }
 0x3f3   :  { %3158 = vmatpush.msrb.mxu0 %v2254_v54  ;;  %3175 = vmatpush.msrb.mxu1 %v2406_v55  ;;  %v2654_v20 = vld [vmem:[#allocation10 + $0xda8] sm:$0xff]  ;;  %v2279_v32 = vld [vmem:[#allocation10 + $0x1f0] sm:$0xff] }
 0x3f4   :  { %3194 = vmatpush.msrb.mxu2 %v2542_v56  ;;  %3211 = vmatpush.msrb.mxu3 %v2694_v51  ;;  %v2358_v22 = vld [vmem:[#allocation10 + $0x468] sm:$0xff]  ;;  %v2431_v48 = vld [vmem:[#allocation10 + $0x6b0] sm:$0xff] }
 0x3f5   :  { %3159 = vmatpush.msrb.mxu0 %v2246_v60  ;;  %3176 = vmatpush.msrb.mxu1 %v2398_v38  ;;  %v2494_v24 = vld [vmem:[#allocation10 + $0x8a8] sm:$0xff]  ;;  %v2567_v26 = vld [vmem:[#allocation10 + $0xaf0] sm:$0xff] }
 0x3f6   :  { %3195 = vmatpush.msrb.mxu2 %v2534_v62  ;;  %3212 = vmatpush.msrb.mxu3 %v2686_v61  ;;  %v2646_v58 = vld [vmem:[#allocation10 + $0xd68] sm:$0xff]  ;;  %v2719_v49 = vld [vmem:[#allocation10 + $0xfb0] sm:$0xff] }
 0x3f7   :  { %3160 = vmatpush.msrb.mxu0 %v2238_v63  ;;  %3177 = vmatpush.msrb.mxu1 %v2390_v0  ;;  %v2350_v28 = vld [vmem:[#allocation10 + $0x428] sm:$0xff]  ;;  %v2271_v50 = vld [vmem:[#allocation10 + $0x1b0] sm:$0xff] }
 0x3f8   :  { %3196 = vmatpush.msrb.mxu2 %v2526_v4  ;;  %3213 = vmatpush.msrb.mxu3 %v2678_v5  ;;  %v2486_v1 = vld [vmem:[#allocation10 + $0x868] sm:$0xff]  ;;  %v2423_v52 = vld [vmem:[#allocation10 + $0x670] sm:$0xff] }
 0x3f9   :  { %3161 = vmatpush.msrb.mxu0 %v2230_v6  ;;  %3178 = vmatpush.msrb.mxu1 %v2382_v7  ;;  %v2638_v2 = vld [vmem:[#allocation10 + $0xd28] sm:$0xff]  ;;  %v2559_v53 = vld [vmem:[#allocation10 + $0xab0] sm:$0xff] }
 0x3fa   :  { %3197 = vmatpush.msrb.mxu2 %v2518_v8  ;;  %3214 = vmatpush.msrb.mxu3 %v2670_v10  ;;  %v2478_v36 = vld [vmem:[#allocation10 + $0x828] sm:$0xff]  ;;  %v2711_v34 = vld [vmem:[#allocation10 + $0xf70] sm:$0xff] }
 0x3fb   :  { %3162 = vmatpush.msrb.mxu0 %v2222_v11  ;;  %3179 = vmatpush.msrb.mxu1 %v2374_v13  ;;  %v2630_v37 = vld [vmem:[#allocation10 + $0xce8] sm:$0xff]  ;;  %v2263_v54 = vld [vmem:[#allocation10 + $0x170] sm:$0xff] }
 0x3fc   :  { %3198 = vmatpush.msrb.mxu2 %v2510_v14  ;;  %3215 = vmatpush.msrb.mxu3 %v2662_v16  ;;  %v2622_v29 = vld [vmem:[#allocation10 + $0xca8] sm:$0xff]  ;;  %v2415_v55 = vld [vmem:[#allocation10 + $0x630] sm:$0xff] }
 0x3fd   :  { %3163 = vmatmul.f32.vlgmr.msrb.gmra.mxu0 %v6445_v57  ;;  %3180 = vmatpush.msrb.mxu1 %v2366_v17  ;;  %v2614_v42 = vld [vmem:[#allocation10 + $0xc68] sm:$0xff]  ;;  %v2551_v56 = vld [vmem:[#allocation10 + $0xa70] sm:$0xff]  ;;  %v6477_v17 = vpop.f32.mrf.mxu0 }
 0x3fe   :  { %3227 = vmatpush.msra.mxu0 %v2343_v18  ;;  %3199 = vmatpush.msrb.mxu2 %v2502_v19  ;;  %v2606_v27 = vld [vmem:[#allocation10 + $0xc28] sm:$0xff]  ;;  %v2703_v51 = vld [vmem:[#allocation10 + $0xf30] sm:$0xff] }
 0x3ff   :  { %3216 = vmatpush.msrb.mxu3 %v2654_v20  ;;  %3181 = vmatpush.msrb.mxu1 %v2358_v22  ;;  %v2255_v60 = vld [vmem:[#allocation10 + $0x130] sm:$0xff] }
 0x400   :  { %3228 = vmatpush.msra.mxu0 %v2335_v23  ;;  %3200 = vmatpush.msrb.mxu2 %v2494_v24  ;;  %v2407_v38 = vld [vmem:[#allocation10 + $0x5f0] sm:$0xff]  ;;  %v6479_v23 = vpop.f32.mrf.mxu1 }
 0x401   :  { %3217 = vmatpush.msrb.mxu3 %v2646_v58  ;;  %3182 = vmatpush.msrb.mxu1 %v2350_v28  ;;  %v2543_v62 = vld [vmem:[#allocation10 + $0xa30] sm:$0xff]  ;;  %v2344_v58 = vld [vmem:[#allocation10 + $0x3f8] sm:$0xff] }
 0x402   :  { %3229 = vmatpush.msra.mxu0 %v2327_v59  ;;  %3201 = vmatpush.msrb.mxu2 %v2486_v1  ;;  %v2695_v61 = vld [vmem:[#allocation10 + $0xef0] sm:$0xff]  ;;  %v6481_v59 = vpop.f32.mrf.mxu2 }
 0x403   :  { %3218 = vmatpush.msrb.mxu3 %v2638_v2  ;;  %3183 = vmatmul.f32.vlgmr.msrb.gmra.mxu1 %v6448_v12  ;;  %v2247_v63 = vld [vmem:[#allocation10 + $0xf0] sm:$0xff] }
 0x404   :  { %3230 = vmatpush.msra.mxu0 %v2319_v31  ;;  %3247 = vmatpush.msra.mxu1 %v2471_v33  ;;  %v2399_v0 = vld [vmem:[#allocation10 + $0x5b0] sm:$0xff]  ;;  %v2336_v31 = vld [vmem:[#allocation10 + $0x3b8] sm:$0xff] }
 0x405   :  { %3202 = vmatpush.msrb.mxu2 %v2478_v36  ;;  %3219 = vmatpush.msrb.mxu3 %v2630_v37  ;;  %v2535_v4 = vld [vmem:[#allocation10 + $0x9f0] sm:$0xff] }
 0x406   :  { %3203 = vmatmul.f32.vlgmr.msrb.gmra.mxu2 %v6450_v15  ;;  %3231 = vmatpush.msra.mxu0 %v2311_v3  ;;  %v2687_v5 = vld [vmem:[#allocation10 + $0xeb0] sm:$0xff]  ;;  %v6484_v36 = vpop.f32.mrf.mxu3 }
 0x407   :  { %3248 = vmatpush.msra.mxu1 %v2463_v39  ;;  %3267 = vmatpush.msra.mxu2 %v2599_v40  ;;  %v2239_v6 = vld [vmem:[#allocation10 + $0xb0] sm:$0xff]  ;;  %v2328_v39 = vld [vmem:[#allocation10 + $0x378] sm:$0xff] }
 0x408   :  { %3220 = vmatpush.msrb.mxu3 %v2622_v29  ;;  %3232 = vmatpush.msra.mxu0 %v2303_v41  ;;  %v2391_v7 = vld [vmem:[#allocation10 + $0x570] sm:$0xff]  ;;  %v2320_v41 = vld [vmem:[#allocation10 + $0x338] sm:$0xff] }
 0x409   :  { %3249 = vmatpush.msra.mxu1 %v2455_v21  ;;  %3268 = vmatpush.msra.mxu2 %v2591_v25  ;;  %v2527_v8 = vld [vmem:[#allocation10 + $0x9b0] sm:$0xff]  ;;  %v2472_v21 = vld [vmem:[#allocation10 + $0x7f8] sm:$0xff]  ;;  %v2844_v25 = vpop.f32.mrf.mxu0 }
 0x40a   :  { %3221 = vmatpush.msrb.mxu3 %v2614_v42  ;;  %3233 = vmatpush.msra.mxu0 %v2295_v43  ;;  %v2679_v10 = vld [vmem:[#allocation10 + $0xe70] sm:$0xff] }
 0x40b   :  { %3250 = vmatpush.msra.mxu1 %v2447_v35  ;;  %3269 = vmatpush.msra.mxu2 %v2583_v44  ;;  %v2231_v11 = vld [vmem:[#allocation10 + $0x70] sm:$0xff]  ;;  %v2312_v35 = vld [vmem:[#allocation10 + $0x2f8] sm:$0xff]  ;;  %v2864_v44 = vpop.f32.mrf.mxu1 }
 0x40c   :  { %3222 = vmatpush.msrb.mxu3 %v2606_v27  ;;  %3234 = vmatpush.msra.mxu0 %v2287_v45  ;;  %v2383_v13 = vld [vmem:[#allocation10 + $0x530] sm:$0xff]  ;;  %v2464_v27 = vld [vmem:[#allocation10 + $0x7b8] sm:$0xff] }
 0x40d   :  { %3223 = vmatmul.f32.vlgmr.msrb.gmra.mxu3 %v6455_v30  ;;  %3251 = vmatpush.msra.mxu1 %v2439_v46  ;;  %v2519_v14 = vld [vmem:[#allocation10 + $0x970] sm:$0xff]  ;;  %v2600_v45 = vld [vmem:[#allocation10 + $0xbf8] sm:$0xff] }
 0x40e   :  { %3270 = vmatpush.msra.mxu2 %v2575_v47  ;;  %3287 = vmatpush.msra.mxu3 %v2727_v9  ;;  %v2671_v16 = vld [vmem:[#allocation10 + $0xe30] sm:$0xff]  ;;  %v2304_v47 = vld [vmem:[#allocation10 + $0x2b8] sm:$0xff]  ;;  %v6490_v9 = vld [vmem:[%s6612_s9] sm:$0xff] }
 0x40f   :  { %3235 = vmatpush.msra.mxu0 %v2279_v32  ;;  %3252 = vmatpush.msra.mxu1 %v2431_v48  ;;  %v2223_v18 = vld [vmem:[#allocation10 + $0x30] sm:$0xff]  ;;  %v2884_v32 = vpop.f32.mrf.mxu2  ;;  %v2456_v48 = vld [vmem:[#allocation10 + $0x778] sm:$0xff] }
 0x410   :  { %3271 = vmatpush.msra.mxu2 %v2567_v26  ;;  %3288 = vmatpush.msra.mxu3 %v2719_v49  ;;  %v2375_v19 = vld [vmem:[#allocation10 + $0x4f0] sm:$0xff]  ;;  %v2592_v26 = vld [vmem:[#allocation10 + $0xbb8] sm:$0xff]  ;;  %v2732_v49 = vperm.slane %v6490_v9, 1 }
 0x411   :  { %3236 = vmatpush.msra.mxu0 %v2271_v50  ;;  %3253 = vmatpush.msra.mxu1 %v2423_v52  ;;  %v2511_v20 = vld [vmem:[#allocation10 + $0x930] sm:$0xff]  ;;  %v2296_v52 = vld [vmem:[#allocation10 + $0x278] sm:$0xff] }
 0x412   :  { %3272 = vmatpush.msra.mxu2 %v2559_v53  ;;  %3289 = vmatpush.msra.mxu3 %v2711_v34  ;;  %v2663_v22 = vld [vmem:[#allocation10 + $0xdf0] sm:$0xff]  ;;  %v2904_v53 = vpop.f32.mrf.mxu3  ;;  %v2448_v34 = vld [vmem:[#allocation10 + $0x738] sm:$0xff] }
 0x413   :  { %3237 = vmatpush.msra.mxu0 %v2263_v54  ;;  %3254 = vmatpush.msra.mxu1 %v2415_v55  ;;  %v2367_v24 = vld [vmem:[#allocation10 + $0x4b0] sm:$0xff]  ;;  %v2584_v54 = vld [vmem:[#allocation10 + $0xb78] sm:$0xff]  ;;  %v2733_v55 = vperm.slane %v6490_v9, 2 }
 0x414   :  { %3273 = vmatpush.msra.mxu2 %v2551_v56  ;;  %3290 = vmatpush.msra.mxu3 %v2703_v51  ;;  %v2503_v28 = vld [vmem:[#allocation10 + $0x8f0] sm:$0xff]  ;;  %v2288_v51 = vld [vmem:[#allocation10 + $0x238] sm:$0xff] }
 0x415   :  { %3238 = vmatpush.msra.mxu0 %v2255_v60  ;;  %3255 = vmatpush.msra.mxu1 %v2407_v38  ;;  %v2655_v1 = vld [vmem:[#allocation10 + $0xdb0] sm:$0xff]  ;;  %v2924_v60 = vpop.f32.mrf.mxu0  ;;  %v2440_v38 = vld [vmem:[#allocation10 + $0x6f8] sm:$0xff] }
 0x416   :  { %3274 = vmatpush.msra.mxu2 %v2543_v62  ;;  %3291 = vmatpush.msra.mxu3 %v2695_v61  ;;  %v2359_v2 = vld [vmem:[#allocation10 + $0x470] sm:$0xff]  ;;  %v2845_v62 = vadd.f32 %v2844_v25, %v2732_v49  ;;  %v2576_v61 = vld [vmem:[#allocation10 + $0xb38] sm:$0xff] }
 0x417   :  { %3239 = vmatpush.msra.mxu0 %v2247_v63  ;;  %3256 = vmatpush.msra.mxu1 %v2399_v0  ;;  %v2495_v33 = vld [vmem:[#allocation10 + $0x8b0] sm:$0xff]  ;;  %v2728_v63 = vld [vmem:[#allocation10 + $0xff8] sm:$0xff]  ;;  %v2731_v0 = vperm.slane %v6490_v9, 0 }
 0x418   :  { %3275 = vmatpush.msra.mxu2 %v2535_v4  ;;  %3292 = vmatpush.msra.mxu3 %v2687_v5  ;;  %v2647_v37 = vld [vmem:[#allocation10 + $0xd70] sm:$0xff]  ;;  %v2280_v5 = vld [vmem:[#allocation10 + $0x1f8] sm:$0xff] }
 0x419   :  { %3240 = vmatpush.msra.mxu0 %v2239_v6  ;;  %3257 = vmatpush.msra.mxu1 %v2391_v7  ;;  %v2351_v3 = vld [vmem:[#allocation10 + $0x430] sm:$0xff]  ;;  %v2432_v6 = vld [vmem:[#allocation10 + $0x6b8] sm:$0xff]  ;;  %v2865_v7 = vadd.f32 %v2864_v44, %v2845_v62 }
 0x41a   :  { %3276 = vmatpush.msra.mxu2 %v2527_v8  ;;  %3293 = vmatpush.msra.mxu3 %v2679_v10  ;;  %v2487_v40 = vld [vmem:[#allocation10 + $0x870] sm:$0xff]  ;;  %v2944_v4 = vpop.f32.mrf.mxu1  ;;  %v2925_v8 = vadd.f32 %v2924_v60, %v2733_v55  ;;  %v2568_v10 = vld [vmem:[#allocation10 + $0xaf8] sm:$0xff] }
 0x41b   :  { %3241 = vmatpush.msra.mxu0 %v2231_v11  ;;  %3258 = vmatpush.msra.mxu1 %v2383_v13  ;;  %v2639_v29 = vld [vmem:[#allocation10 + $0xd30] sm:$0xff]  ;;  %v2720_v11 = vld [vmem:[#allocation10 + $0xfb8] sm:$0xff] }
 0x41c   :  { %3277 = vmatpush.msra.mxu2 %v2519_v14  ;;  %3294 = vmatpush.msra.mxu3 %v2671_v16  ;;  %v2479_v42 = vld [vmem:[#allocation10 + $0x830] sm:$0xff]  ;;  %v2272_v14 = vld [vmem:[#allocation10 + $0x1b8] sm:$0xff] }
 0x41d   :  { %3242 = vmatpush.msra.mxu0 %v2223_v18  ;;  %3259 = vmatpush.msra.mxu1 %v2375_v19  ;;  %v2631_v43 = vld [vmem:[#allocation10 + $0xcf0] sm:$0xff]  ;;  %v2424_v16 = vld [vmem:[#allocation10 + $0x678] sm:$0xff]  ;;  %v2885_v18 = vadd.f32 %v2884_v32, %v2865_v7  ;;  %v2945_v19 = vadd.f32 %v2944_v4, %v2925_v8  ;;  %v2734_v4 = vperm.slane %v6490_v9, 3 }
 0x41e   :  { %3278 = vmatpush.msra.mxu2 %v2511_v20  ;;  %3295 = vmatpush.msra.mxu3 %v2663_v22  ;;  %v2623_v46 = vld [vmem:[#allocation10 + $0xcb0] sm:$0xff]  ;;  %v2560_v20 = vld [vmem:[#allocation10 + $0xab8] sm:$0xff] }
 0x41f   :  { %3243 = vmatmul.f32.vlgmr.msra.gmra.mxu0 %v6445_v57  ;;  %3260 = vmatpush.msra.mxu1 %v2367_v24  ;;  %v2615_v50 = vld [vmem:[#allocation10 + $0xc70] sm:$0xff]  ;;  %v2712_v22 = vld [vmem:[#allocation10 + $0xf78] sm:$0xff]  ;;  %v2765_v24 = vadd.f32 %v6477_v17, %v2731_v0 }
 0x420   :  { %3307 = vmatpush.msrb.mxu0 %v2344_v58  ;;  %3279 = vmatpush.msra.mxu2 %v2503_v28  ;;  %v2607_v56 = vld [vmem:[#allocation10 + $0xc30] sm:$0xff]  ;;  %v2264_v58 = vld [vmem:[#allocation10 + $0x178] sm:$0xff] }
 0x421   :  { %3296 = vmatpush.msra.mxu3 %v2655_v1  ;;  %3261 = vmatpush.msra.mxu1 %v2359_v2  ;;  %v2416_v28 = vld [vmem:[#allocation10 + $0x638] sm:$0xff]  ;;  %v2905_v2 = vadd.f32 %v2904_v53, %v2885_v18 }
 0x422   :  { %3308 = vmatpush.msrb.mxu0 %v2336_v31  ;;  %3280 = vmatpush.msra.mxu2 %v2495_v33  ;;  %v2552_v33 = vld [vmem:[#allocation10 + $0xa78] sm:$0xff] }
 0x423   :  { %3297 = vmatpush.msra.mxu3 %v2647_v37  ;;  %3262 = vmatpush.msra.mxu1 %v2351_v3  ;;  %v2964_v13 = vpop.f32.mrf.mxu2  ;;  %v2704_v37 = vld [vmem:[#allocation10 + $0xf38] sm:$0xff]  ;;  %v2785_v3 = vadd.f32 %v6479_v23, %v2765_v24 }
 0x424   :  { %3309 = vmatpush.msrb.mxu0 %v2328_v39  ;;  %3281 = vmatpush.msra.mxu2 %v2487_v40  ;;  %v2965_v31 = vadd.f32 %v2964_v13, %v2945_v19  ;;  %v2256_v39 = vld [vmem:[#allocation10 + $0x138] sm:$0xff] }
 0x425   :  { %3298 = vmatpush.msra.mxu3 %v2639_v29  ;;  %3263 = vmatmul.f32.vlgmr.msra.gmra.mxu1 %v6448_v12  ;;  %v2408_v40 = vld [vmem:[#allocation10 + $0x5f8] sm:$0xff] }
 0x426   :  { %3310 = vmatpush.msrb.mxu0 %v2320_v41  ;;  %3327 = vmatpush.msrb.mxu1 %v2472_v21  ;;  %v2544_v29 = vld [vmem:[#allocation10 + $0xa38] sm:$0xff]  ;;  %v2805_v21 = vadd.f32 %v6481_v59, %v2785_v3 }
 0x427   :  { %3282 = vmatpush.msra.mxu2 %v2479_v42  ;;  %3299 = vmatpush.msra.mxu3 %v2631_v43  ;;  %v2696_v41 = vld [vmem:[#allocation10 + $0xef8] sm:$0xff]  ;;  %v3388_v43 = vsub.f32 0.0, %v2905_v2 }
 0x428   :  { %3283 = vmatmul.f32.vlgmr.msra.gmra.mxu2 %v6450_v15  ;;  %3311 = vmatpush.msrb.mxu0 %v2312_v35  ;;  %v2248_v25 = vld [vmem:[#allocation10 + $0xf8] sm:$0xff]  ;;  %v2825_v44 = vadd.f32 %v6484_v36, %v2805_v21 }
 0x429   :  { %3328 = vmatpush.msrb.mxu1 %v2464_v27  ;;  %3347 = vmatpush.msrb.mxu2 %v2600_v45  ;;  %v2400_v42 = vld [vmem:[#allocation10 + $0x5b8] sm:$0xff] }
 0x42a   :  { %3300 = vmatpush.msra.mxu3 %v2623_v46  ;;  %3312 = vmatpush.msrb.mxu0 %v2304_v47  ;;  %v2984_v1 = vpop.f32.mrf.mxu3  ;;  %v2536_v35 = vld [vmem:[#allocation10 + $0x9f8] sm:$0xff] }
 0x42b   :  { %3329 = vmatpush.msrb.mxu1 %v2456_v48  ;;  %3348 = vmatpush.msrb.mxu2 %v2592_v26  ;;  %v2985_v17 = vadd.f32 %v2984_v1, %v2965_v31  ;;  %v2688_v23 = vld [vmem:[#allocation10 + $0xeb8] sm:$0xff]  ;;  %v3397_v26 = vmul.f32 1.442695, %v3388_v43 }
 0x42c   :  { %3301 = vmatpush.msra.mxu3 %v2615_v50  ;;  %3313 = vmatpush.msrb.mxu0 %v2296_v52  ;;  %v2240_v27 = vld [vmem:[#allocation10 + $0xb8] sm:$0xff]  ;;  %v3387_v52 = vsub.f32 0.0, %v2825_v44 }
 0x42d   :  { %3330 = vmatpush.msrb.mxu1 %v2448_v34  ;;  %3349 = vmatpush.msrb.mxu2 %v2584_v54  ;;  %v2392_v45 = vld [vmem:[#allocation10 + $0x578] sm:$0xff]  ;;  %v3389_v46 = vsub.f32 0.0, %v2985_v17  ;;  %3656 = vpow2.f32 %v3397_v26 }
 0x42e   :  { %3302 = vmatpush.msra.mxu3 %v2607_v56  ;;  %3314 = vmatpush.msrb.mxu0 %v2288_v51  ;;  %v2528_v47 = vld [vmem:[#allocation10 + $0x9b8] sm:$0xff] }
 0x42f   :  { %3303 = vmatmul.f32.vlgmr.msra.gmra.mxu3 %v6455_v30  ;;  %3331 = vmatpush.msrb.mxu1 %v2440_v38  ;;  %v2680_v59 = vld [vmem:[#allocation10 + $0xe78] sm:$0xff]  ;;  %v3399_v34 = vmul.f32 1.442695, %v3389_v46  ;;  %v3395_v38 = vmul.f32 1.442695, %v3387_v52 }
 0x430   :  { %3350 = vmatpush.msrb.mxu2 %v2576_v61  ;;  %3367 = vmatpush.msrb.mxu3 %v2728_v63  ;;  %v2232_v32 = vld [vmem:[#allocation10 + $0x78] sm:$0xff] }
 0x431   :  { %3315 = vmatpush.msrb.mxu0 %v2280_v5  ;;  %3332 = vmatpush.msrb.mxu1 %v2432_v6  ;;  %v2384_v48 = vld [vmem:[#allocation10 + $0x538] sm:$0xff]  ;;  %3658 = vpow2.f32 %v3399_v34 }
 0x432   :  { %3351 = vmatpush.msrb.mxu2 %v2568_v10  ;;  %3368 = vmatpush.msrb.mxu3 %v2720_v11  ;;  %v2520_v49 = vld [vmem:[#allocation10 + $0x978] sm:$0xff]  ;;  %3660 = vpow2.f32 %v3395_v38 }
 0x433   :  { %3316 = vmatpush.msrb.mxu0 %v2272_v14  ;;  %3333 = vmatpush.msrb.mxu1 %v2424_v16  ;;  %v2672_v50 = vld [vmem:[#allocation10 + $0xe38] sm:$0xff]  ;;  %v3657_v8 = vpop.eup %3656 }
 0x434   :  { %3352 = vmatpush.msrb.mxu2 %v2560_v20  ;;  %3369 = vmatpush.msrb.mxu3 %v2712_v22  ;;  %v2224_v36 = vld [vmem:[#allocation10 + $0x38] sm:$0xff]  ;;  %v3412_v18 = vadd.f32 1.0, %v3657_v8 }
 0x435   :  { %3317 = vmatpush.msrb.mxu0 %v2264_v58  ;;  %3334 = vmatpush.msrb.mxu1 %v2416_v28  ;;  %v2376_v53 = vld [vmem:[#allocation10 + $0x4f8] sm:$0xff] }
 0x436   :  { %3353 = vmatpush.msrb.mxu2 %v2552_v33  ;;  %3370 = vmatpush.msrb.mxu3 %v2704_v37  ;;  %v2512_v54 = vld [vmem:[#allocation10 + $0x938] sm:$0xff]  ;;  %v3004_v7 = vpop.f32.mrf.mxu0  ;;  %3662 = vrcp.f32 %v3412_v18  ;;  %v3445_v46 = vand.u32 2147483648, %v3412_v18  ;;  %vm3439_vm2 = vweird.f32 %v3412_v18 }
 0x437   :  { %3318 = vmatpush.msrb.mxu0 %v2256_v39  ;;  %3335 = vmatpush.msrb.mxu1 %v2408_v40  ;;  %v2664_v55 = vld [vmem:[#allocation10 + $0xdf8] sm:$0xff]  ;;  %v3659_v13 = vpop.eup %3658  ;;  %v3005_v14 = vadd.f32 %v3004_v7, %v2734_v4 }
 0x438   :  { %3354 = vmatpush.msrb.mxu2 %v2544_v29  ;;  %3371 = vmatpush.msrb.mxu3 %v2696_v41  ;;  %v2368_v56 = vld [vmem:[#allocation10 + $0x4b8] sm:$0xff]  ;;  %v3661_v24 = vpop.eup %3660  ;;  %v6505_v58 = vadd.f32 1.0, %v3659_v13  ;;  %v3446_v52 = vor.u32 1.1754944e-38, %v3445_v46 }
 0x439   :  { %3319 = vmatpush.msrb.mxu0 %v2248_v25  ;;  %3336 = vmatpush.msrb.mxu1 %v2400_v42  ;;  %v2504_v51 = vld [vmem:[#allocation10 + $0x8f8] sm:$0xff]  ;;  %v6507_v31 = vadd.f32 1.0, %v3661_v24 }
 0x43a   :  { %3355 = vmatpush.msrb.mxu2 %v2536_v35  ;;  %3372 = vmatpush.msrb.mxu3 %v2688_v23  ;;  %v2656_v60 = vld [vmem:[#allocation10 + $0xdb8] sm:$0xff]  ;;  %3664 = vrcp.f32 %v6505_v58  ;;  %vm3454_vm6 = vweird.f32 %v6505_v58  ;;  %v3458_v26 = vand.u32 2147483647, %v6505_v58 }
 0x43b   :  { %3320 = vmatpush.msrb.mxu0 %v2240_v27  ;;  %3337 = vmatpush.msrb.mxu1 %v2392_v45  ;;  %v2360_v62 = vld [vmem:[#allocation10 + $0x478] sm:$0xff]  ;;  %3666 = vrcp.f32 %v6507_v31  ;;  %v3443_v45 = vand.u32 2147483647, %v3412_v18  ;;  %vm3424_vm10 = vweird.f32 %v6507_v31 }
 0x43c   :  { %3356 = vmatpush.msrb.mxu2 %v2528_v47  ;;  %3373 = vmatpush.msrb.mxu3 %v2680_v59  ;;  %v2496_v61 = vld [vmem:[#allocation10 + $0x8b8] sm:$0xff]  ;;  %v3663_v37 = vpop.eup %3662  ;;  %vm3459_vm13 = vcmp.eq.f32.partialorder %v3458_v26, 8.507059e+37 }
 0x43d   :  { %3321 = vmatpush.msrb.mxu0 %v2232_v32  ;;  %3338 = vmatpush.msrb.mxu1 %v2384_v48  ;;  %v2648_v63 = vld [vmem:[#allocation10 + $0xd78] sm:$0xff]  ;;  %v3435_v39 = vmul.f32 %v3663_v37, %v3412_v18  ;;  %vm3440_vm1 = vweird.f32 %v3663_v37  ;;  %v3460_v48 = vand.u32 2147483648, %v6505_v58  ;;  %vm3444_vm8 = vcmp.eq.f32.partialorder %v3443_v45, 8.507059e+37 }
 0x43e   :  { %3357 = vmatpush.msrb.mxu2 %v2520_v49  ;;  %3374 = vmatpush.msrb.mxu3 %v2672_v50  ;;  %v2352_v0 = vld [vmem:[#allocation10 + $0x438] sm:$0xff]  ;;  %vm6518_vm4 = vmor %vm3439_vm2, %vm3440_vm1  ;;  %vm3554_vm1 = vcmask 1045508  }
 0x43f   :  { %3322 = vmatpush.msrb.mxu0 %v2224_v36  ;;  %3339 = vmatpush.msrb.mxu1 %v2376_v53  ;;  %v2488_v5 = vld [vmem:[#allocation10 + $0x878] sm:$0xff]  ;;  %v3436_v41 = vsub.f32 1.0, %v3435_v39 }
 0x440   :  { %3358 = vmatpush.msrb.mxu2 %v2512_v54  ;;  %3375 = vmatpush.msrb.mxu3 %v2664_v55  ;;  %v2640_v6 = vld [vmem:[#allocation10 + $0xd38] sm:$0xff]  ;;  %v3665_v3 = vpop.eup %3664 }
 0x441   :  { %3323 = vmatmul.f32.vlgmr.msrb.gmra.mxu0 %v6445_v57  ;;  %3340 = vmatpush.msrb.mxu1 %v2368_v56  ;;  %v2480_v10 = vld [vmem:[#allocation10 + $0x838] sm:$0xff]  ;;  %v3024_v57 = vpop.f32.mrf.mxu1  ;;  %v6512_v40 = vpop.eup %3666  ;;  %v3450_v17 = vmul.f32 %v3665_v3, %v6505_v58  ;;  %vm3455_vm3 = vweird.f32 %v3665_v3 }
 0x442   :  { %3359 = vmatpush.msrb.mxu2 %v2504_v51  ;;  %3376 = vmatpush.msrb.mxu3 %v2656_v60  ;;  %v2632_v11 = vld [vmem:[#allocation10 + $0xcf8] sm:$0xff]  ;;  %v3025_v20 = vadd.f32 %v3024_v57, %v3005_v14  ;;  %v3420_v21 = vmul.f32 %v6512_v40, %v6507_v31  ;;  %vm3425_vm5 = vweird.f32 %v6512_v40  ;;  %vm6528_vm7 = vmor %vm3454_vm6, %vm3455_vm3  ;;  %v3461_v51 = vor.u32 1.1754944e-38, %v3460_v48 }
 0x443   :  { %3341 = vmatpush.msrb.mxu1 %v2360_v62  ;;  %v2624_v16 = vld [vmem:[#allocation10 + $0xcb8] sm:$0xff]  ;;  %v3451_v42 = vsub.f32 1.0, %v3450_v17  ;;  %v3430_v60 = vand.u32 2147483648, %v6507_v31  ;;  %vm6539_vm12 = vmor %vm3424_vm10, %vm3425_vm5  ;;  %vm3556_vm3 = vcmask 1043456   ;;  %v2738_v48 = vperm.slane %v6490_v9, 7 }
 0x444   :  { %3360 = vmatpush.msrb.mxu2 %v2496_v61  ;;  %3377 = vmatpush.msrb.mxu3 %v2648_v63  ;;  %v2616_v22 = vld [vmem:[#allocation10 + $0xc78] sm:$0xff]  ;;  %v3421_v43 = vsub.f32 1.0, %v3420_v21  ;;  %v3428_v61 = vand.u32 2147483647, %v6507_v31 }
 0x445   :  { %3342 = vmatpush.msrb.mxu1 %v2352_v0  ;;  %v3044_v19 = vpop.f32.mrf.mxu2  ;;  %v2608_v28 = vld [vmem:[#allocation10 + $0xc38] sm:$0xff]  ;;  %v3452_v35 = vmul.f32 %v3665_v3, %v3451_v42  ;;  %v3431_v8 = vor.u32 1.1754944e-38, %v3430_v60 }
 0x446   :  { %3361 = vmatpush.msrb.mxu2 %v2488_v5  ;;  %3378 = vmatpush.msrb.mxu3 %v2640_v6  ;;  %v3045_v1 = vadd.f32 %v3044_v19, %v3025_v20  ;;  %v3422_v27 = vmul.f32 %v6512_v40, %v3421_v43  ;;  %vm3429_vm2 = vcmp.eq.f32.partialorder %v3428_v61, 8.507059e+37 }
 0x447   :  { %3343 = vmatmul.f32.vlgmr.msrb.gmra.mxu1 %v6448_v12  ;;  %v3453_v59 = vadd.f32 %v3665_v3, %v3452_v35 }
 0x448   :  { %3362 = vmatpush.msrb.mxu2 %v2480_v10  ;;  %3379 = vmatpush.msrb.mxu3 %v2632_v11  ;;  %v3423_v34 = vadd.f32 %v6512_v40, %v3422_v27 }
 0x449   :  { %3363 = vmatmul.f32.vlgmr.msrb.gmra.mxu2 %v6450_v15  ;;  %v3457_v56 = vsel %vm6528_vm7, %v3665_v3, %v3453_v59 }
 0x44a   :  { %3380 = vmatpush.msrb.mxu3 %v2624_v16  ;;  %v3462_v4 = vsel %vm3459_vm13, %v3461_v51, %v3457_v56  ;;  %v3427_v5 = vsel %vm6539_vm12, %v6512_v40, %v3423_v34 }
 0x44b   :  { %v3548_v11 = vrot.slane %v3462_v4, 4  ;;  %v3432_v13 = vsel %vm3429_vm2, %v3431_v8, %v3427_v5 }
 0x44c   :  { %3381 = vmatpush.msrb.mxu3 %v2616_v22  ;;  %v3064_v2 = vpop.f32.mrf.mxu3 }
 0x44d   :  { %v3065_v12 = vadd.f32 %v3064_v2, %v3045_v1  ;;  %v2736_v2 = vperm.slane %v6490_v9, 5 }
 0x44e   :  { %3382 = vmatpush.msrb.mxu3 %v2608_v28 }
 0x44f   :  { %3383 = vmatmul.f32.vlgmr.msrb.gmra.mxu3 %v6455_v30  ;;  %v3390_v33 = vsub.f32 0.0, %v3065_v12  ;;  %v3437_v30 = vmul.f32 %v3663_v37, %v3436_v41  ;;  %v2737_v12 = vperm.slane %v6490_v9, 6 }
 0x451   :  { %v3401_v15 = vmul.f32 1.442695, %v3390_v33  ;;  %v3438_v23 = vadd.f32 %v3663_v37, %v3437_v30 }
 0x453   :  { %3668 = vpow2.f32 %v3401_v15  ;;  %v3442_v50 = vsel %vm6518_vm4, %v3663_v37, %v3438_v23  ;;  %v2735_v37 = vperm.slane %v6490_v9, 4 }
 0x454   :  { %v3447_v38 = vsel %vm3444_vm8, %v3446_v52, %v3442_v50 }
 0x455   :  { %v3547_v7 = vrot.slane %v3447_v38, 6 }
 0x457   :  { %v3553_v14 = vsel %vm1899_vm0, %v3432_v13, %v3547_v7 }
 0x458   :  { %v3084_v19 = vpop.f32.mrf.mxu0 }
 0x459   :  { %v3669_v29 = vpop.eup %3668  ;;  %v3085_v21 = vadd.f32 %v3084_v19, %v2735_v37 }
 0x45a   :  { %v3414_v25 = vadd.f32 1.0, %v3669_v29 }
 0x45c   :  { %3670 = vrcp.f32 %v3414_v25  ;;  %v3475_v53 = vand.u32 2147483648, %v3414_v25  ;;  %v3473_v55 = vand.u32 2147483647, %v3414_v25  ;;  %vm3469_vm11 = vweird.f32 %v3414_v25 }
 0x45e   :  { %v3476_v0 = vor.u32 1.1754944e-38, %v3475_v53  ;;  %vm3474_vm15 = vcmp.eq.f32.partialorder %v3473_v55, 8.507059e+37  ;;  %v3104_v20 = vpop.f32.mrf.mxu1 }
 0x45f   :  { %v3105_v43 = vadd.f32 %v3104_v20, %v3085_v21 }
 0x462   :  { %v3671_v44 = vpop.eup %3670 }
 0x463   :  { %v3465_v47 = vmul.f32 %v3671_v44, %v3414_v25  ;;  %vm3470_vm9 = vweird.f32 %v3671_v44 }
 0x464   :  { %vm3471_vm14 = vmor %vm3469_vm11, %vm3470_vm9 }
 0x465   :  { %v3466_v49 = vsub.f32 1.0, %v3465_v47 }
 0x467   :  { %v3467_v54 = vmul.f32 %v3671_v44, %v3466_v49  ;;  %v3124_v22 = vpop.f32.mrf.mxu2 }
 0x468   :  { %v3125_v23 = vadd.f32 %v3124_v22, %v3105_v43 }
 0x469   :  { %v3468_v63 = vadd.f32 %v3671_v44, %v3467_v54 }
 0x46b   :  { %v3472_v6 = vsel %vm3471_vm14, %v3671_v44, %v3468_v63 }
 0x46c   :  { %v3477_v10 = vsel %vm3474_vm15, %v3476_v0, %v3472_v6 }
 0x46d   :  { %v3549_v57 = vrot.slane %v3477_v10, 2 }
 0x46e   :  { %v3144_v24 = vpop.f32.mrf.mxu3 }
 0x46f   :  { %v3555_v16 = vsel %vm3554_vm1, %v3548_v11, %v3549_v57  ;;  %v3145_v27 = vadd.f32 %v3144_v24, %v3125_v23 }
 0x470   :  { %v3557_v18 = vsel %vm3556_vm3, %v3553_v14, %v3555_v16 }
 0x471   :  { %3563 = vst [vmem:[#allocation11] sm:$0xff] %v3557_v18  ;;  %v3391_v47 = vsub.f32 0.0, %v3145_v27 }
 0x473   :  { %v3403_v32 = vmul.f32 1.442695, %v3391_v47 }
 0x47a   :  { %v3164_v58 = vpop.f32.mrf.mxu0 }
 0x47b   :  { %v3165_v15 = vadd.f32 %v3164_v58, %v2736_v2 }
 0x480   :  { %v3184_v28 = vpop.f32.mrf.mxu1 }
 0x481   :  { %v3185_v39 = vadd.f32 %v3184_v28, %v3165_v15 }
 0x489   :  { %v3204_v1 = vpop.f32.mrf.mxu2 }
 0x48a   :  { %v3205_v29 = vadd.f32 %v3204_v1, %v3185_v39 }
 0x490   :  { %v3224_v31 = vpop.f32.mrf.mxu3 }
 0x491   :  { %v3225_v42 = vadd.f32 %v3224_v31, %v3205_v29 }
 0x493   :  { %v3392_v44 = vsub.f32 0.0, %v3225_v42 }
 0x495   :  { %v3405_v46 = vmul.f32 1.442695, %v3392_v44 }
 0x497   :  { %3672 = vpow2.f32 %v3405_v46 }
 0x49c   :  { %v3244_v33 = vpop.f32.mrf.mxu0 }
 0x49d   :  { %v3245_v40 = vadd.f32 %v3244_v33, %v2737_v12  ;;  %v3673_v49 = vpop.eup %3672 }
 0x49e   :  { %v3416_v53 = vadd.f32 1.0, %v3673_v49 }
 0x4a0   :  { %v3503_v22 = vand.u32 2147483647, %v3416_v53  ;;  %v3505_v24 = vand.u32 2147483648, %v3416_v53  ;;  %vm3499_vm5 = vweird.f32 %v3416_v53 }
 0x4a2   :  { %v3264_v3 = vpop.f32.mrf.mxu1  ;;  %v3506_v15 = vor.u32 1.1754944e-38, %v3505_v24  ;;  %vm3504_vm11 = vcmp.eq.f32.partialorder %v3503_v22, 8.507059e+37 }
 0x4a3   :  { %v3265_v41 = vadd.f32 %v3264_v3, %v3245_v40 }
 0x4ab   :  { %v3284_v17 = vpop.f32.mrf.mxu2 }
 0x4ac   :  { %v3285_v30 = vadd.f32 %v3284_v17, %v3265_v41 }
 0x4b2   :  { %v3304_v25 = vpop.f32.mrf.mxu3 }
 0x4b3   :  { %v3305_v35 = vadd.f32 %v3304_v25, %v3285_v30 }
 0x4b5   :  { %v3393_v45 = vsub.f32 0.0, %v3305_v35 }
 0x4b7   :  { %v3407_v59 = vmul.f32 1.442695, %v3393_v45 }
 0x4b9   :  { %3674 = vpow2.f32 %v3407_v59 }
 0x4ba   :  { %3676 = vpow2.f32 %v3403_v32 }
 0x4bb   :  { %3678 = vrcp.f32 %v3416_v53 }
 0x4be   :  { %v3324_v26 = vpop.f32.mrf.mxu0 }
 0x4bf   :  { %v3675_v52 = vpop.eup %3674  ;;  %v3325_v36 = vadd.f32 %v3324_v26, %v2738_v48 }
 0x4c0   :  { %v3677_v55 = vpop.eup %3676  ;;  %v3417_v56 = vadd.f32 1.0, %v3675_v52 }
 0x4c1   :  { %v6563_v38 = vadd.f32 1.0, %v3677_v55  ;;  %v3679_v63 = vpop.eup %3678 }
 0x4c2   :  { %3680 = vrcp.f32 %v3417_v56  ;;  %v3495_v4 = vmul.f32 %v3679_v63, %v3416_v53  ;;  %vm3500_vm4 = vweird.f32 %v3679_v63  ;;  %v3520_v2 = vand.u32 2147483648, %v3417_v56 }
 0x4c3   :  { %3682 = vrcp.f32 %v6563_v38  ;;  %vm6571_vm7 = vmor %vm3499_vm5, %vm3500_vm4  ;;  %vm3514_vm9 = vweird.f32 %v3417_v56  ;;  %v3518_v31 = vand.u32 2147483647, %v3417_v56  ;;  %vm3484_vm13 = vweird.f32 %v6563_v38 }
 0x4c4   :  { %v3344_v50 = vpop.f32.mrf.mxu1  ;;  %v3496_v8 = vsub.f32 1.0, %v3495_v4  ;;  %v3521_v41 = vor.u32 1.1754944e-38, %v3520_v2  ;;  %v3490_v21 = vand.u32 2147483648, %v6563_v38  ;;  %v3488_v30 = vand.u32 2147483647, %v6563_v38 }
 0x4c5   :  { %v3345_v54 = vadd.f32 %v3344_v50, %v3325_v36  ;;  %vm3519_vm2 = vcmp.eq.f32.partialorder %v3518_v31, 8.507059e+37 }
 0x4c6   :  { %v3497_v13 = vmul.f32 %v3679_v63, %v3496_v8  ;;  %v3491_v46 = vor.u32 1.1754944e-38, %v3490_v21 }
 0x4c8   :  { %v3681_v0 = vpop.eup %3680  ;;  %v3498_v18 = vadd.f32 %v3679_v63, %v3497_v13 }
 0x4c9   :  { %v6566_v5 = vpop.eup %3682  ;;  %v3510_v6 = vmul.f32 %v3681_v0, %v3417_v56  ;;  %vm3515_vm6 = vweird.f32 %v3681_v0 }
 0x4ca   :  { %v3480_v10 = vmul.f32 %v6566_v5, %v6563_v38  ;;  %vm3485_vm8 = vweird.f32 %v6566_v5  ;;  %v3502_v33 = vsel %vm6571_vm7, %v3679_v63, %v3498_v18  ;;  %vm6578_vm10 = vmor %vm3514_vm9, %vm3515_vm6  ;;  %vm3489_vm6 = vcmp.eq.f32.partialorder %v3488_v30, 8.507059e+37 }
 0x4cb   :  { %v3511_v57 = vsub.f32 1.0, %v3510_v6  ;;  %v3507_v25 = vsel %vm3504_vm11, %v3506_v15, %v3502_v33  ;;  %vm6589_vm15 = vmor %vm3484_vm13, %vm3485_vm8 }
 0x4cc   :  { %v3364_v34 = vpop.f32.mrf.mxu2  ;;  %v3481_v14 = vsub.f32 1.0, %v3480_v10  ;;  %v3550_v45 = vrot.slane %v3507_v25, 6 }
 0x4cd   :  { %v3365_v51 = vadd.f32 %v3364_v34, %v3345_v54  ;;  %v3512_v16 = vmul.f32 %v3681_v0, %v3511_v57 }
 0x4ce   :  { %v3482_v20 = vmul.f32 %v6566_v5, %v3481_v14 }
 0x4cf   :  { %v3513_v28 = vadd.f32 %v3681_v0, %v3512_v16 }
 0x4d0   :  { %v3483_v39 = vadd.f32 %v6566_v5, %v3482_v20 }
 0x4d1   :  { %v3517_v29 = vsel %vm6578_vm10, %v3681_v0, %v3513_v28 }
 0x4d2   :  { %v3384_v60 = vpop.f32.mrf.mxu3  ;;  %v3522_v23 = vsel %vm3519_vm2, %v3521_v41, %v3517_v29  ;;  %v3487_v44 = vsel %vm6589_vm15, %v6566_v5, %v3483_v39 }
 0x4d3   :  { %v3385_v62 = vadd.f32 %v3384_v60, %v3365_v51  ;;  %v3551_v59 = vrot.slane %v3522_v23, 4  ;;  %v3492_v48 = vsel %vm3489_vm6, %v3491_v46, %v3487_v44 }
 0x4d4   :  { %v3558_v26 = vsel %vm1899_vm0, %v3492_v48, %v3550_v45 }
 0x4d5   :  { %v3394_v61 = vsub.f32 0.0, %v3385_v62 }
 0x4d7   :  { %v3409_v9 = vmul.f32 1.442695, %v3394_v61 }
 0x4d9   :  { %3684 = vpow2.f32 %v3409_v9 }
 0x4df   :  { %v3685_v7 = vpop.eup %3684 }
 0x4e0   :  { %v3418_v11 = vadd.f32 1.0, %v3685_v7 }
 0x4e2   :  { %3686 = vrcp.f32 %v3418_v11  ;;  %v3535_v3 = vand.u32 2147483648, %v3418_v11  ;;  %v3533_v17 = vand.u32 2147483647, %v3418_v11  ;;  %vm3529_vm14 = vweird.f32 %v3418_v11 }
 0x4e4   :  { %v3536_v35 = vor.u32 1.1754944e-38, %v3535_v3  ;;  %vm3534_vm5 = vcmp.eq.f32.partialorder %v3533_v17, 8.507059e+37 }
 0x4e8   :  { %v3687_v19 = vpop.eup %3686 }
 0x4e9   :  { %v3525_v58 = vmul.f32 %v3687_v19, %v3418_v11  ;;  %vm3530_vm12 = vweird.f32 %v3687_v19 }
 0x4ea   :  { %vm3531_vm4 = vmor %vm3529_vm14, %vm3530_vm12 }
 0x4eb   :  { %v3526_v12 = vsub.f32 1.0, %v3525_v58 }
 0x4ed   :  { %v3527_v40 = vmul.f32 %v3687_v19, %v3526_v12 }
 0x4ef   :  { %v3528_v43 = vadd.f32 %v3687_v19, %v3527_v40 }
 0x4f1   :  { %v3532_v27 = vsel %vm3531_vm4, %v3687_v19, %v3528_v43 }
 0x4f2   :  { %v3537_v47 = vsel %vm3534_vm5, %v3536_v35, %v3532_v27 }
 0x4f3   :  { %v3552_v32 = vrot.slane %v3537_v47, 2 }
 0x4f5   :  { %v3559_v49 = vsel %vm3554_vm1, %v3551_v59, %v3552_v32 }
 0x4f6   :  { %v3560_v50 = vsel %vm3556_vm3, %v3558_v26, %v3559_v49 }
 0x4f7   :  { %3564 = vst [vmem:[#allocation11 + $0x8] sm:$0xff] %v3560_v50 }
 0x4f8   :  { %3583 = dma.vmem_to_hbm [thread:$0]  %s3579_s13, 256, %s3581_s26, [#allocation4]  }
 0x4f9   :  { %3918 = dma.done.wait [#allocation4], 256  }
 0x4fa   :  { %3919 = vsyncadd [#allocation4], 4294967040 }
 0x4fb   :  { %3920 = dma.done.wait [#allocation13], 128  }
 0x4fc   :  { %3921 = vsyncadd [#allocation13], 4294967168 }
 0x4fd   :  { %3922 = dma.done.wait [#allocation16], 64  }
 0x4fe   :  { %3923 = vsyncadd [#allocation16], 4294967232 }
 0x4ff   :  { %3633 = vsyncpa [#allocation3], 1 }
 0x500   :  { %3634 = vsyncpa [#allocation6], 1 }
 0x501   :  { %3635 = vsyncpa [#allocation9], 1 }
 0x502   :  { %3636 = vsyncpa [#allocation4], 1 }
 0x503   :  { %3637 = vsyncpa [#allocation13], 1 }
 0x504   :  { %3638 = vsyncpa [#allocation16], 1 }

</bundles_post_ra>
